<compile_context>
chip_gen: v6e
topology: v6e:2x2x1
jax: 0.10.0
libtpu: 0.0.40
codegen_flags: <defaults>
</compile_context>

<pallas_src>
import functools
import math

import jax
import jax.numpy as jnp
from jax import lax
from jax.experimental import pallas as pl
from jax.experimental.pallas import tpu as pltpu

HIDDEN = 512  # fixed by the module definition


def _round_up(v, m):
    return ((v + m - 1) // m) * m


def _gelu(x, approximate):
    if approximate:
        # tanh approximation -> transcendental routes to the EUP slot.
        c = math.sqrt(2.0 / math.pi)
        return 0.5 * x * (1.0 + jnp.tanh(c * (x + 0.044715 * x * x * x)))
    # Exact GELU: 0.5 * x * (1 + erf(x / sqrt(2)))  (matches F.gelu default).
    return 0.5 * x * (1.0 + lax.erf(x * (1.0 / math.sqrt(2.0))))


# --------------------------------------------------------------------------
# Kernels
# --------------------------------------------------------------------------
def _hidden_kernel(x_ref, w0_ref, b0_ref, w1_ref, b1_ref, w2_ref, b2_ref,
                   w3_ref, b3_ref, h_ref, *, approximate):
    """Grid = (batch tile i,).  4 matmuls + GELUs; H stored in compute dtype.

    MXU operands are in the weight dtype (bf16 or f32); accumulation and GELU
    math stay in f32.  Storing H in the compute dtype is numerically identical
    to casting at the next dot, and removes per-step astype filler in pass 2.
    """
    cdt = w0_ref.dtype
    h = _gelu(jnp.dot(x_ref[...], w0_ref[...],
                      preferred_element_type=jnp.float32) + b0_ref[...], approximate)
    h = _gelu(jnp.dot(h.astype(cdt), w1_ref[...],
                      preferred_element_type=jnp.float32) + b1_ref[...], approximate)
    h = _gelu(jnp.dot(h.astype(cdt), w2_ref[...],
                      preferred_element_type=jnp.float32) + b2_ref[...], approximate)
    h = _gelu(jnp.dot(h.astype(cdt), w3_ref[...],
                      preferred_element_type=jnp.float32) + b3_ref[...], approximate)
    h_ref[...] = h.astype(h_ref.dtype)


def _output_kernel(h_ref, w4_ref, b4_ref, o_ref, *, approximate):
    """Grid = (output column tile j OUTER, batch tile i INNER).

    W4's block index depends only on j, so within a j-step the column tile is
    not re-DMA'd while i sweeps every batch tile: W4 is read from HBM once.
    """
    y = jnp.dot(h_ref[...], w4_ref[...],
                preferred_element_type=jnp.float32) + b4_ref[...]
    o_ref[...] = _gelu(y, approximate).astype(o_ref.dtype)


# --------------------------------------------------------------------------
# One-time parameter preparation (hoisted out of the per-call path)
# --------------------------------------------------------------------------
def _pick_out_tile(dim2_128, req):
    """Choose a lane-dense output tile.  Prefer a multiple of 128 that evenly
    divides the 128-padded output width (zero dead columns); otherwise fall
    back to the requested tile (padding happens once, at prepare time)."""
    if dim2_128 <= req:
        return dim2_128
    lanes, req_l = dim2_128 // 128, req // 128
    for t in range(req_l, max(req_l // 2, 1) - 1, -1):
        if lanes % t == 0:
            return t * 128
    return req


def prepare_model(params, *, compute_dtype=jnp.bfloat16, out_tile=2048):
    """Pad / cast the weights once (not per call).

    params: list of (W, b), W shaped (in_features, out_features), b (1, out).
    compute_dtype: MXU operand dtype (bf16 default); accumulation is f32.
    """
    (w0, b0), (w1, b1), (w2, b2), (w3, b3), (w4, b4) = params
    dim_mod1, dim_mod2 = w0.shape[0], w4.shape[1]

    dim1_p = _round_up(dim_mod1, 128)              # contraction dim of layer 0
    dim2_128 = _round_up(dim_mod2, 128)
    out_tile = _pick_out_tile(
        dim2_128, max(128, _round_up(min(out_tile, dim2_128), 128)))
    dim2_p = _round_up(dim2_128, out_tile)

    cast = lambda w: w.astype(compute_dtype)
    return dict(
        dim_mod1=dim_mod1, dim_mod2=dim_mod2,
        dim1_p=dim1_p, dim2_p=dim2_p, out_tile=out_tile,
        compute_dtype=jnp.dtype(compute_dtype),
        w0=cast(jnp.pad(w0, ((0, dim1_p - dim_mod1), (0, 0)))),
        w1=cast(w1), w2=cast(w2), w3=cast(w3),
        w4=cast(jnp.pad(w4, ((0, 0), (0, dim2_p - dim_mod2)))),
        # Biases stay f32 (added after the f32 MXU accumulation).
        b0=b0.astype(jnp.float32), b1=b1.astype(jnp.float32),
        b2=b2.astype(jnp.float32), b3=b3.astype(jnp.float32),
        b4=jnp.pad(b4.astype(jnp.float32), ((0, 0), (0, dim2_p - dim_mod2))),
    )


# --------------------------------------------------------------------------
# Forward pass
# --------------------------------------------------------------------------
def model_regression_adt2gex(x, prepared, *, batch_tile=None,
                             out_dtype=jnp.float32,
                             gelu_approximate=False,
                             vmem_limit_bytes=None):
    """Fused forward pass.  x: (N, dim_mod1) float32; prepared: prepare_model()."""
    N, dim_mod1 = x.shape
    assert dim_mod1 == prepared["dim_mod1"], "dim_mod1 mismatch with prepared params"
    cdt = prepared["compute_dtype"]
    dim1_p = prepared["dim1_p"]
    dim2_p = prepared["dim2_p"]
    out_tile = prepared["out_tile"]
    dim_mod2 = prepared["dim_mod2"]

    # Memory-bound on every current chip: big batch tiles amortize H streaming
    # and per-grid-step overhead.  Cap + 16-align for tiny batches (bf16 packing).
    if batch_tile is None:
        batch_tile = 512
    batch_tile = _round_up(min(batch_tile, _round_up(N, 16)), 16)
    n_p = _round_up(N, batch_tile)
    n_i = n_p // batch_tile
    n_j = dim2_p // out_tile

    if vmem_limit_bytes is None:
        cb = cdt.itemsize
        ob = jnp.dtype(out_dtype).itemsize
        # Double-buffered pipeline blocks + headroom for f32 GELU temps.
        k2 = 2 * (batch_tile * HIDDEN * cb + HIDDEN * out_tile * cb
                  + out_tile * 4 + batch_tile * out_tile * ob)
        k2 += 6 * batch_tile * out_tile * 4
        k1 = (2 * (batch_tile * dim1_p * cb + batch_tile * HIDDEN * cb)
              + 2 * (dim1_p + 3 * HIDDEN) * HIDDEN * cb
              + 8 * batch_tile * HIDDEN * 4)
        kind = jax.devices()[0].device_kind.lower()
        # v4/v5/v6 have 128 MiB VMEM per TC; v7x (and unknown) assumed 64 MiB.
        cap = (100 << 20) if any(v in kind for v in ("v4", "v5", "v6")) else (56 << 20)
        vmem_limit_bytes = min(cap, max(32 << 20, int(1.2 * max(k1, k2))))

    # Per-call work on x only (tiny vs. the output): zero-pad + cast.
    xp = jnp.pad(x, ((0, n_p - N), (0, dim1_p - dim_mod1))).astype(cdt)

    hidden_k = functools.partial(_hidden_kernel, approximate=gelu_approximate)
    output_k = functools.partial(_output_kernel, approximate=gelu_approximate)

    def const(shape):
        # Whole-array block with a constant index: Pallas does not re-DMA
        # blocks whose index does not change across grid steps.
        return pl.BlockSpec(shape, lambda i: (0,) * len(shape))

    # --- Pass 1: H = gelu(gelu(gelu(gelu(x@W0+b0)@W1+b1)@W2+b2)@W3+b3) -----
    h = pl.pallas_call(
        hidden_k,
        out_shape=jax.ShapeDtypeStruct((n_p, HIDDEN), cdt),
        grid=(n_i,),
        in_specs=[
            pl.BlockSpec((batch_tile, dim1_p), lambda i: (i, 0)),
            const(prepared["w0"].shape), const(prepared["b0"].shape),
            const(prepared["w1"].shape), const(prepared["b1"].shape),
            const(prepared["w2"].shape), const(prepared["b2"].shape),
            const(prepared["w3"].shape), const(prepared["b3"].shape),
        ],
        out_specs=pl.BlockSpec((batch_tile, HIDDEN), lambda i: (i, 0)),
        compiler_params=pltpu.CompilerParams(
            dimension_semantics=("parallel",),
            vmem_limit_bytes=vmem_limit_bytes),
    )(xp, prepared["w0"], prepared["b0"], prepared["w1"], prepared["b1"],
      prepared["w2"], prepared["b2"], prepared["w3"], prepared["b3"])

    # --- Pass 2: out = gelu(H @ W4 + b4); W4 column tiles on the OUTER axis --
    out_p = pl.pallas_call(
        output_k,
        out_shape=jax.ShapeDtypeStruct((n_p, dim2_p), out_dtype),
        grid=(n_j, n_i),
        in_specs=[
            pl.BlockSpec((batch_tile, HIDDEN), lambda j, i: (i, 0)),
            pl.BlockSpec((HIDDEN, out_tile), lambda j, i: (0, j)),
            pl.BlockSpec((1, out_tile), lambda j, i: (0, j)),
        ],
        out_specs=pl.BlockSpec((batch_tile, out_tile), lambda j, i: (i, j)),
        compiler_params=pltpu.CompilerParams(
            # No cross-step carry in this pass: both axes can be sharded.
            dimension_semantics=("parallel", "parallel"),
            vmem_limit_bytes=vmem_limit_bytes),
    )(h, prepared["w4"], prepared["b4"])

    return out_p[:N, :dim_mod2]


# --------------------------------------------------------------------------
# Reference + synthetic parameters + test
# --------------------------------------------------------------------------
def init_params(key, dim_mod1, dim_mod2):
    """Deterministic synthetic parameters (PyTorch-Linear-like uniform init),
    stored as (in_features, out_features) so that y = x @ W + b."""
    dims = [(dim_mod1, HIDDEN), (HIDDEN, HIDDEN), (HIDDEN, HIDDEN),
            (HIDDEN, HIDDEN), (HIDDEN, dim_mod2)]
    params = []
    for (fan_in, fan_out) in dims:
        key, kw, kb = jax.random.split(key, 3)
        bound = 1.0 / math.sqrt(fan_in)
        w = jax.random.uniform(kw, (fan_in, fan_out), jnp.float32, -bound, bound)
        b = jax.random.uniform(kb, (1, fan_out), jnp.float32, -bound, bound)
        params.append((w, b))
    return params


def _reference_forward(x, params):
    h = x
    for (w, b) in params:
        h = jax.nn.gelu(h @ w + b, approximate=False)
    return h


if __name__ == "__main__":
    key = jax.random.PRNGKey(0)
    key, kx1, kx2 = jax.random.split(key, 3)

    # Small shapes consistent with the module; deliberately not 128-aligned to
    # exercise padding / lane-dense-output handling.
    dim_mod1, dim_mod2 = 134, 200
    params = init_params(key, dim_mod1, dim_mod2)

    x_small = jax.random.normal(kx1, (16, dim_mod1), jnp.float32)
    x_multi = jax.random.normal(kx2, (48, dim_mod1), jnp.float32)

    ref_small = _reference_forward(x_small, params)
    ref_multi = _reference_forward(x_multi, params)

    # f32 MXU operands: tight match vs the pure-JAX reference.
    prep_f32 = prepare_model(params, compute_dtype=jnp.float32)
    out_f32 = jax.block_until_ready(model_regression_adt2gex(x_small, prep_f32))
    assert out_f32.shape == (16, dim_mod2)
    assert jnp.allclose(out_f32, ref_small, atol=1e-4, rtol=1e-4), "f32 mismatch vs reference"

    # Default path: bf16 MXU operands, f32 accumulation (looser tolerance:
    # activations are cast to bf16 between layers, so error compounds).
    prep_bf16 = prepare_model(params)
    out_bf16 = jax.block_until_ready(model_regression_adt2gex(x_small, prep_bf16))
    assert out_bf16.shape == (16, dim_mod2)
    assert jnp.allclose(out_bf16, ref_small, atol=5e-2, rtol=5e-2), "bf16 mismatch vs reference"

    # Multi-tile grid: several batch tiles (i) and several W4 column tiles (j),
    # exercising the W4-read-once (j outer, i inner) schedule.
    prep_tiled = prepare_model(params, out_tile=128)
    out_tiled = jax.block_until_ready(
        model_regression_adt2gex(x_multi, prep_tiled, batch_tile=16))
    assert out_tiled.shape == (48, dim_mod2)
    assert jnp.allclose(out_tiled, ref_multi, atol=5e-2, rtol=5e-2), "tiled mismatch vs reference"

    print("KERNEL_OK")
</pallas_src>

<mosaic_0001>
module attributes {stable_mosaic.version = 11 : i64} {
  func.func @_hidden_kernel(%arg0: i32, %arg1: memref<16x256xf32, #tpu.memory_space<vmem>>, %arg2: memref<256x512xf32, #tpu.memory_space<vmem>>, %arg3: memref<1x512xf32, #tpu.memory_space<vmem>>, %arg4: memref<512x512xf32, #tpu.memory_space<vmem>>, %arg5: memref<1x512xf32, #tpu.memory_space<vmem>>, %arg6: memref<512x512xf32, #tpu.memory_space<vmem>>, %arg7: memref<1x512xf32, #tpu.memory_space<vmem>>, %arg8: memref<512x512xf32, #tpu.memory_space<vmem>>, %arg9: memref<1x512xf32, #tpu.memory_space<vmem>>, %arg10: memref<16x512xf32, #tpu.memory_space<vmem>>) attributes {dimension_semantics = [#tpu.dimension_semantics<parallel>], iteration_bounds = array<i64: 1>, scalar_prefetch = 0 : i64, scratch_operands = 0 : i64, tpu.core_type = #tpu.core_type<tc>, window_params = [{transform_indices = @transform_0, window_bounds = array<i64: 16, 256>}, {pipeline_mode = #tpu.pipeline_mode<synchronous>, transform_indices = @transform_1, window_bounds = array<i64: 256, 512>}, {pipeline_mode = #tpu.pipeline_mode<synchronous>, transform_indices = @transform_2, window_bounds = array<i64: 1, 512>}, {pipeline_mode = #tpu.pipeline_mode<synchronous>, transform_indices = @transform_3, window_bounds = array<i64: 512, 512>}, {pipeline_mode = #tpu.pipeline_mode<synchronous>, transform_indices = @transform_4, window_bounds = array<i64: 1, 512>}, {pipeline_mode = #tpu.pipeline_mode<synchronous>, transform_indices = @transform_5, window_bounds = array<i64: 512, 512>}, {pipeline_mode = #tpu.pipeline_mode<synchronous>, transform_indices = @transform_6, window_bounds = array<i64: 1, 512>}, {pipeline_mode = #tpu.pipeline_mode<synchronous>, transform_indices = @transform_7, window_bounds = array<i64: 512, 512>}, {pipeline_mode = #tpu.pipeline_mode<synchronous>, transform_indices = @transform_8, window_bounds = array<i64: 1, 512>}, {transform_indices = @transform_9, window_bounds = array<i64: 16, 512>}]} {
    %c0 = arith.constant 0 : index
    %c0_0 = arith.constant 0 : index
    %0 = vector.load %arg1[%c0, %c0_0] : memref<16x256xf32, #tpu.memory_space<vmem>>, vector<16x256xf32>
    %c0_1 = arith.constant 0 : index
    %c0_2 = arith.constant 0 : index
    %1 = vector.load %arg2[%c0_1, %c0_2] : memref<256x512xf32, #tpu.memory_space<vmem>>, vector<256x512xf32>
    %cst = arith.constant dense<0.000000e+00> : vector<16x512xf32>
    %2 = tpu.matmul %0, %1, %cst {dimension_numbers = #tpu.dot_dimension_numbers<[1], [0], [0], [1], [0, 0, 1, 1], [], []>} : vector<16x256xf32>, vector<256x512xf32>, vector<16x512xf32> -> vector<16x512xf32>
    %c0_3 = arith.constant 0 : index
    %c0_4 = arith.constant 0 : index
    %3 = vector.load %arg3[%c0_3, %c0_4] : memref<1x512xf32, #tpu.memory_space<vmem>>, vector<1x512xf32>
    %4 = vector.broadcast %3 : vector<1x512xf32> to vector<16x512xf32>
    %5 = arith.addf %2, %4 : vector<16x512xf32>
    %cst_5 = arith.constant 5.000000e-01 : f32
    %6 = vector.broadcast %cst_5 : f32 to vector<16x512xf32>
    %7 = arith.mulf %6, %5 : vector<16x512xf32>
    %cst_6 = arith.constant 0.707106769 : f32
    %8 = vector.broadcast %cst_6 : f32 to vector<16x512xf32>
    %9 = arith.mulf %5, %8 : vector<16x512xf32>
    %10 = math.erf %9 : vector<16x512xf32>
    %cst_7 = arith.constant 1.000000e+00 : f32
    %11 = vector.broadcast %cst_7 : f32 to vector<16x512xf32>
    %12 = arith.addf %11, %10 : vector<16x512xf32>
    %13 = arith.mulf %7, %12 : vector<16x512xf32>
    %c0_8 = arith.constant 0 : index
    %c0_9 = arith.constant 0 : index
    %14 = vector.load %arg4[%c0_8, %c0_9] : memref<512x512xf32, #tpu.memory_space<vmem>>, vector<512x512xf32>
    %cst_10 = arith.constant dense<0.000000e+00> : vector<16x512xf32>
    %15 = tpu.matmul %13, %14, %cst_10 {dimension_numbers = #tpu.dot_dimension_numbers<[1], [0], [0], [1], [0, 0, 1, 1], [], []>} : vector<16x512xf32>, vector<512x512xf32>, vector<16x512xf32> -> vector<16x512xf32>
    %c0_11 = arith.constant 0 : index
    %c0_12 = arith.constant 0 : index
    %16 = vector.load %arg5[%c0_11, %c0_12] : memref<1x512xf32, #tpu.memory_space<vmem>>, vector<1x512xf32>
    %17 = vector.broadcast %16 : vector<1x512xf32> to vector<16x512xf32>
    %18 = arith.addf %15, %17 : vector<16x512xf32>
    %cst_13 = arith.constant 5.000000e-01 : f32
    %19 = vector.broadcast %cst_13 : f32 to vector<16x512xf32>
    %20 = arith.mulf %19, %18 : vector<16x512xf32>
    %cst_14 = arith.constant 0.707106769 : f32
    %21 = vector.broadcast %cst_14 : f32 to vector<16x512xf32>
    %22 = arith.mulf %18, %21 : vector<16x512xf32>
    %23 = math.erf %22 : vector<16x512xf32>
    %cst_15 = arith.constant 1.000000e+00 : f32
    %24 = vector.broadcast %cst_15 : f32 to vector<16x512xf32>
    %25 = arith.addf %24, %23 : vector<16x512xf32>
    %26 = arith.mulf %20, %25 : vector<16x512xf32>
    %c0_16 = arith.constant 0 : index
    %c0_17 = arith.constant 0 : index
    %27 = vector.load %arg6[%c0_16, %c0_17] : memref<512x512xf32, #tpu.memory_space<vmem>>, vector<512x512xf32>
    %cst_18 = arith.constant dense<0.000000e+00> : vector<16x512xf32>
    %28 = tpu.matmul %26, %27, %cst_18 {dimension_numbers = #tpu.dot_dimension_numbers<[1], [0], [0], [1], [0, 0, 1, 1], [], []>} : vector<16x512xf32>, vector<512x512xf32>, vector<16x512xf32> -> vector<16x512xf32>
    %c0_19 = arith.constant 0 : index
    %c0_20 = arith.constant 0 : index
    %29 = vector.load %arg7[%c0_19, %c0_20] : memref<1x512xf32, #tpu.memory_space<vmem>>, vector<1x512xf32>
    %30 = vector.broadcast %29 : vector<1x512xf32> to vector<16x512xf32>
    %31 = arith.addf %28, %30 : vector<16x512xf32>
    %cst_21 = arith.constant 5.000000e-01 : f32
    %32 = vector.broadcast %cst_21 : f32 to vector<16x512xf32>
    %33 = arith.mulf %32, %31 : vector<16x512xf32>
    %cst_22 = arith.constant 0.707106769 : f32
    %34 = vector.broadcast %cst_22 : f32 to vector<16x512xf32>
    %35 = arith.mulf %31, %34 : vector<16x512xf32>
    %36 = math.erf %35 : vector<16x512xf32>
    %cst_23 = arith.constant 1.000000e+00 : f32
    %37 = vector.broadcast %cst_23 : f32 to vector<16x512xf32>
    %38 = arith.addf %37, %36 : vector<16x512xf32>
    %39 = arith.mulf %33, %38 : vector<16x512xf32>
    %c0_24 = arith.constant 0 : index
    %c0_25 = arith.constant 0 : index
    %40 = vector.load %arg8[%c0_24, %c0_25] : memref<512x512xf32, #tpu.memory_space<vmem>>, vector<512x512xf32>
    %cst_26 = arith.constant dense<0.000000e+00> : vector<16x512xf32>
    %41 = tpu.matmul %39, %40, %cst_26 {dimension_numbers = #tpu.dot_dimension_numbers<[1], [0], [0], [1], [0, 0, 1, 1], [], []>} : vector<16x512xf32>, vector<512x512xf32>, vector<16x512xf32> -> vector<16x512xf32>
    %c0_27 = arith.constant 0 : index
    %c0_28 = arith.constant 0 : index
    %42 = vector.load %arg9[%c0_27, %c0_28] : memref<1x512xf32, #tpu.memory_space<vmem>>, vector<1x512xf32>
    %43 = vector.broadcast %42 : vector<1x512xf32> to vector<16x512xf32>
    %44 = arith.addf %41, %43 : vector<16x512xf32>
    %cst_29 = arith.constant 5.000000e-01 : f32
    %45 = vector.broadcast %cst_29 : f32 to vector<16x512xf32>
    %46 = arith.mulf %45, %44 : vector<16x512xf32>
    %cst_30 = arith.constant 0.707106769 : f32
    %47 = vector.broadcast %cst_30 : f32 to vector<16x512xf32>
    %48 = arith.mulf %44, %47 : vector<16x512xf32>
    %49 = math.erf %48 : vector<16x512xf32>
    %cst_31 = arith.constant 1.000000e+00 : f32
    %50 = vector.broadcast %cst_31 : f32 to vector<16x512xf32>
    %51 = arith.addf %50, %49 : vector<16x512xf32>
    %52 = arith.mulf %46, %51 : vector<16x512xf32>
    %c0_32 = arith.constant 0 : index
    %c0_33 = arith.constant 0 : index
    %53 = vector.load %arg10[%c0_32, %c0_33] : memref<16x512xf32, #tpu.memory_space<vmem>>, vector<16x512xf32>
    tpu.vector_store %arg10[%c0_32, %c0_33], %52 {strides = array<i32>} : memref<16x512xf32, #tpu.memory_space<vmem>>, vector<16x512xf32>,
    return
  }
  func.func @transform_0(%arg0: i32) -> (i32, i32) {
    %c0_i32 = arith.constant 0 : i32
    %c0_i32_0 = arith.constant 0 : i32
    return %arg0, %c0_i32 : i32, i32
  }
  func.func @transform_1(%arg0: i32) -> (i32, i32) {
    %c0_i32 = arith.constant 0 : i32
    %c0_i32_0 = arith.constant 0 : i32
    %c0_i32_1 = arith.constant 0 : i32
    return %c0_i32, %c0_i32_0 : i32, i32
  }
  func.func @transform_2(%arg0: i32) -> (i32, i32) {
    %c0_i32 = arith.constant 0 : i32
    %c0_i32_0 = arith.constant 0 : i32
    %c0_i32_1 = arith.constant 0 : i32
    return %c0_i32, %c0_i32_0 : i32, i32
  }
  func.func @transform_3(%arg0: i32) -> (i32, i32) {
    %c0_i32 = arith.constant 0 : i32
    %c0_i32_0 = arith.constant 0 : i32
    %c0_i32_1 = arith.constant 0 : i32
    return %c0_i32, %c0_i32_0 : i32, i32
  }
  func.func @transform_4(%arg0: i32) -> (i32, i32) {
    %c0_i32 = arith.constant 0 : i32
    %c0_i32_0 = arith.constant 0 : i32
    %c0_i32_1 = arith.constant 0 : i32
    return %c0_i32, %c0_i32_0 : i32, i32
  }
  func.func @transform_5(%arg0: i32) -> (i32, i32) {
    %c0_i32 = arith.constant 0 : i32
    %c0_i32_0 = arith.constant 0 : i32
    %c0_i32_1 = arith.constant 0 : i32
    return %c0_i32, %c0_i32_0 : i32, i32
  }
  func.func @transform_6(%arg0: i32) -> (i32, i32) {
    %c0_i32 = arith.constant 0 : i32
    %c0_i32_0 = arith.constant 0 : i32
    %c0_i32_1 = arith.constant 0 : i32
    return %c0_i32, %c0_i32_0 : i32, i32
  }
  func.func @transform_7(%arg0: i32) -> (i32, i32) {
    %c0_i32 = arith.constant 0 : i32
    %c0_i32_0 = arith.constant 0 : i32
    %c0_i32_1 = arith.constant 0 : i32
    return %c0_i32, %c0_i32_0 : i32, i32
  }
  func.func @transform_8(%arg0: i32) -> (i32, i32) {
    %c0_i32 = arith.constant 0 : i32
    %c0_i32_0 = arith.constant 0 : i32
    %c0_i32_1 = arith.constant 0 : i32
    return %c0_i32, %c0_i32_0 : i32, i32
  }
  func.func @transform_9(%arg0: i32) -> (i32, i32) {
    %c0_i32 = arith.constant 0 : i32
    %c0_i32_0 = arith.constant 0 : i32
    return %arg0, %c0_i32 : i32, i32
  }
}

</mosaic_0001>

<bundles_post_ra>
// kernel: tpu_custom_call.1
= control target key start
LH: loop header
LB: loop body
LE: loop exit
PB: predicated region body
PF: predicated region fallthrough
CT: control target
= control target key end

     0   :  { %14 = vsyncpa [#allocation3], 0  ;;  %s2814_s0 = inlined_call_operand.hbm [shape: f32[16,256], index: 0, kind: input, shape index: {}]   ;;  %s2815_s1 = inlined_call_operand.hbm [shape: f32[256,512], index: 1, kind: input, shape index: {}]   ;;  %s2816_s2 = inlined_call_operand.hbm [shape: f32[1,512], index: 2, kind: input, shape index: {}]   ;;  %s2817_s3 = inlined_call_operand.hbm [shape: f32[512,512], index: 3, kind: input, shape index: {}]   ;;  %s2818_s4 = inlined_call_operand.vmem [shape: f32[1,512], index: 4, kind: input, shape index: {}]   ;;  %s2819_s5 = inlined_call_operand.hbm [shape: f32[512,512], index: 5, kind: input, shape index: {}]   ;;  %s2820_s6 = inlined_call_operand.vmem [shape: f32[1,512], index: 6, kind: input, shape index: {}]   ;;  %s2821_s7 = inlined_call_operand.hbm [shape: f32[512,512], index: 7, kind: input, shape index: {}]   ;;  %s2822_s8 = inlined_call_operand.vmem [shape: f32[1,512], index: 8, kind: input, shape index: {}]   ;;  %s2823_s9 = inlined_call_operand.hbm [shape: f32[16,512], index: 9, kind: output, shape index: {}]  }
   0x1   :  { %15 = vsyncpa [#allocation6], 0 }
   0x2   :  { %16 = vsyncpa [#allocation9], 0 }
   0x3   :  { %17 = vsyncpa [#allocation12], 0 }
   0x4   :  { %18 = vsyncpa [#allocation4], 0  ;;  %s2592_s30 = smov [#allocation5]  }
   0x5   :  { %s36_s10 = sshll.u32 %s2592_s30, 4  ;;  %s37_s10 = int_to_ptr.vmem [resolvable:$true] %s36_s10 }
   0x6   :  { %s2450_s11 = scalar_lea.vmem %s37_s10, 16384  ;;  %p2455_p1 = scmp.lt.s32.totalorder %s37_s10, %s37_s10 }
   0x7   :  { %p2451_p0 = scmp.ne.s32.totalorder %s37_s10, %s2450_s11  ;;  %p2456_p2 = scmp.lt.s32.totalorder %s2450_s11, %s2450_s11 }
   0x9   :  { %p2457_p3 = por %p2456_p2, %p2455_p1 }
   0xb   :  { %p2458_p4 = pnand %p2457_p3, %p2451_p0 }
   0xd   :  { %2461 = shalt.err (!%p2458_p4)
}
   0xe   :  { %s2593_s12 = smov 512   ;;  %s2594_s13 = smov 32  }
   0xf   :  { %42 = dma.hbm_to_vmem [thread:$0]  %s2815_s1, 16384, %s37_s10, [#allocation6], %s2593_s12, %s2593_s12, %s2594_s13  }
  0x10   :  { %s2595_s16 = smov [#allocation8]   ;;  %s2596_s18 = smov [#allocation2]  }
  0x11   :  { %s58_s17 = sshll.u32 %s2595_s16, 4  ;;  %s24_s19 = sshll.u32 %s2596_s18, 4  ;;  %s59_s17 = int_to_ptr.vmem [resolvable:$true] %s58_s17  ;;  %s25_s19 = int_to_ptr.vmem [resolvable:$true] %s24_s19 }
  0x12   :  { %s2470_s20 = scalar_lea.vmem %s59_s17, 32768  ;;  %p2475_p6 = scmp.lt.s32.totalorder %s59_s17, %s59_s17 }
  0x13   :  { %p2471_p5 = scmp.ne.s32.totalorder %s59_s17, %s2470_s20  ;;  %p2476_p7 = scmp.lt.s32.totalorder %s2470_s20, %s2470_s20 }
  0x15   :  { %p2477_p8 = por %p2476_p7, %p2475_p6 }
  0x17   :  { %p2478_p9 = pnand %p2477_p8, %p2471_p5 }
  0x19   :  { %2481 = shalt.err (!%p2478_p9)
}
  0x1a   :  { %64 = dma.hbm_to_vmem [thread:$0]  %s2817_s3, 32768, %s59_s17, [#allocation9], %s2593_s12, %s2593_s12, %s2594_s13  }
  0x1b   :  { %s2490_s1 = scalar_lea.vmem %s25_s19, 512  ;;  %p2495_p11 = scmp.lt.s32.totalorder %s25_s19, %s25_s19 }
  0x1c   :  { %p2491_p10 = scmp.ne.s32.totalorder %s25_s19, %s2490_s1  ;;  %p2496_p12 = scmp.lt.s32.totalorder %s2490_s1, %s2490_s1 }
  0x1e   :  { %p2497_p13 = por %p2496_p12, %p2495_p11 }
  0x20   :  { %p2498_p0 = pnand %p2497_p13, %p2491_p10 }
  0x22   :  { %2501 = shalt.err (!%p2498_p0)
}
  0x23   :  { %s2597_s23 = smov 256   ;;  %s2598_s24 = smov 16  }
  0x24   :  { %30 = dma.hbm_to_vmem [thread:$0]  %s2814_s0, 512, %s25_s19, [#allocation3], %s2597_s23, %s2597_s23, %s2598_s24  }
  0x25   :  { %s2599_s27 = smov [#allocation7]   ;;  %s2600_s29 = smov [#allocation10]  }
  0x26   :  { %s49_s28 = sshll.u32 %s2599_s27, 4  ;;  %s72_s30 = sshll.u32 %s2600_s29, 4  ;;  %s50_s28 = int_to_ptr.vmem [resolvable:$true] %s49_s28  ;;  %s73_s30 = int_to_ptr.vmem [resolvable:$true] %s72_s30 }
  0x27   :  { %s2510_s3 = scalar_lea.vmem %s50_s28, 64  ;;  %p2515_p2 = scmp.lt.s32.totalorder %s50_s28, %s50_s28 }
  0x28   :  { %p2511_p1 = scmp.ne.s32.totalorder %s50_s28, %s2510_s3  ;;  %p2516_p3 = scmp.lt.s32.totalorder %s2510_s3, %s2510_s3 }
  0x2a   :  { %p2517_p4 = por %p2516_p3, %p2515_p2 }
  0x2c   :  { %p2518_p5 = pnand %p2517_p4, %p2511_p1 }
  0x2e   :  { %2521 = shalt.err (!%p2518_p5)
}
  0x2f   :  { %52 = dma.hbm_to_vmem [thread:$0]  %s2816_s2, 64, %s50_s28, [#allocation6]  }
  0x30   :  { %s2530_s14 = scalar_lea.vmem %s73_s30, 32768  ;;  %p2535_p7 = scmp.lt.s32.totalorder %s73_s30, %s73_s30 }
  0x31   :  { %p2531_p6 = scmp.ne.s32.totalorder %s73_s30, %s2530_s14  ;;  %p2536_p8 = scmp.lt.s32.totalorder %s2530_s14, %s2530_s14 }
  0x33   :  { %p2537_p9 = por %p2536_p8, %p2535_p7 }
  0x35   :  { %p2538_p10 = pnand %p2537_p9, %p2531_p6 }
  0x37   :  { %2541 = shalt.err (!%p2538_p10)
}
  0x38   :  { %78 = dma.hbm_to_vmem [thread:$0]  %s2819_s5, 32768, %s73_s30, [#allocation9], %s2593_s12, %s2593_s12, %s2594_s13  }
  0x39   :  { %s2601_s16 = smov [#allocation11]  }
  0x3a   :  { %s86_s17 = sshll.u32 %s2601_s16, 4  ;;  %s87_s17 = int_to_ptr.vmem [resolvable:$true] %s86_s17 }
  0x3b   :  { %s2550_s18 = scalar_lea.vmem %s87_s17, 32768  ;;  %p2555_p12 = scmp.lt.s32.totalorder %s87_s17, %s87_s17 }
  0x3c   :  { %p2551_p11 = scmp.ne.s32.totalorder %s87_s17, %s2550_s18  ;;  %p2556_p13 = scmp.lt.s32.totalorder %s2550_s18, %s2550_s18 }
  0x3e   :  { %p2557_p0 = por %p2556_p13, %p2555_p12 }
  0x40   :  { %p2558_p1 = pnand %p2557_p0, %p2551_p11 }
  0x42   :  { %2561 = shalt.err (!%p2558_p1)
}
  0x43   :  { %92 = dma.hbm_to_vmem [thread:$0]  %s2821_s7, 32768, %s87_s17, [#allocation12], %s2593_s12, %s2593_s12, %s2594_s13  }
  0x44   :  { %2582 = dma.done.wait [#allocation3], 512  }
  0x45   :  { %2583 = vsyncadd [#allocation3], 4294966784 }
  0x46   :  { %2584 = dma.done.wait [#allocation6], 16448  }
  0x47   :  { %2585 = vsyncadd [#allocation6], 4294950848 }
  0x48   :  { %2586 = dma.done.wait [#allocation9], 65536  }
  0x49   :  { %2587 = vsyncadd [#allocation9], 4294901760 }
  0x4a   :  { %2588 = dma.done.wait [#allocation12], 32768  }
  0x4b   :  { %2589 = vsyncadd [#allocation12], 4294934528  ;;  %v178_v0 = vld [vmem:[#allocation5 + $0x1e8] sm:$0xff]  ;;  %v180_v1 = vld [vmem:[#allocation5 + $0x1f8] sm:$0xff] }
  0x4c   :  { %v177_v2 = vld [vmem:[#allocation5 + $0x1e0] sm:$0xff]  ;;  %267 = vmatprep.subr.mxu0 %v178_v0  ;;  %344 = vmatprep.subr.mxu1 %v180_v1  ;;  %v179_v3 = vld [vmem:[#allocation5 + $0x1f0] sm:$0xff]  ;;  %v174_v4 = vld [vmem:[#allocation5 + $0x1c8] sm:$0xff] }
  0x4d   :  { %v176_v5 = vld [vmem:[#allocation5 + $0x1d8] sm:$0xff]  ;;  %268 = vmatpush1.msra.mxu0 %v177_v2  ;;  %345 = vmatpush1.msra.mxu1 %v179_v3  ;;  %v173_v6 = vld [vmem:[#allocation5 + $0x1c0] sm:$0xff]  ;;  %v175_v7 = vld [vmem:[#allocation5 + $0x1d0] sm:$0xff] }
  0x4e   :  { %v170_v8 = vld [vmem:[#allocation5 + $0x1a8] sm:$0xff]  ;;  %269 = vmatprep.subr.mxu0 %v174_v4  ;;  %346 = vmatprep.subr.mxu1 %v176_v5  ;;  %v172_v9 = vld [vmem:[#allocation5 + $0x1b8] sm:$0xff]  ;;  %v169_v10 = vld [vmem:[#allocation5 + $0x1a0] sm:$0xff] }
  0x4f   :  { %v171_v11 = vld [vmem:[#allocation5 + $0x1b0] sm:$0xff]  ;;  %270 = vmatpush1.msra.mxu0 %v173_v6  ;;  %347 = vmatpush1.msra.mxu1 %v175_v7  ;;  %v166_v12 = vld [vmem:[#allocation5 + $0x188] sm:$0xff]  ;;  %v168_v13 = vld [vmem:[#allocation5 + $0x198] sm:$0xff] }
  0x50   :  { %271 = vmatprep.subr.mxu0 %v170_v8  ;;  %348 = vmatprep.subr.mxu1 %v172_v9  ;;  %v165_v14 = vld [vmem:[#allocation5 + $0x180] sm:$0xff]  ;;  %v167_v15 = vld [vmem:[#allocation5 + $0x190] sm:$0xff]  ;;  %v162_v16 = vld [vmem:[#allocation5 + $0x168] sm:$0xff] }
  0x51   :  { %272 = vmatpush1.msra.mxu0 %v169_v10  ;;  %349 = vmatpush1.msra.mxu1 %v171_v11  ;;  %v164_v17 = vld [vmem:[#allocation5 + $0x178] sm:$0xff]  ;;  %v161_v18 = vld [vmem:[#allocation5 + $0x160] sm:$0xff]  ;;  %v163_v19 = vld [vmem:[#allocation5 + $0x170] sm:$0xff] }
  0x52   :  { %273 = vmatprep.subr.mxu0 %v166_v12  ;;  %350 = vmatprep.subr.mxu1 %v168_v13  ;;  %v158_v20 = vld [vmem:[#allocation5 + $0x148] sm:$0xff]  ;;  %v160_v21 = vld [vmem:[#allocation5 + $0x158] sm:$0xff]  ;;  %v157_v22 = vld [vmem:[#allocation5 + $0x140] sm:$0xff] }
  0x53   :  { %274 = vmatpush1.msra.mxu0 %v165_v14  ;;  %351 = vmatpush1.msra.mxu1 %v167_v15  ;;  %v159_v23 = vld [vmem:[#allocation5 + $0x150] sm:$0xff]  ;;  %v154_v24 = vld [vmem:[#allocation5 + $0x128] sm:$0xff]  ;;  %v156_v25 = vld [vmem:[#allocation5 + $0x138] sm:$0xff] }
  0x54   :  { %275 = vmatprep.subr.mxu0 %v162_v16  ;;  %352 = vmatprep.subr.mxu1 %v164_v17  ;;  %v153_v26 = vld [vmem:[#allocation5 + $0x120] sm:$0xff]  ;;  %v155_v27 = vld [vmem:[#allocation5 + $0x130] sm:$0xff]  ;;  %v150_v28 = vld [vmem:[#allocation5 + $0x108] sm:$0xff] }
  0x55   :  { %276 = vmatpush1.msra.mxu0 %v161_v18  ;;  %353 = vmatpush1.msra.mxu1 %v163_v19  ;;  %v152_v29 = vld [vmem:[#allocation5 + $0x118] sm:$0xff]  ;;  %v149_v30 = vld [vmem:[#allocation5 + $0x100] sm:$0xff]  ;;  %v151_v31 = vld [vmem:[#allocation5 + $0x110] sm:$0xff] }
  0x56   :  { %277 = vmatprep.subr.mxu0 %v158_v20  ;;  %354 = vmatprep.subr.mxu1 %v160_v21  ;;  %v146_v32 = vld [vmem:[#allocation5 + $0xe8] sm:$0xff]  ;;  %v148_v33 = vld [vmem:[#allocation5 + $0xf8] sm:$0xff]  ;;  %v145_v34 = vld [vmem:[#allocation5 + $0xe0] sm:$0xff] }
  0x57   :  { %278 = vmatpush1.msra.mxu0 %v157_v22  ;;  %355 = vmatpush1.msra.mxu1 %v159_v23  ;;  %v147_v35 = vld [vmem:[#allocation5 + $0xf0] sm:$0xff]  ;;  %v142_v36 = vld [vmem:[#allocation5 + $0xc8] sm:$0xff]  ;;  %v144_v37 = vld [vmem:[#allocation5 + $0xd8] sm:$0xff] }
  0x58   :  { %279 = vmatprep.subr.mxu0 %v154_v24  ;;  %356 = vmatprep.subr.mxu1 %v156_v25  ;;  %v141_v38 = vld [vmem:[#allocation5 + $0xc0] sm:$0xff]  ;;  %v143_v39 = vld [vmem:[#allocation5 + $0xd0] sm:$0xff]  ;;  %v138_v40 = vld [vmem:[#allocation5 + $0xa8] sm:$0xff] }
  0x59   :  { %280 = vmatpush1.msra.mxu0 %v153_v26  ;;  %357 = vmatpush1.msra.mxu1 %v155_v27  ;;  %v140_v41 = vld [vmem:[#allocation5 + $0xb8] sm:$0xff]  ;;  %v137_v42 = vld [vmem:[#allocation5 + $0xa0] sm:$0xff]  ;;  %v139_v43 = vld [vmem:[#allocation5 + $0xb0] sm:$0xff] }
  0x5a   :  { %281 = vmatprep.subr.mxu0 %v150_v28  ;;  %358 = vmatprep.subr.mxu1 %v152_v29  ;;  %v134_v44 = vld [vmem:[#allocation5 + $0x88] sm:$0xff]  ;;  %v136_v45 = vld [vmem:[#allocation5 + $0x98] sm:$0xff]  ;;  %v133_v46 = vld [vmem:[#allocation5 + $0x80] sm:$0xff] }
  0x5b   :  { %282 = vmatpush1.msra.mxu0 %v149_v30  ;;  %359 = vmatpush1.msra.mxu1 %v151_v31  ;;  %v135_v47 = vld [vmem:[#allocation5 + $0x90] sm:$0xff]  ;;  %v130_v48 = vld [vmem:[#allocation5 + $0x68] sm:$0xff]  ;;  %v132_v49 = vld [vmem:[#allocation5 + $0x78] sm:$0xff] }
  0x5c   :  { %283 = vmatprep.subr.mxu0 %v146_v32  ;;  %360 = vmatprep.subr.mxu1 %v148_v33  ;;  %v129_v50 = vld [vmem:[#allocation5 + $0x60] sm:$0xff]  ;;  %v131_v51 = vld [vmem:[#allocation5 + $0x70] sm:$0xff]  ;;  %v126_v52 = vld [vmem:[#allocation5 + $0x48] sm:$0xff] }
  0x5d   :  { %284 = vmatpush1.msra.mxu0 %v145_v34  ;;  %361 = vmatpush1.msra.mxu1 %v147_v35  ;;  %v128_v53 = vld [vmem:[#allocation5 + $0x58] sm:$0xff]  ;;  %v125_v54 = vld [vmem:[#allocation5 + $0x40] sm:$0xff]  ;;  %v127_v55 = vld [vmem:[#allocation5 + $0x50] sm:$0xff] }
  0x5e   :  { %285 = vmatprep.subr.mxu0 %v142_v36  ;;  %362 = vmatprep.subr.mxu1 %v144_v37  ;;  %v122_v56 = vld [vmem:[#allocation5 + $0x28] sm:$0xff]  ;;  %v124_v57 = vld [vmem:[#allocation5 + $0x38] sm:$0xff]  ;;  %v121_v58 = vld [vmem:[#allocation5 + $0x20] sm:$0xff] }
  0x5f   :  { %286 = vmatpush1.msra.mxu0 %v141_v38  ;;  %363 = vmatpush1.msra.mxu1 %v143_v39  ;;  %v123_v59 = vld [vmem:[#allocation5 + $0x30] sm:$0xff]  ;;  %v118_v60 = vld [vmem:[#allocation5 + $0x8] sm:$0xff]  ;;  %v120_v61 = vld [vmem:[#allocation5 + $0x18] sm:$0xff] }
  0x60   :  { %287 = vmatprep.subr.mxu0 %v138_v40  ;;  %364 = vmatprep.subr.mxu1 %v140_v41  ;;  %v117_v62 = vld [vmem:[#allocation5] sm:$0xff]  ;;  %v119_v63 = vld [vmem:[#allocation5 + $0x10] sm:$0xff]  ;;  %v242_v0 = vld [vmem:[#allocation5 + $0x3e8] sm:$0xff] }
  0x61   :  { %288 = vmatpush1.msra.mxu0 %v137_v42  ;;  %365 = vmatpush1.msra.mxu1 %v139_v43  ;;  %v244_v1 = vld [vmem:[#allocation5 + $0x3f8] sm:$0xff]  ;;  %v241_v2 = vld [vmem:[#allocation5 + $0x3e0] sm:$0xff]  ;;  %v243_v3 = vld [vmem:[#allocation5 + $0x3f0] sm:$0xff] }
  0x62   :  { %289 = vmatprep.subr.mxu0 %v134_v44  ;;  %366 = vmatprep.subr.mxu1 %v136_v45  ;;  %v238_v4 = vld [vmem:[#allocation5 + $0x3c8] sm:$0xff]  ;;  %v240_v5 = vld [vmem:[#allocation5 + $0x3d8] sm:$0xff]  ;;  %v237_v6 = vld [vmem:[#allocation5 + $0x3c0] sm:$0xff] }
  0x63   :  { %290 = vmatpush1.msra.mxu0 %v133_v46  ;;  %367 = vmatpush1.msra.mxu1 %v135_v47  ;;  %v239_v7 = vld [vmem:[#allocation5 + $0x3d0] sm:$0xff]  ;;  %v234_v8 = vld [vmem:[#allocation5 + $0x3a8] sm:$0xff]  ;;  %v236_v9 = vld [vmem:[#allocation5 + $0x3b8] sm:$0xff] }
  0x64   :  { %291 = vmatprep.subr.mxu0 %v130_v48  ;;  %368 = vmatprep.subr.mxu1 %v132_v49  ;;  %v233_v10 = vld [vmem:[#allocation5 + $0x3a0] sm:$0xff]  ;;  %v235_v11 = vld [vmem:[#allocation5 + $0x3b0] sm:$0xff]  ;;  %v230_v12 = vld [vmem:[#allocation5 + $0x388] sm:$0xff] }
  0x65   :  { %292 = vmatpush1.msra.mxu0 %v129_v50  ;;  %369 = vmatpush1.msra.mxu1 %v131_v51  ;;  %v232_v13 = vld [vmem:[#allocation5 + $0x398] sm:$0xff]  ;;  %v229_v14 = vld [vmem:[#allocation5 + $0x380] sm:$0xff]  ;;  %v231_v15 = vld [vmem:[#allocation5 + $0x390] sm:$0xff] }
  0x66   :  { %293 = vmatprep.subr.mxu0 %v126_v52  ;;  %370 = vmatprep.subr.mxu1 %v128_v53  ;;  %v226_v16 = vld [vmem:[#allocation5 + $0x368] sm:$0xff]  ;;  %v228_v17 = vld [vmem:[#allocation5 + $0x378] sm:$0xff]  ;;  %v225_v18 = vld [vmem:[#allocation5 + $0x360] sm:$0xff] }
  0x67   :  { %294 = vmatpush1.msra.mxu0 %v125_v54  ;;  %371 = vmatpush1.msra.mxu1 %v127_v55  ;;  %v227_v19 = vld [vmem:[#allocation5 + $0x370] sm:$0xff]  ;;  %v222_v20 = vld [vmem:[#allocation5 + $0x348] sm:$0xff]  ;;  %v224_v21 = vld [vmem:[#allocation5 + $0x358] sm:$0xff] }
  0x68   :  { %295 = vmatprep.subr.mxu0 %v122_v56  ;;  %372 = vmatprep.subr.mxu1 %v124_v57  ;;  %v221_v22 = vld [vmem:[#allocation5 + $0x340] sm:$0xff]  ;;  %v223_v23 = vld [vmem:[#allocation5 + $0x350] sm:$0xff]  ;;  %v218_v24 = vld [vmem:[#allocation5 + $0x328] sm:$0xff] }
  0x69   :  { %296 = vmatpush1.msra.mxu0 %v121_v58  ;;  %373 = vmatpush1.msra.mxu1 %v123_v59  ;;  %v220_v25 = vld [vmem:[#allocation5 + $0x338] sm:$0xff]  ;;  %v217_v26 = vld [vmem:[#allocation5 + $0x320] sm:$0xff]  ;;  %v219_v27 = vld [vmem:[#allocation5 + $0x330] sm:$0xff] }
  0x6a   :  { %297 = vmatprep.subr.mxu0 %v118_v60  ;;  %374 = vmatprep.subr.mxu1 %v120_v61  ;;  %v214_v28 = vld [vmem:[#allocation5 + $0x308] sm:$0xff]  ;;  %v216_v29 = vld [vmem:[#allocation5 + $0x318] sm:$0xff]  ;;  %v213_v30 = vld [vmem:[#allocation5 + $0x300] sm:$0xff] }
  0x6b   :  { %298 = vmatpush1.msra.mxu0 %v117_v62  ;;  %375 = vmatpush1.msra.mxu1 %v119_v63  ;;  %v215_v31 = vld [vmem:[#allocation5 + $0x310] sm:$0xff]  ;;  %v210_v32 = vld [vmem:[#allocation5 + $0x2e8] sm:$0xff]  ;;  %v212_v33 = vld [vmem:[#allocation5 + $0x2f8] sm:$0xff] }
  0x6c   :  { %299 = vmatprep.subr.mxu0 %v242_v0  ;;  %376 = vmatprep.subr.mxu1 %v244_v1  ;;  %v209_v34 = vld [vmem:[#allocation5 + $0x2e0] sm:$0xff]  ;;  %v211_v35 = vld [vmem:[#allocation5 + $0x2f0] sm:$0xff]  ;;  %v206_v36 = vld [vmem:[#allocation5 + $0x2c8] sm:$0xff] }
  0x6d   :  { %300 = vmatpush2.msra.mxu0 %v241_v2  ;;  %377 = vmatpush2.msra.mxu1 %v243_v3  ;;  %v208_v37 = vld [vmem:[#allocation5 + $0x2d8] sm:$0xff]  ;;  %v205_v38 = vld [vmem:[#allocation5 + $0x2c0] sm:$0xff]  ;;  %v207_v39 = vld [vmem:[#allocation5 + $0x2d0] sm:$0xff] }
  0x6e   :  { %301 = vmatprep.subr.mxu0 %v238_v4  ;;  %378 = vmatprep.subr.mxu1 %v240_v5  ;;  %v202_v40 = vld [vmem:[#allocation5 + $0x2a8] sm:$0xff]  ;;  %v204_v41 = vld [vmem:[#allocation5 + $0x2b8] sm:$0xff]  ;;  %v201_v42 = vld [vmem:[#allocation5 + $0x2a0] sm:$0xff] }
  0x6f   :  { %302 = vmatpush2.msra.mxu0 %v237_v6  ;;  %379 = vmatpush2.msra.mxu1 %v239_v7  ;;  %v203_v43 = vld [vmem:[#allocation5 + $0x2b0] sm:$0xff]  ;;  %v198_v44 = vld [vmem:[#allocation5 + $0x288] sm:$0xff]  ;;  %v200_v45 = vld [vmem:[#allocation5 + $0x298] sm:$0xff] }
  0x70   :  { %303 = vmatprep.subr.mxu0 %v234_v8  ;;  %380 = vmatprep.subr.mxu1 %v236_v9  ;;  %v197_v46 = vld [vmem:[#allocation5 + $0x280] sm:$0xff]  ;;  %v199_v47 = vld [vmem:[#allocation5 + $0x290] sm:$0xff]  ;;  %v194_v48 = vld [vmem:[#allocation5 + $0x268] sm:$0xff] }
  0x71   :  { %304 = vmatpush2.msra.mxu0 %v233_v10  ;;  %381 = vmatpush2.msra.mxu1 %v235_v11  ;;  %v196_v49 = vld [vmem:[#allocation5 + $0x278] sm:$0xff]  ;;  %v193_v50 = vld [vmem:[#allocation5 + $0x260] sm:$0xff]  ;;  %v195_v51 = vld [vmem:[#allocation5 + $0x270] sm:$0xff] }
  0x72   :  { %305 = vmatprep.subr.mxu0 %v230_v12  ;;  %382 = vmatprep.subr.mxu1 %v232_v13  ;;  %v190_v52 = vld [vmem:[#allocation5 + $0x248] sm:$0xff]  ;;  %v192_v53 = vld [vmem:[#allocation5 + $0x258] sm:$0xff]  ;;  %v189_v54 = vld [vmem:[#allocation5 + $0x240] sm:$0xff] }
  0x73   :  { %306 = vmatpush2.msra.mxu0 %v229_v14  ;;  %383 = vmatpush2.msra.mxu1 %v231_v15  ;;  %v191_v55 = vld [vmem:[#allocation5 + $0x250] sm:$0xff]  ;;  %v186_v56 = vld [vmem:[#allocation5 + $0x228] sm:$0xff]  ;;  %v188_v57 = vld [vmem:[#allocation5 + $0x238] sm:$0xff] }
  0x74   :  { %307 = vmatprep.subr.mxu0 %v226_v16  ;;  %384 = vmatprep.subr.mxu1 %v228_v17  ;;  %v185_v58 = vld [vmem:[#allocation5 + $0x220] sm:$0xff]  ;;  %v187_v59 = vld [vmem:[#allocation5 + $0x230] sm:$0xff]  ;;  %v182_v60 = vld [vmem:[#allocation5 + $0x208] sm:$0xff] }
  0x75   :  { %308 = vmatpush2.msra.mxu0 %v225_v18  ;;  %385 = vmatpush2.msra.mxu1 %v227_v19  ;;  %v184_v61 = vld [vmem:[#allocation5 + $0x218] sm:$0xff]  ;;  %v181_v62 = vld [vmem:[#allocation5 + $0x200] sm:$0xff]  ;;  %v114_v63 = vld [vmem:[#allocation2 + $0x8] sm:$0xff] }
  0x76   :  { %309 = vmatprep.subr.mxu0 %v222_v20  ;;  %386 = vmatprep.subr.mxu1 %v224_v21  ;;  %v183_v0 = vld [vmem:[#allocation5 + $0x210] sm:$0xff]  ;;  %v113_v1 = vld [vmem:[#allocation2] sm:$0xff]  ;;  %v116_v2 = vld [vmem:[#allocation2 + $0x18] sm:$0xff] }
  0x77   :  { %310 = vmatpush2.msra.mxu0 %v221_v22  ;;  %387 = vmatpush2.msra.mxu1 %v223_v23  ;;  %v522_v3 = vld [vmem:[#allocation8 + $0x1e8] sm:$0xff]  ;;  %v521_v5 = vld [vmem:[#allocation8 + $0x1e0] sm:$0xff] }
  0x78   :  { %311 = vmatprep.subr.mxu0 %v218_v24  ;;  %388 = vmatprep.subr.mxu1 %v220_v25  ;;  %v650_v4 = vld [vmem:[#allocation8 + $0x5e8] sm:$0xff]  ;;  %v649_v6 = vld [vmem:[#allocation8 + $0x5e0] sm:$0xff] }
  0x79   :  { %312 = vmatpush2.msra.mxu0 %v217_v26  ;;  %389 = vmatpush2.msra.mxu1 %v219_v27  ;;  %v115_v7 = vld [vmem:[#allocation2 + $0x10] sm:$0xff]  ;;  %v517_v10 = vld [vmem:[#allocation8 + $0x1c0] sm:$0xff] }
  0x7a   :  { %313 = vmatprep.subr.mxu0 %v214_v28  ;;  %390 = vmatprep.subr.mxu1 %v216_v29  ;;  %v518_v8 = vld [vmem:[#allocation8 + $0x1c8] sm:$0xff]  ;;  %v645_v11 = vld [vmem:[#allocation8 + $0x5c0] sm:$0xff] }
  0x7b   :  { %314 = vmatpush2.msra.mxu0 %v213_v30  ;;  %391 = vmatpush2.msra.mxu1 %v215_v31  ;;  %v646_v9 = vld [vmem:[#allocation8 + $0x5c8] sm:$0xff]  ;;  %v513_v14 = vld [vmem:[#allocation8 + $0x1a0] sm:$0xff] }
  0x7c   :  { %315 = vmatprep.subr.mxu0 %v210_v32  ;;  %392 = vmatprep.subr.mxu1 %v212_v33  ;;  %v514_v12 = vld [vmem:[#allocation8 + $0x1a8] sm:$0xff]  ;;  %v641_v15 = vld [vmem:[#allocation8 + $0x5a0] sm:$0xff] }
  0x7d   :  { %316 = vmatpush2.msra.mxu0 %v209_v34  ;;  %393 = vmatpush2.msra.mxu1 %v211_v35  ;;  %v642_v13 = vld [vmem:[#allocation8 + $0x5a8] sm:$0xff]  ;;  %v509_v18 = vld [vmem:[#allocation8 + $0x180] sm:$0xff] }
  0x7e   :  { %317 = vmatprep.subr.mxu0 %v206_v36  ;;  %394 = vmatprep.subr.mxu1 %v208_v37  ;;  %v510_v16 = vld [vmem:[#allocation8 + $0x188] sm:$0xff]  ;;  %v637_v19 = vld [vmem:[#allocation8 + $0x580] sm:$0xff] }
  0x7f   :  { %318 = vmatpush2.msra.mxu0 %v205_v38  ;;  %395 = vmatpush2.msra.mxu1 %v207_v39  ;;  %v638_v17 = vld [vmem:[#allocation8 + $0x588] sm:$0xff]  ;;  %v505_v22 = vld [vmem:[#allocation8 + $0x160] sm:$0xff] }
  0x80   :  { %319 = vmatprep.subr.mxu0 %v202_v40  ;;  %396 = vmatprep.subr.mxu1 %v204_v41  ;;  %v506_v20 = vld [vmem:[#allocation8 + $0x168] sm:$0xff]  ;;  %v633_v23 = vld [vmem:[#allocation8 + $0x560] sm:$0xff] }
  0x81   :  { %320 = vmatpush2.msra.mxu0 %v201_v42  ;;  %397 = vmatpush2.msra.mxu1 %v203_v43  ;;  %v634_v21 = vld [vmem:[#allocation8 + $0x568] sm:$0xff]  ;;  %v501_v26 = vld [vmem:[#allocation8 + $0x140] sm:$0xff] }
  0x82   :  { %321 = vmatprep.subr.mxu0 %v198_v44  ;;  %398 = vmatprep.subr.mxu1 %v200_v45  ;;  %v502_v24 = vld [vmem:[#allocation8 + $0x148] sm:$0xff]  ;;  %v629_v27 = vld [vmem:[#allocation8 + $0x540] sm:$0xff] }
  0x83   :  { %322 = vmatpush2.msra.mxu0 %v197_v46  ;;  %399 = vmatpush2.msra.mxu1 %v199_v47  ;;  %v630_v25 = vld [vmem:[#allocation8 + $0x548] sm:$0xff]  ;;  %v497_v30 = vld [vmem:[#allocation8 + $0x120] sm:$0xff] }
  0x84   :  { %323 = vmatprep.subr.mxu0 %v194_v48  ;;  %400 = vmatprep.subr.mxu1 %v196_v49  ;;  %v498_v28 = vld [vmem:[#allocation8 + $0x128] sm:$0xff]  ;;  %v625_v31 = vld [vmem:[#allocation8 + $0x520] sm:$0xff] }
  0x85   :  { %324 = vmatpush2.msra.mxu0 %v193_v50  ;;  %401 = vmatpush2.msra.mxu1 %v195_v51  ;;  %v626_v29 = vld [vmem:[#allocation8 + $0x528] sm:$0xff]  ;;  %v493_v34 = vld [vmem:[#allocation8 + $0x100] sm:$0xff] }
  0x86   :  { %325 = vmatprep.subr.mxu0 %v190_v52  ;;  %402 = vmatprep.subr.mxu1 %v192_v53  ;;  %v494_v32 = vld [vmem:[#allocation8 + $0x108] sm:$0xff]  ;;  %v621_v35 = vld [vmem:[#allocation8 + $0x500] sm:$0xff] }
  0x87   :  { %326 = vmatpush2.msra.mxu0 %v189_v54  ;;  %403 = vmatpush2.msra.mxu1 %v191_v55  ;;  %v622_v33 = vld [vmem:[#allocation8 + $0x508] sm:$0xff]  ;;  %v489_v38 = vld [vmem:[#allocation8 + $0xe0] sm:$0xff] }
  0x88   :  { %327 = vmatprep.subr.mxu0 %v186_v56  ;;  %404 = vmatprep.subr.mxu1 %v188_v57  ;;  %v490_v36 = vld [vmem:[#allocation8 + $0xe8] sm:$0xff]  ;;  %v617_v39 = vld [vmem:[#allocation8 + $0x4e0] sm:$0xff] }
  0x89   :  { %328 = vmatpush2.msra.mxu0 %v185_v58  ;;  %405 = vmatpush2.msra.mxu1 %v187_v59  ;;  %v618_v37 = vld [vmem:[#allocation8 + $0x4e8] sm:$0xff]  ;;  %v485_v42 = vld [vmem:[#allocation8 + $0xc0] sm:$0xff] }
  0x8a   :  { %329 = vmatprep.subr.mxu0 %v182_v60  ;;  %406 = vmatprep.subr.mxu1 %v184_v61  ;;  %v486_v40 = vld [vmem:[#allocation8 + $0xc8] sm:$0xff]  ;;  %v613_v43 = vld [vmem:[#allocation8 + $0x4c0] sm:$0xff] }
  0x8b   :  { %330 = vmatpush2.msra.mxu0 %v181_v62  ;;  %331 = vmatprep.mubr.f32.mxu0 %v114_v63  ;;  %v614_v41 = vld [vmem:[#allocation8 + $0x4c8] sm:$0xff]  ;;  %v481_v46 = vld [vmem:[#allocation8 + $0xa0] sm:$0xff] }
  0x8c   :  { %407 = vmatpush2.msra.mxu1 %v183_v0  ;;  %408 = vmatprep.mubr.f32.mxu1 %v114_v63  ;;  %v482_v44 = vld [vmem:[#allocation8 + $0xa8] sm:$0xff]  ;;  %v609_v47 = vld [vmem:[#allocation8 + $0x4a0] sm:$0xff] }
  0x8d   :  { %332 = vmatmul.mubr.f32.vlgmr.msra.gmra.mxu0 %v113_v1  ;;  %409 = vmatmul.mubr.f32.vlgmr.msra.gmra.mxu1 %v113_v1  ;;  %v610_v45 = vld [vmem:[#allocation8 + $0x4a8] sm:$0xff]  ;;  %v477_v50 = vld [vmem:[#allocation8 + $0x80] sm:$0xff] }
  0x8e   :  { %337 = vmatprep.mubr.f32.mxu0 %v116_v2  ;;  %414 = vmatprep.mubr.f32.mxu1 %v116_v2  ;;  %v478_v48 = vld [vmem:[#allocation8 + $0x88] sm:$0xff]  ;;  %v605_v51 = vld [vmem:[#allocation8 + $0x480] sm:$0xff] }
  0x8f   :  { %739 = vmatprep.subr.mxu0 %v522_v3  ;;  %816 = vmatprep.subr.mxu1 %v650_v4  ;;  %v606_v49 = vld [vmem:[#allocation8 + $0x488] sm:$0xff]  ;;  %v473_v54 = vld [vmem:[#allocation8 + $0x60] sm:$0xff] }
  0x90   :  { %740 = vmatpush1.msra.mxu0 %v521_v5  ;;  %817 = vmatpush1.msra.mxu1 %v649_v6  ;;  %v474_v52 = vld [vmem:[#allocation8 + $0x68] sm:$0xff]  ;;  %v601_v55 = vld [vmem:[#allocation8 + $0x460] sm:$0xff] }
  0x91   :  { %338 = vmatmul.mubr.f32.gmra.mxu0 %v115_v7  ;;  %415 = vmatmul.mubr.f32.gmra.mxu1 %v115_v7  ;;  %v602_v53 = vld [vmem:[#allocation8 + $0x468] sm:$0xff]  ;;  %v469_v58 = vld [vmem:[#allocation8 + $0x40] sm:$0xff] }
  0x92   :  { %741 = vmatprep.subr.mxu0 %v518_v8  ;;  %818 = vmatprep.subr.mxu1 %v646_v9  ;;  %v470_v56 = vld [vmem:[#allocation8 + $0x48] sm:$0xff]  ;;  %v597_v59 = vld [vmem:[#allocation8 + $0x440] sm:$0xff] }
  0x93   :  { %742 = vmatpush1.msra.mxu0 %v517_v10  ;;  %819 = vmatpush1.msra.mxu1 %v645_v11  ;;  %v598_v57 = vld [vmem:[#allocation8 + $0x448] sm:$0xff]  ;;  %v465_v62 = vld [vmem:[#allocation8 + $0x20] sm:$0xff] }
  0x94   :  { %743 = vmatprep.subr.mxu0 %v514_v12  ;;  %820 = vmatprep.subr.mxu1 %v642_v13  ;;  %v466_v60 = vld [vmem:[#allocation8 + $0x28] sm:$0xff]  ;;  %v593_v63 = vld [vmem:[#allocation8 + $0x420] sm:$0xff] }
  0x95   :  { %744 = vmatpush1.msra.mxu0 %v513_v14  ;;  %821 = vmatpush1.msra.mxu1 %v641_v15  ;;  %v594_v61 = vld [vmem:[#allocation8 + $0x428] sm:$0xff]  ;;  %v461_v2 = vld [vmem:[#allocation8] sm:$0xff] }
  0x96   :  { %745 = vmatprep.subr.mxu0 %v510_v16  ;;  %822 = vmatprep.subr.mxu1 %v638_v17  ;;  %v462_v0 = vld [vmem:[#allocation8 + $0x8] sm:$0xff]  ;;  %v589_v3 = vld [vmem:[#allocation8 + $0x400] sm:$0xff] }
  0x97   :  { %746 = vmatpush1.msra.mxu0 %v509_v18  ;;  %823 = vmatpush1.msra.mxu1 %v637_v19  ;;  %v590_v1 = vld [vmem:[#allocation8 + $0x408] sm:$0xff]  ;;  %v585_v6 = vld [vmem:[#allocation8 + $0x3e0] sm:$0xff] }
  0x98   :  { %747 = vmatprep.subr.mxu0 %v506_v20  ;;  %824 = vmatprep.subr.mxu1 %v634_v21  ;;  %v586_v4 = vld [vmem:[#allocation8 + $0x3e8] sm:$0xff]  ;;  %v713_v7 = vld [vmem:[#allocation8 + $0x7e0] sm:$0xff] }
  0x99   :  { %748 = vmatpush1.msra.mxu0 %v505_v22  ;;  %825 = vmatpush1.msra.mxu1 %v633_v23  ;;  %v714_v5 = vld [vmem:[#allocation8 + $0x7e8] sm:$0xff]  ;;  %v581_v10 = vld [vmem:[#allocation8 + $0x3c0] sm:$0xff] }
  0x9a   :  { %749 = vmatprep.subr.mxu0 %v502_v24  ;;  %826 = vmatprep.subr.mxu1 %v630_v25  ;;  %v582_v8 = vld [vmem:[#allocation8 + $0x3c8] sm:$0xff]  ;;  %v709_v11 = vld [vmem:[#allocation8 + $0x7c0] sm:$0xff] }
  0x9b   :  { %750 = vmatpush1.msra.mxu0 %v501_v26  ;;  %827 = vmatpush1.msra.mxu1 %v629_v27  ;;  %v710_v9 = vld [vmem:[#allocation8 + $0x7c8] sm:$0xff]  ;;  %v577_v14 = vld [vmem:[#allocation8 + $0x3a0] sm:$0xff] }
  0x9c   :  { %751 = vmatprep.subr.mxu0 %v498_v28  ;;  %828 = vmatprep.subr.mxu1 %v626_v29  ;;  %v578_v12 = vld [vmem:[#allocation8 + $0x3a8] sm:$0xff]  ;;  %v705_v15 = vld [vmem:[#allocation8 + $0x7a0] sm:$0xff] }
  0x9d   :  { %752 = vmatpush1.msra.mxu0 %v497_v30  ;;  %829 = vmatpush1.msra.mxu1 %v625_v31  ;;  %v706_v13 = vld [vmem:[#allocation8 + $0x7a8] sm:$0xff]  ;;  %v573_v18 = vld [vmem:[#allocation8 + $0x380] sm:$0xff] }
  0x9e   :  { %753 = vmatprep.subr.mxu0 %v494_v32  ;;  %830 = vmatprep.subr.mxu1 %v622_v33  ;;  %v574_v16 = vld [vmem:[#allocation8 + $0x388] sm:$0xff]  ;;  %v701_v19 = vld [vmem:[#allocation8 + $0x780] sm:$0xff] }
  0x9f   :  { %754 = vmatpush1.msra.mxu0 %v493_v34  ;;  %831 = vmatpush1.msra.mxu1 %v621_v35  ;;  %v702_v17 = vld [vmem:[#allocation8 + $0x788] sm:$0xff]  ;;  %v569_v22 = vld [vmem:[#allocation8 + $0x360] sm:$0xff] }
  0xa0   :  { %755 = vmatprep.subr.mxu0 %v490_v36  ;;  %832 = vmatprep.subr.mxu1 %v618_v37  ;;  %v570_v20 = vld [vmem:[#allocation8 + $0x368] sm:$0xff]  ;;  %v697_v23 = vld [vmem:[#allocation8 + $0x760] sm:$0xff] }
  0xa1   :  { %756 = vmatpush1.msra.mxu0 %v489_v38  ;;  %833 = vmatpush1.msra.mxu1 %v617_v39  ;;  %v698_v21 = vld [vmem:[#allocation8 + $0x768] sm:$0xff]  ;;  %v565_v26 = vld [vmem:[#allocation8 + $0x340] sm:$0xff] }
  0xa2   :  { %757 = vmatprep.subr.mxu0 %v486_v40  ;;  %834 = vmatprep.subr.mxu1 %v614_v41  ;;  %v566_v24 = vld [vmem:[#allocation8 + $0x348] sm:$0xff]  ;;  %v693_v27 = vld [vmem:[#allocation8 + $0x740] sm:$0xff] }
  0xa3   :  { %758 = vmatpush1.msra.mxu0 %v485_v42  ;;  %835 = vmatpush1.msra.mxu1 %v613_v43  ;;  %v694_v25 = vld [vmem:[#allocation8 + $0x748] sm:$0xff]  ;;  %v561_v30 = vld [vmem:[#allocation8 + $0x320] sm:$0xff] }
  0xa4   :  { %759 = vmatprep.subr.mxu0 %v482_v44  ;;  %836 = vmatprep.subr.mxu1 %v610_v45  ;;  %v562_v28 = vld [vmem:[#allocation8 + $0x328] sm:$0xff]  ;;  %v689_v31 = vld [vmem:[#allocation8 + $0x720] sm:$0xff] }
  0xa5   :  { %760 = vmatpush1.msra.mxu0 %v481_v46  ;;  %837 = vmatpush1.msra.mxu1 %v609_v47  ;;  %v690_v29 = vld [vmem:[#allocation8 + $0x728] sm:$0xff]  ;;  %v557_v34 = vld [vmem:[#allocation8 + $0x300] sm:$0xff] }
  0xa6   :  { %761 = vmatprep.subr.mxu0 %v478_v48  ;;  %838 = vmatprep.subr.mxu1 %v606_v49  ;;  %v558_v32 = vld [vmem:[#allocation8 + $0x308] sm:$0xff]  ;;  %v685_v35 = vld [vmem:[#allocation8 + $0x700] sm:$0xff] }
  0xa7   :  { %762 = vmatpush1.msra.mxu0 %v477_v50  ;;  %839 = vmatpush1.msra.mxu1 %v605_v51  ;;  %v686_v33 = vld [vmem:[#allocation8 + $0x708] sm:$0xff]  ;;  %v553_v38 = vld [vmem:[#allocation8 + $0x2e0] sm:$0xff] }
  0xa8   :  { %763 = vmatprep.subr.mxu0 %v474_v52  ;;  %840 = vmatprep.subr.mxu1 %v602_v53  ;;  %v554_v36 = vld [vmem:[#allocation8 + $0x2e8] sm:$0xff]  ;;  %v681_v39 = vld [vmem:[#allocation8 + $0x6e0] sm:$0xff] }
  0xa9   :  { %764 = vmatpush1.msra.mxu0 %v473_v54  ;;  %841 = vmatpush1.msra.mxu1 %v601_v55  ;;  %v682_v37 = vld [vmem:[#allocation8 + $0x6e8] sm:$0xff]  ;;  %v549_v42 = vld [vmem:[#allocation8 + $0x2c0] sm:$0xff] }
  0xaa   :  { %765 = vmatprep.subr.mxu0 %v470_v56  ;;  %842 = vmatprep.subr.mxu1 %v598_v57  ;;  %v550_v40 = vld [vmem:[#allocation8 + $0x2c8] sm:$0xff]  ;;  %v677_v43 = vld [vmem:[#allocation8 + $0x6c0] sm:$0xff] }
  0xab   :  { %766 = vmatpush1.msra.mxu0 %v469_v58  ;;  %843 = vmatpush1.msra.mxu1 %v597_v59  ;;  %v678_v41 = vld [vmem:[#allocation8 + $0x6c8] sm:$0xff]  ;;  %v545_v46 = vld [vmem:[#allocation8 + $0x2a0] sm:$0xff] }
  0xac   :  { %767 = vmatprep.subr.mxu0 %v466_v60  ;;  %844 = vmatprep.subr.mxu1 %v594_v61  ;;  %v546_v44 = vld [vmem:[#allocation8 + $0x2a8] sm:$0xff]  ;;  %v673_v47 = vld [vmem:[#allocation8 + $0x6a0] sm:$0xff] }
  0xad   :  { %768 = vmatpush1.msra.mxu0 %v465_v62  ;;  %845 = vmatpush1.msra.mxu1 %v593_v63  ;;  %v674_v45 = vld [vmem:[#allocation8 + $0x6a8] sm:$0xff]  ;;  %v541_v50 = vld [vmem:[#allocation8 + $0x280] sm:$0xff] }
  0xae   :  { %769 = vmatprep.subr.mxu0 %v462_v0  ;;  %846 = vmatprep.subr.mxu1 %v590_v1  ;;  %v542_v48 = vld [vmem:[#allocation8 + $0x288] sm:$0xff]  ;;  %v669_v51 = vld [vmem:[#allocation8 + $0x680] sm:$0xff] }
  0xaf   :  { %770 = vmatpush1.msra.mxu0 %v461_v2  ;;  %847 = vmatpush1.msra.mxu1 %v589_v3  ;;  %v670_v49 = vld [vmem:[#allocation8 + $0x688] sm:$0xff]  ;;  %v537_v54 = vld [vmem:[#allocation8 + $0x260] sm:$0xff] }
  0xb0   :  { %771 = vmatprep.subr.mxu0 %v586_v4  ;;  %848 = vmatprep.subr.mxu1 %v714_v5  ;;  %v538_v52 = vld [vmem:[#allocation8 + $0x268] sm:$0xff]  ;;  %v665_v55 = vld [vmem:[#allocation8 + $0x660] sm:$0xff]  ;;  %v524_v4 = vld [vmem:[#allocation8 + $0x1f8] sm:$0xff] }
  0xb1   :  { %772 = vmatpush2.msra.mxu0 %v585_v6  ;;  %849 = vmatpush2.msra.mxu1 %v713_v7  ;;  %v666_v53 = vld [vmem:[#allocation8 + $0x668] sm:$0xff]  ;;  %v533_v58 = vld [vmem:[#allocation8 + $0x240] sm:$0xff]  ;;  %v652_v5 = vld [vmem:[#allocation8 + $0x5f8] sm:$0xff]  ;;  %v247_v6 = vlaneseq }
  0xb2   :  { %773 = vmatprep.subr.mxu0 %v582_v8  ;;  %850 = vmatprep.subr.mxu1 %v710_v9  ;;  %v534_v56 = vld [vmem:[#allocation8 + $0x248] sm:$0xff]  ;;  %v661_v59 = vld [vmem:[#allocation8 + $0x640] sm:$0xff] }
  0xb3   :  { %774 = vmatpush2.msra.mxu0 %v581_v10  ;;  %851 = vmatpush2.msra.mxu1 %v709_v11  ;;  %v662_v57 = vld [vmem:[#allocation8 + $0x648] sm:$0xff]  ;;  %v529_v62 = vld [vmem:[#allocation8 + $0x220] sm:$0xff]  ;;  %v248_v7 = vshrl.u32 %v247_v6, 7  ;;  %v245_v10 = vld [vmem:[#allocation7] sm:$0xf] }
  0xb4   :  { %775 = vmatprep.subr.mxu0 %v578_v12  ;;  %852 = vmatprep.subr.mxu1 %v706_v13  ;;  %v530_v60 = vld [vmem:[#allocation8 + $0x228] sm:$0xff]  ;;  %v657_v63 = vld [vmem:[#allocation8 + $0x620] sm:$0xff] }
  0xb5   :  { %776 = vmatpush2.msra.mxu0 %v577_v14  ;;  %853 = vmatpush2.msra.mxu1 %v705_v15  ;;  %v658_v61 = vld [vmem:[#allocation8 + $0x628] sm:$0xff]  ;;  %v525_v2 = vld [vmem:[#allocation8 + $0x200] sm:$0xff]  ;;  %v2683_v8 = vsub.s32 0, %v248_v7  ;;  %v2685_v9 = vsub.s32 2, %v248_v7  ;;  %v2687_v11 = vsub.s32 1, %v248_v7  ;;  %v2689_v12 = vsub.s32 3, %v248_v7 }
  0xb6   :  { %777 = vmatprep.subr.mxu0 %v574_v16  ;;  %854 = vmatprep.subr.mxu1 %v702_v17  ;;  %v526_v0 = vld [vmem:[#allocation8 + $0x208] sm:$0xff]  ;;  %v653_v3 = vld [vmem:[#allocation8 + $0x600] sm:$0xff]  ;;  %v648_v7 = vld [vmem:[#allocation8 + $0x5d8] sm:$0xff] }
  0xb7   :  { %778 = vmatpush2.msra.mxu0 %v573_v18  ;;  %855 = vmatpush2.msra.mxu1 %v701_v19  ;;  %v654_v1 = vld [vmem:[#allocation8 + $0x608] sm:$0xff]  ;;  %v250_v13 = vrot.slane %v245_v10, %v2683_v8  ;;  %v258_v14 = vrot.slane %v245_v10, %v2685_v9  ;;  %v254_v17 = vrot.slane %v245_v10, %v2687_v11 }
  0xb8   :  { %779 = vmatprep.subr.mxu0 %v570_v20  ;;  %856 = vmatprep.subr.mxu1 %v698_v21  ;;  %v262_v18 = vrot.slane %v245_v10, %v2689_v12  ;;  %v519_v10 = vld [vmem:[#allocation8 + $0x1d0] sm:$0xff] }
  0xb9   :  { %780 = vmatpush2.msra.mxu0 %v569_v22  ;;  %857 = vmatpush2.msra.mxu1 %v697_v23 }
  0xba   :  { %781 = vmatprep.subr.mxu0 %v566_v24  ;;  %858 = vmatprep.subr.mxu1 %v694_v25 }
  0xbb   :  { %782 = vmatpush2.msra.mxu0 %v565_v26  ;;  %859 = vmatpush2.msra.mxu1 %v693_v27 }
  0xbc   :  { %783 = vmatprep.subr.mxu0 %v562_v28  ;;  %860 = vmatprep.subr.mxu1 %v690_v29 }
  0xbd   :  { %784 = vmatpush2.msra.mxu0 %v561_v30  ;;  %861 = vmatpush2.msra.mxu1 %v689_v31 }
  0xbe   :  { %785 = vmatprep.subr.mxu0 %v558_v32  ;;  %862 = vmatprep.subr.mxu1 %v686_v33 }
  0xbf   :  { %786 = vmatpush2.msra.mxu0 %v557_v34  ;;  %863 = vmatpush2.msra.mxu1 %v685_v35 }
  0xc0   :  { %787 = vmatprep.subr.mxu0 %v554_v36  ;;  %864 = vmatprep.subr.mxu1 %v682_v37 }
  0xc1   :  { %788 = vmatpush2.msra.mxu0 %v553_v38  ;;  %865 = vmatpush2.msra.mxu1 %v681_v39 }
  0xc2   :  { %789 = vmatprep.subr.mxu0 %v550_v40  ;;  %866 = vmatprep.subr.mxu1 %v678_v41 }
  0xc3   :  { %790 = vmatpush2.msra.mxu0 %v549_v42  ;;  %867 = vmatpush2.msra.mxu1 %v677_v43 }
  0xc4   :  { %791 = vmatprep.subr.mxu0 %v546_v44  ;;  %868 = vmatprep.subr.mxu1 %v674_v45 }
  0xc5   :  { %792 = vmatpush2.msra.mxu0 %v545_v46  ;;  %869 = vmatpush2.msra.mxu1 %v673_v47 }
  0xc6   :  { %793 = vmatprep.subr.mxu0 %v542_v48  ;;  %870 = vmatprep.subr.mxu1 %v670_v49 }
  0xc7   :  { %794 = vmatpush2.msra.mxu0 %v541_v50  ;;  %871 = vmatpush2.msra.mxu1 %v669_v51 }
  0xc8   :  { %795 = vmatprep.subr.mxu0 %v538_v52  ;;  %872 = vmatprep.subr.mxu1 %v666_v53 }
  0xc9   :  { %796 = vmatpush2.msra.mxu0 %v537_v54  ;;  %873 = vmatpush2.msra.mxu1 %v665_v55 }
  0xca   :  { %797 = vmatprep.subr.mxu0 %v534_v56  ;;  %874 = vmatprep.subr.mxu1 %v662_v57 }
  0xcb   :  { %798 = vmatpush2.msra.mxu0 %v533_v58  ;;  %875 = vmatpush2.msra.mxu1 %v661_v59 }
  0xcc   :  { %799 = vmatprep.subr.mxu0 %v530_v60  ;;  %876 = vmatprep.subr.mxu1 %v658_v61 }
  0xcd   :  { %800 = vmatpush2.msra.mxu0 %v529_v62  ;;  %877 = vmatpush2.msra.mxu1 %v657_v63  ;;  %v523_v62 = vld [vmem:[#allocation8 + $0x1f0] sm:$0xff] }
  0xce   :  { %801 = vmatprep.subr.mxu0 %v526_v0  ;;  %878 = vmatprep.subr.mxu1 %v654_v1 }
  0xcf   :  { %802 = vmatpush2.msra.mxu0 %v525_v2  ;;  %879 = vmatpush2.msra.mxu1 %v653_v3  ;;  %v651_v3 = vld [vmem:[#allocation8 + $0x5f0] sm:$0xff] }
  0xd0   :  { %893 = vmatprep.subr.mxu0 %v524_v4  ;;  %970 = vmatprep.subr.mxu1 %v652_v5  ;;  %v520_v4 = vld [vmem:[#allocation8 + $0x1d8] sm:$0xff] }
 0x14d   :  { %v333_v15 = vpop.f32.mrf.mxu0  ;;  %v410_v16 = vpop.f32.mrf.mxu1 }
 0x14e   :  { %v334_v19 = vadd.f32 %v333_v15, %v250_v13  ;;  %v411_v20 = vadd.f32 %v410_v16, %v258_v14 }
 0x14f   :  { %v335_v21 = vpop.f32.mrf.mxu0  ;;  %v412_v22 = vpop.f32.mrf.mxu1 }
 0x150   :  { %v429_v23 = vmul.f32 0.70710677, %v334_v19  ;;  %v431_v24 = vmul.f32 0.70710677, %v411_v20  ;;  %v336_v25 = vadd.f32 %v335_v21, %v254_v17  ;;  %v413_v26 = vadd.f32 %v412_v22, %v262_v18  ;;  %v515_v21 = vld [vmem:[#allocation8 + $0x1b0] sm:$0xff] }
 0x151   :  { %v339_v27 = vpop.f32.mrf.mxu0  ;;  %v416_v28 = vpop.f32.mrf.mxu1  ;;  %v421_v50 = vmul.f32 0.5, %v334_v19  ;;  %v423_v54 = vmul.f32 0.5, %v411_v20  ;;  %v644_v19 = vld [vmem:[#allocation8 + $0x5b8] sm:$0xff]  ;;  %v643_v22 = vld [vmem:[#allocation8 + $0x5b0] sm:$0xff] }
 0x152   :  { %2378 = verf.f32 %v429_v23  ;;  %v340_v29 = vadd.f32 %v339_v27, %v250_v13  ;;  %v417_v30 = vadd.f32 %v416_v28, %v258_v14  ;;  %v430_v31 = vmul.f32 0.70710677, %v336_v25  ;;  %v647_v14 = vld [vmem:[#allocation8 + $0x5d0] sm:$0xff]  ;;  %v512_v23 = vld [vmem:[#allocation8 + $0x198] sm:$0xff] }
 0x153   :  { %2380 = verf.f32 %v431_v24  ;;  %v341_v32 = vpop.f32.mrf.mxu0  ;;  %v418_v33 = vpop.f32.mrf.mxu1  ;;  %v432_v34 = vmul.f32 0.70710677, %v413_v26  ;;  %v422_v47 = vmul.f32 0.5, %v336_v25  ;;  %v424_v51 = vmul.f32 0.5, %v413_v26  ;;  %v640_v24 = vld [vmem:[#allocation8 + $0x598] sm:$0xff]  ;;  %v511_v25 = vld [vmem:[#allocation8 + $0x190] sm:$0xff] }
 0x154   :  { %v433_v35 = vmul.f32 0.70710677, %v340_v29  ;;  %2382 = verf.f32 %v430_v31  ;;  %v435_v36 = vmul.f32 0.70710677, %v417_v30  ;;  %v342_v37 = vadd.f32 %v341_v32, %v254_v17  ;;  %v516_v17 = vld [vmem:[#allocation8 + $0x1b8] sm:$0xff]  ;;  %v639_v26 = vld [vmem:[#allocation8 + $0x590] sm:$0xff] }
 0x155   :  { %v419_v38 = vadd.f32 %v418_v33, %v262_v18  ;;  %2384 = verf.f32 %v432_v34  ;;  %v425_v55 = vmul.f32 0.5, %v340_v29  ;;  %v427_v2 = vmul.f32 0.5, %v417_v30  ;;  %v508_v27 = vld [vmem:[#allocation8 + $0x178] sm:$0xff]  ;;  %v507_v29 = vld [vmem:[#allocation8 + $0x170] sm:$0xff] }
 0x156   :  { %2386 = verf.f32 %v433_v35  ;;  %v434_v39 = vmul.f32 0.70710677, %v342_v37  ;;  %v426_v56 = vmul.f32 0.5, %v342_v37  ;;  %v636_v28 = vld [vmem:[#allocation8 + $0x578] sm:$0xff]  ;;  %v635_v30 = vld [vmem:[#allocation8 + $0x570] sm:$0xff] }
 0x157   :  { %2388 = verf.f32 %v435_v36  ;;  %v436_v40 = vmul.f32 0.70710677, %v419_v38  ;;  %v428_v60 = vmul.f32 0.5, %v419_v38  ;;  %v504_v31 = vld [vmem:[#allocation8 + $0x158] sm:$0xff]  ;;  %v503_v33 = vld [vmem:[#allocation8 + $0x150] sm:$0xff] }
 0x158   :  { %2390 = verf.f32 %v434_v39  ;;  %v632_v32 = vld [vmem:[#allocation8 + $0x558] sm:$0xff]  ;;  %v631_v34 = vld [vmem:[#allocation8 + $0x550] sm:$0xff] }
 0x159   :  { %2392 = verf.f32 %v436_v40  ;;  %v500_v35 = vld [vmem:[#allocation8 + $0x138] sm:$0xff]  ;;  %v499_v37 = vld [vmem:[#allocation8 + $0x130] sm:$0xff] }
 0x15a   :  { %v628_v36 = vld [vmem:[#allocation8 + $0x538] sm:$0xff]  ;;  %v627_v38 = vld [vmem:[#allocation8 + $0x530] sm:$0xff] }
 0x15b   :  { %v496_v39 = vld [vmem:[#allocation8 + $0x118] sm:$0xff] }
 0x15c   :  { %v624_v40 = vld [vmem:[#allocation8 + $0x518] sm:$0xff] }
 0x15f   :  { %v2379_v41 = vpop.eup %2378 }
 0x160   :  { %v2381_v42 = vpop.eup %2380  ;;  %v445_v44 = vadd.f32 1.0, %v2379_v41  ;;  %v495_v41 = vld [vmem:[#allocation8 + $0x110] sm:$0xff] }
 0x161   :  { %v2383_v43 = vpop.eup %2382  ;;  %v447_v46 = vadd.f32 1.0, %v2381_v42  ;;  %v623_v42 = vld [vmem:[#allocation8 + $0x510] sm:$0xff] }
 0x162   :  { %v2385_v45 = vpop.eup %2384  ;;  %v446_v48 = vadd.f32 1.0, %v2383_v43  ;;  %v2695_v59 = vmul.f32 %v445_v44, %v421_v50  ;;  %v492_v43 = vld [vmem:[#allocation8 + $0xf8] sm:$0xff]  ;;  %v615_v50 = vld [vmem:[#allocation8 + $0x4d0] sm:$0xff] }
 0x163   :  { %v2387_v49 = vpop.eup %2386  ;;  %v448_v52 = vadd.f32 1.0, %v2385_v45  ;;  %v2697_v1 = vmul.f32 %v447_v46, %v423_v54  ;;  %v620_v44 = vld [vmem:[#allocation8 + $0x4f8] sm:$0xff]  ;;  %v491_v45 = vld [vmem:[#allocation8 + $0xf0] sm:$0xff] }
 0x164   :  { %v2389_v53 = vpop.eup %2388  ;;  %v454_v57 = vmul.f32 %v446_v48, %v422_v47  ;;  %v449_v63 = vadd.f32 1.0, %v2387_v49  ;;  %v619_v46 = vld [vmem:[#allocation8 + $0x4f0] sm:$0xff]  ;;  %v488_v47 = vld [vmem:[#allocation8 + $0xd8] sm:$0xff] }
 0x165   :  { %v2391_v58 = vpop.eup %2390  ;;  %v456_v61 = vmul.f32 %v448_v52, %v424_v51  ;;  %v451_v6 = vadd.f32 1.0, %v2389_v53  ;;  %v616_v48 = vld [vmem:[#allocation8 + $0x4d8] sm:$0xff]  ;;  %v487_v49 = vld [vmem:[#allocation8 + $0xd0] sm:$0xff] }
 0x166   :  { %v2393_v0 = vpop.eup %2392  ;;  %803 = vmatprep.mubr.f32.mxu0 %v454_v57  ;;  %v450_v5 = vadd.f32 1.0, %v2391_v58  ;;  %v2705_v18 = vmul.f32 %v449_v63, %v425_v55  ;;  %v484_v51 = vld [vmem:[#allocation8 + $0xb8] sm:$0xff]  ;;  %v483_v53 = vld [vmem:[#allocation8 + $0xb0] sm:$0xff] }
 0x167   :  { %880 = vmatprep.mubr.f32.mxu1 %v456_v61  ;;  %804 = vmatmul.mubr.f32.vlgmr.msra.gmra.mxu0 %v2695_v59  ;;  %v452_v13 = vadd.f32 1.0, %v2393_v0  ;;  %v2707_v20 = vmul.f32 %v451_v6, %v427_v2  ;;  %v612_v52 = vld [vmem:[#allocation8 + $0x4b8] sm:$0xff]  ;;  %v611_v54 = vld [vmem:[#allocation8 + $0x4b0] sm:$0xff] }
 0x168   :  { %881 = vmatmul.mubr.f32.vlgmr.msra.gmra.mxu1 %v2697_v1  ;;  %894 = vmatpush1.msra.mxu0 %v523_v62  ;;  %v2701_v15 = vmul.f32 %v450_v5, %v426_v56  ;;  %v480_v55 = vld [vmem:[#allocation8 + $0x98] sm:$0xff]  ;;  %v607_v58 = vld [vmem:[#allocation8 + $0x490] sm:$0xff] }
 0x169   :  { %971 = vmatpush1.msra.mxu1 %v651_v3  ;;  %895 = vmatprep.subr.mxu0 %v520_v4  ;;  %v2703_v16 = vmul.f32 %v452_v13, %v428_v60  ;;  %v608_v56 = vld [vmem:[#allocation8 + $0x498] sm:$0xff]  ;;  %v475_v62 = vld [vmem:[#allocation8 + $0x70] sm:$0xff] }
 0x16a   :  { %972 = vmatprep.subr.mxu1 %v648_v7  ;;  %896 = vmatpush1.msra.mxu0 %v519_v10  ;;  %v476_v60 = vld [vmem:[#allocation8 + $0x78] sm:$0xff]  ;;  %v603_v63 = vld [vmem:[#allocation8 + $0x470] sm:$0xff] }
 0x16b   :  { %973 = vmatpush1.msra.mxu1 %v647_v14  ;;  %809 = vmatprep.mubr.f32.mxu0 %v2701_v15  ;;  %v472_v0 = vld [vmem:[#allocation8 + $0x58] sm:$0xff]  ;;  %v471_v3 = vld [vmem:[#allocation8 + $0x50] sm:$0xff] }
 0x16c   :  { %886 = vmatprep.mubr.f32.mxu1 %v2703_v16  ;;  %897 = vmatprep.subr.mxu0 %v516_v17  ;;  %v600_v2 = vld [vmem:[#allocation8 + $0x458] sm:$0xff]  ;;  %v599_v4 = vld [vmem:[#allocation8 + $0x450] sm:$0xff] }
 0x16d   :  { %974 = vmatprep.subr.mxu1 %v644_v19  ;;  %810 = vmatmul.mubr.f32.gmra.mxu0 %v2705_v18  ;;  %v468_v5 = vld [vmem:[#allocation8 + $0x38] sm:$0xff]  ;;  %v467_v7 = vld [vmem:[#allocation8 + $0x30] sm:$0xff] }
 0x16e   :  { %887 = vmatmul.mubr.f32.gmra.mxu1 %v2707_v20  ;;  %898 = vmatpush1.msra.mxu0 %v515_v21  ;;  %v596_v6 = vld [vmem:[#allocation8 + $0x438] sm:$0xff]  ;;  %v595_v10 = vld [vmem:[#allocation8 + $0x430] sm:$0xff] }
 0x16f   :  { %975 = vmatpush1.msra.mxu1 %v643_v22  ;;  %899 = vmatprep.subr.mxu0 %v512_v23  ;;  %v464_v13 = vld [vmem:[#allocation8 + $0x18] sm:$0xff]  ;;  %v463_v17 = vld [vmem:[#allocation8 + $0x10] sm:$0xff] }
 0x170   :  { %957 = vmatprep.mubr.f32.mxu0 %v454_v57  ;;  %976 = vmatprep.subr.mxu1 %v640_v24  ;;  %v479_v57 = vld [vmem:[#allocation8 + $0x90] sm:$0xff]  ;;  %v592_v14 = vld [vmem:[#allocation8 + $0x418] sm:$0xff] }
 0x171   :  { %1034 = vmatprep.mubr.f32.mxu1 %v456_v61  ;;  %900 = vmatpush1.msra.mxu0 %v511_v25  ;;  %v604_v61 = vld [vmem:[#allocation8 + $0x478] sm:$0xff]  ;;  %v591_v19 = vld [vmem:[#allocation8 + $0x410] sm:$0xff] }
 0x172   :  { %977 = vmatpush1.msra.mxu1 %v639_v26  ;;  %901 = vmatprep.subr.mxu0 %v508_v27  ;;  %v588_v21 = vld [vmem:[#allocation8 + $0x3f8] sm:$0xff]  ;;  %v587_v23 = vld [vmem:[#allocation8 + $0x3f0] sm:$0xff] }
 0x173   :  { %978 = vmatprep.subr.mxu1 %v636_v28  ;;  %902 = vmatpush1.msra.mxu0 %v507_v29  ;;  %v716_v22 = vld [vmem:[#allocation8 + $0x7f8] sm:$0xff]  ;;  %v715_v24 = vld [vmem:[#allocation8 + $0x7f0] sm:$0xff] }
 0x174   :  { %979 = vmatpush1.msra.mxu1 %v635_v30  ;;  %903 = vmatprep.subr.mxu0 %v504_v31  ;;  %v584_v25 = vld [vmem:[#allocation8 + $0x3d8] sm:$0xff]  ;;  %v583_v27 = vld [vmem:[#allocation8 + $0x3d0] sm:$0xff] }
 0x175   :  { %980 = vmatprep.subr.mxu1 %v632_v32  ;;  %904 = vmatpush1.msra.mxu0 %v503_v33  ;;  %v712_v26 = vld [vmem:[#allocation8 + $0x7d8] sm:$0xff]  ;;  %v711_v28 = vld [vmem:[#allocation8 + $0x7d0] sm:$0xff] }
 0x176   :  { %981 = vmatpush1.msra.mxu1 %v631_v34  ;;  %905 = vmatprep.subr.mxu0 %v500_v35  ;;  %v580_v29 = vld [vmem:[#allocation8 + $0x3b8] sm:$0xff]  ;;  %v579_v31 = vld [vmem:[#allocation8 + $0x3b0] sm:$0xff] }
 0x177   :  { %982 = vmatprep.subr.mxu1 %v628_v36  ;;  %906 = vmatpush1.msra.mxu0 %v499_v37  ;;  %v708_v30 = vld [vmem:[#allocation8 + $0x7b8] sm:$0xff]  ;;  %v707_v32 = vld [vmem:[#allocation8 + $0x7b0] sm:$0xff] }
 0x178   :  { %983 = vmatpush1.msra.mxu1 %v627_v38  ;;  %907 = vmatprep.subr.mxu0 %v496_v39  ;;  %v576_v33 = vld [vmem:[#allocation8 + $0x398] sm:$0xff]  ;;  %v575_v35 = vld [vmem:[#allocation8 + $0x390] sm:$0xff] }
 0x179   :  { %984 = vmatprep.subr.mxu1 %v624_v40  ;;  %908 = vmatpush1.msra.mxu0 %v495_v41  ;;  %v704_v34 = vld [vmem:[#allocation8 + $0x798] sm:$0xff]  ;;  %v703_v36 = vld [vmem:[#allocation8 + $0x790] sm:$0xff] }
 0x17a   :  { %985 = vmatpush1.msra.mxu1 %v623_v42  ;;  %909 = vmatprep.subr.mxu0 %v492_v43  ;;  %v572_v37 = vld [vmem:[#allocation8 + $0x378] sm:$0xff]  ;;  %v571_v39 = vld [vmem:[#allocation8 + $0x370] sm:$0xff] }
 0x17b   :  { %986 = vmatprep.subr.mxu1 %v620_v44  ;;  %910 = vmatpush1.msra.mxu0 %v491_v45  ;;  %v700_v38 = vld [vmem:[#allocation8 + $0x778] sm:$0xff]  ;;  %v699_v40 = vld [vmem:[#allocation8 + $0x770] sm:$0xff] }
 0x17c   :  { %987 = vmatpush1.msra.mxu1 %v619_v46  ;;  %911 = vmatprep.subr.mxu0 %v488_v47  ;;  %v568_v41 = vld [vmem:[#allocation8 + $0x358] sm:$0xff]  ;;  %v567_v43 = vld [vmem:[#allocation8 + $0x350] sm:$0xff] }
 0x17d   :  { %988 = vmatprep.subr.mxu1 %v616_v48  ;;  %912 = vmatpush1.msra.mxu0 %v487_v49  ;;  %v696_v42 = vld [vmem:[#allocation8 + $0x758] sm:$0xff]  ;;  %v695_v44 = vld [vmem:[#allocation8 + $0x750] sm:$0xff] }
 0x17e   :  { %989 = vmatpush1.msra.mxu1 %v615_v50  ;;  %913 = vmatprep.subr.mxu0 %v484_v51  ;;  %v564_v45 = vld [vmem:[#allocation8 + $0x338] sm:$0xff]  ;;  %v563_v47 = vld [vmem:[#allocation8 + $0x330] sm:$0xff] }
 0x17f   :  { %990 = vmatprep.subr.mxu1 %v612_v52  ;;  %914 = vmatpush1.msra.mxu0 %v483_v53  ;;  %v692_v46 = vld [vmem:[#allocation8 + $0x738] sm:$0xff]  ;;  %v691_v48 = vld [vmem:[#allocation8 + $0x730] sm:$0xff] }
 0x180   :  { %991 = vmatpush1.msra.mxu1 %v611_v54  ;;  %915 = vmatprep.subr.mxu0 %v480_v55  ;;  %v560_v49 = vld [vmem:[#allocation8 + $0x318] sm:$0xff]  ;;  %v559_v51 = vld [vmem:[#allocation8 + $0x310] sm:$0xff] }
 0x181   :  { %992 = vmatprep.subr.mxu1 %v608_v56  ;;  %916 = vmatpush1.msra.mxu0 %v479_v57  ;;  %v688_v50 = vld [vmem:[#allocation8 + $0x718] sm:$0xff]  ;;  %v687_v52 = vld [vmem:[#allocation8 + $0x710] sm:$0xff] }
 0x182   :  { %993 = vmatpush1.msra.mxu1 %v607_v58  ;;  %917 = vmatprep.subr.mxu0 %v476_v60  ;;  %v556_v53 = vld [vmem:[#allocation8 + $0x2f8] sm:$0xff]  ;;  %v555_v55 = vld [vmem:[#allocation8 + $0x2f0] sm:$0xff] }
 0x183   :  { %994 = vmatprep.subr.mxu1 %v604_v61  ;;  %918 = vmatpush1.msra.mxu0 %v475_v62  ;;  %v684_v54 = vld [vmem:[#allocation8 + $0x6f8] sm:$0xff]  ;;  %v683_v56 = vld [vmem:[#allocation8 + $0x6f0] sm:$0xff] }
 0x184   :  { %995 = vmatpush1.msra.mxu1 %v603_v63  ;;  %919 = vmatprep.subr.mxu0 %v472_v0  ;;  %v552_v57 = vld [vmem:[#allocation8 + $0x2d8] sm:$0xff]  ;;  %v551_v60 = vld [vmem:[#allocation8 + $0x2d0] sm:$0xff] }
 0x185   :  { %996 = vmatprep.subr.mxu1 %v600_v2  ;;  %920 = vmatpush1.msra.mxu0 %v471_v3  ;;  %v680_v58 = vld [vmem:[#allocation8 + $0x6d8] sm:$0xff]  ;;  %v679_v61 = vld [vmem:[#allocation8 + $0x6d0] sm:$0xff] }
 0x186   :  { %997 = vmatpush1.msra.mxu1 %v599_v4  ;;  %921 = vmatprep.subr.mxu0 %v468_v5  ;;  %v548_v62 = vld [vmem:[#allocation8 + $0x2b8] sm:$0xff]  ;;  %v547_v0 = vld [vmem:[#allocation8 + $0x2b0] sm:$0xff] }
 0x187   :  { %998 = vmatprep.subr.mxu1 %v596_v6  ;;  %922 = vmatpush1.msra.mxu0 %v467_v7  ;;  %v676_v63 = vld [vmem:[#allocation8 + $0x6b8] sm:$0xff]  ;;  %v675_v2 = vld [vmem:[#allocation8 + $0x6b0] sm:$0xff] }
 0x188   :  { %999 = vmatpush1.msra.mxu1 %v595_v10  ;;  %923 = vmatprep.subr.mxu0 %v464_v13  ;;  %v544_v3 = vld [vmem:[#allocation8 + $0x298] sm:$0xff]  ;;  %v543_v5 = vld [vmem:[#allocation8 + $0x290] sm:$0xff] }
 0x189   :  { %1000 = vmatprep.subr.mxu1 %v592_v14  ;;  %924 = vmatpush1.msra.mxu0 %v463_v17  ;;  %v672_v4 = vld [vmem:[#allocation8 + $0x698] sm:$0xff]  ;;  %v671_v6 = vld [vmem:[#allocation8 + $0x690] sm:$0xff] }
 0x18a   :  { %1001 = vmatpush1.msra.mxu1 %v591_v19  ;;  %925 = vmatprep.subr.mxu0 %v588_v21  ;;  %v540_v7 = vld [vmem:[#allocation8 + $0x278] sm:$0xff]  ;;  %v539_v13 = vld [vmem:[#allocation8 + $0x270] sm:$0xff] }
 0x18b   :  { %1002 = vmatprep.subr.mxu1 %v716_v22  ;;  %926 = vmatpush2.msra.mxu0 %v587_v23  ;;  %v668_v10 = vld [vmem:[#allocation8 + $0x678] sm:$0xff]  ;;  %v667_v14 = vld [vmem:[#allocation8 + $0x670] sm:$0xff] }
 0x18c   :  { %1003 = vmatpush2.msra.mxu1 %v715_v24  ;;  %927 = vmatprep.subr.mxu0 %v584_v25  ;;  %v536_v17 = vld [vmem:[#allocation8 + $0x258] sm:$0xff]  ;;  %v535_v21 = vld [vmem:[#allocation8 + $0x250] sm:$0xff] }
 0x18d   :  { %1004 = vmatprep.subr.mxu1 %v712_v26  ;;  %928 = vmatpush2.msra.mxu0 %v583_v27  ;;  %v664_v19 = vld [vmem:[#allocation8 + $0x658] sm:$0xff]  ;;  %v663_v22 = vld [vmem:[#allocation8 + $0x650] sm:$0xff] }
 0x18e   :  { %1005 = vmatpush2.msra.mxu1 %v711_v28  ;;  %929 = vmatprep.subr.mxu0 %v580_v29  ;;  %v532_v23 = vld [vmem:[#allocation8 + $0x238] sm:$0xff]  ;;  %v531_v25 = vld [vmem:[#allocation8 + $0x230] sm:$0xff] }
 0x18f   :  { %1006 = vmatprep.subr.mxu1 %v708_v30  ;;  %930 = vmatpush2.msra.mxu0 %v579_v31  ;;  %v660_v24 = vld [vmem:[#allocation8 + $0x638] sm:$0xff]  ;;  %v659_v26 = vld [vmem:[#allocation8 + $0x630] sm:$0xff]  ;;  %v1148_v31 = vld [vmem:[#allocation10 + $0x1e8] sm:$0xff] }
 0x190   :  { %1007 = vmatpush2.msra.mxu1 %v707_v32  ;;  %931 = vmatprep.subr.mxu0 %v576_v33  ;;  %v528_v27 = vld [vmem:[#allocation8 + $0x218] sm:$0xff]  ;;  %v527_v29 = vld [vmem:[#allocation8 + $0x210] sm:$0xff]  ;;  %v1147_v32 = vld [vmem:[#allocation10 + $0x1e0] sm:$0xff] }
 0x191   :  { %1008 = vmatprep.subr.mxu1 %v704_v34  ;;  %932 = vmatpush2.msra.mxu0 %v575_v35  ;;  %v656_v28 = vld [vmem:[#allocation8 + $0x618] sm:$0xff]  ;;  %v655_v30 = vld [vmem:[#allocation8 + $0x610] sm:$0xff]  ;;  %v1144_v33 = vld [vmem:[#allocation10 + $0x1c8] sm:$0xff] }
 0x192   :  { %1009 = vmatpush2.msra.mxu1 %v703_v36  ;;  %933 = vmatprep.subr.mxu0 %v572_v37  ;;  %v1143_v34 = vld [vmem:[#allocation10 + $0x1c0] sm:$0xff]  ;;  %v1140_v35 = vld [vmem:[#allocation10 + $0x1a8] sm:$0xff] }
 0x193   :  { %1010 = vmatprep.subr.mxu1 %v700_v38  ;;  %934 = vmatpush2.msra.mxu0 %v571_v39  ;;  %v1139_v36 = vld [vmem:[#allocation10 + $0x1a0] sm:$0xff]  ;;  %v1124_v39 = vld [vmem:[#allocation10 + $0x128] sm:$0xff] }
 0x194   :  { %1011 = vmatpush2.msra.mxu1 %v699_v40  ;;  %935 = vmatprep.subr.mxu0 %v568_v41  ;;  %v1135_v37 = vld [vmem:[#allocation10 + $0x180] sm:$0xff]  ;;  %v1120_v40 = vld [vmem:[#allocation10 + $0x108] sm:$0xff] }
 0x195   :  { %1012 = vmatprep.subr.mxu1 %v696_v42  ;;  %936 = vmatpush2.msra.mxu0 %v567_v43  ;;  %v1127_v38 = vld [vmem:[#allocation10 + $0x140] sm:$0xff]  ;;  %v1116_v41 = vld [vmem:[#allocation10 + $0xe8] sm:$0xff] }
 0x196   :  { %1013 = vmatpush2.msra.mxu1 %v695_v44  ;;  %937 = vmatprep.subr.mxu0 %v564_v45  ;;  %v1115_v42 = vld [vmem:[#allocation10 + $0xe0] sm:$0xff]  ;;  %v1112_v43 = vld [vmem:[#allocation10 + $0xc8] sm:$0xff] }
 0x197   :  { %1014 = vmatprep.subr.mxu1 %v692_v46  ;;  %938 = vmatpush2.msra.mxu0 %v563_v47  ;;  %v1111_v44 = vld [vmem:[#allocation10 + $0xc0] sm:$0xff]  ;;  %v1108_v45 = vld [vmem:[#allocation10 + $0xa8] sm:$0xff] }
 0x198   :  { %1015 = vmatpush2.msra.mxu1 %v691_v48  ;;  %939 = vmatprep.subr.mxu0 %v560_v49  ;;  %v1107_v46 = vld [vmem:[#allocation10 + $0xa0] sm:$0xff]  ;;  %v1104_v47 = vld [vmem:[#allocation10 + $0x88] sm:$0xff] }
 0x199   :  { %1016 = vmatprep.subr.mxu1 %v688_v50  ;;  %940 = vmatpush2.msra.mxu0 %v559_v51  ;;  %v1103_v48 = vld [vmem:[#allocation10 + $0x80] sm:$0xff]  ;;  %v1276_v49 = vld [vmem:[#allocation10 + $0x5e8] sm:$0xff] }
 0x19a   :  { %1017 = vmatpush2.msra.mxu1 %v687_v52  ;;  %941 = vmatprep.subr.mxu0 %v556_v53  ;;  %v1100_v50 = vld [vmem:[#allocation10 + $0x68] sm:$0xff]  ;;  %v1099_v51 = vld [vmem:[#allocation10 + $0x60] sm:$0xff] }
 0x19b   :  { %1018 = vmatprep.subr.mxu1 %v684_v54  ;;  %942 = vmatpush2.msra.mxu0 %v555_v55  ;;  %v1275_v52 = vld [vmem:[#allocation10 + $0x5e0] sm:$0xff]  ;;  %v1096_v53 = vld [vmem:[#allocation10 + $0x48] sm:$0xff] }
 0x19c   :  { %1019 = vmatpush2.msra.mxu1 %v683_v56  ;;  %943 = vmatprep.subr.mxu0 %v552_v57  ;;  %v1272_v54 = vld [vmem:[#allocation10 + $0x5c8] sm:$0xff]  ;;  %v1095_v55 = vld [vmem:[#allocation10 + $0x40] sm:$0xff] }
 0x19d   :  { %1020 = vmatprep.subr.mxu1 %v680_v58  ;;  %944 = vmatpush2.msra.mxu0 %v551_v60  ;;  %v1271_v56 = vld [vmem:[#allocation10 + $0x5c0] sm:$0xff]  ;;  %v1092_v57 = vld [vmem:[#allocation10 + $0x28] sm:$0xff] }
 0x19e   :  { %1021 = vmatpush2.msra.mxu1 %v679_v61  ;;  %945 = vmatprep.subr.mxu0 %v548_v62  ;;  %v1268_v58 = vld [vmem:[#allocation10 + $0x5a8] sm:$0xff]  ;;  %v1091_v60 = vld [vmem:[#allocation10 + $0x20] sm:$0xff] }
 0x19f   :  { %1022 = vmatprep.subr.mxu1 %v676_v63  ;;  %946 = vmatpush2.msra.mxu0 %v547_v0  ;;  %v1088_v61 = vld [vmem:[#allocation10 + $0x8] sm:$0xff]  ;;  %v1087_v62 = vld [vmem:[#allocation10] sm:$0xff] }
 0x1a0   :  { %1023 = vmatpush2.msra.mxu1 %v675_v2  ;;  %947 = vmatprep.subr.mxu0 %v544_v3  ;;  %v1267_v63 = vld [vmem:[#allocation10 + $0x5a0] sm:$0xff]  ;;  %v1212_v0 = vld [vmem:[#allocation10 + $0x3e8] sm:$0xff] }
 0x1a1   :  { %1024 = vmatprep.subr.mxu1 %v672_v4  ;;  %948 = vmatpush2.msra.mxu0 %v543_v5  ;;  %v1264_v2 = vld [vmem:[#allocation10 + $0x588] sm:$0xff]  ;;  %v1263_v3 = vld [vmem:[#allocation10 + $0x580] sm:$0xff] }
 0x1a2   :  { %1025 = vmatpush2.msra.mxu1 %v671_v6  ;;  %949 = vmatprep.subr.mxu0 %v540_v7  ;;  %v1211_v4 = vld [vmem:[#allocation10 + $0x3e0] sm:$0xff]  ;;  %v1260_v5 = vld [vmem:[#allocation10 + $0x568] sm:$0xff] }
 0x1a3   :  { %1026 = vmatprep.subr.mxu1 %v668_v10  ;;  %950 = vmatpush2.msra.mxu0 %v539_v13  ;;  %v1208_v6 = vld [vmem:[#allocation10 + $0x3c8] sm:$0xff]  ;;  %v1259_v7 = vld [vmem:[#allocation10 + $0x560] sm:$0xff] }
 0x1a4   :  { %1027 = vmatpush2.msra.mxu1 %v667_v14  ;;  %951 = vmatprep.subr.mxu0 %v536_v17  ;;  %v1256_v10 = vld [vmem:[#allocation10 + $0x548] sm:$0xff]  ;;  %v1207_v13 = vld [vmem:[#allocation10 + $0x3c0] sm:$0xff] }
 0x1a5   :  { %1028 = vmatprep.subr.mxu1 %v664_v19  ;;  %952 = vmatpush2.msra.mxu0 %v535_v21  ;;  %v1255_v14 = vld [vmem:[#allocation10 + $0x540] sm:$0xff]  ;;  %v1204_v17 = vld [vmem:[#allocation10 + $0x3a8] sm:$0xff] }
 0x1a6   :  { %1029 = vmatpush2.msra.mxu1 %v663_v22  ;;  %953 = vmatprep.subr.mxu0 %v532_v23  ;;  %v1252_v19 = vld [vmem:[#allocation10 + $0x528] sm:$0xff]  ;;  %v1203_v21 = vld [vmem:[#allocation10 + $0x3a0] sm:$0xff] }
 0x1a7   :  { %1030 = vmatprep.subr.mxu1 %v660_v24  ;;  %954 = vmatpush2.msra.mxu0 %v531_v25  ;;  %v1251_v22 = vld [vmem:[#allocation10 + $0x520] sm:$0xff]  ;;  %v1200_v23 = vld [vmem:[#allocation10 + $0x388] sm:$0xff] }
 0x1a8   :  { %1031 = vmatpush2.msra.mxu1 %v659_v26  ;;  %955 = vmatprep.subr.mxu0 %v528_v27  ;;  %v1248_v24 = vld [vmem:[#allocation10 + $0x508] sm:$0xff]  ;;  %v1199_v25 = vld [vmem:[#allocation10 + $0x380] sm:$0xff] }
 0x1a9   :  { %1032 = vmatprep.subr.mxu1 %v656_v28  ;;  %956 = vmatpush2.msra.mxu0 %v527_v29  ;;  %v1247_v26 = vld [vmem:[#allocation10 + $0x500] sm:$0xff]  ;;  %v1196_v27 = vld [vmem:[#allocation10 + $0x368] sm:$0xff] }
 0x1aa   :  { %1033 = vmatpush2.msra.mxu1 %v655_v30  ;;  %958 = vmatmul.mubr.f32.vlgmr.msra.gmra.mxu0 %v2695_v59  ;;  %v1136_v59 = vld [vmem:[#allocation10 + $0x188] sm:$0xff]  ;;  %v1195_v29 = vld [vmem:[#allocation10 + $0x360] sm:$0xff] }
 0x1ab   :  { %1035 = vmatmul.mubr.f32.vlgmr.msra.gmra.mxu1 %v2697_v1  ;;  %963 = vmatprep.mubr.f32.mxu0 %v2701_v15  ;;  %v1132_v1 = vld [vmem:[#allocation10 + $0x168] sm:$0xff]  ;;  %v1131_v15 = vld [vmem:[#allocation10 + $0x160] sm:$0xff] }
 0x1ac   :  { %1040 = vmatprep.mubr.f32.mxu1 %v2703_v16  ;;  %1365 = vmatprep.subr.mxu0 %v1148_v31  ;;  %v1128_v16 = vld [vmem:[#allocation10 + $0x148] sm:$0xff]  ;;  %v1243_v30 = vld [vmem:[#allocation10 + $0x4e0] sm:$0xff] }
 0x1ad   :  { %1366 = vmatpush1.msra.mxu0 %v1147_v32  ;;  %1442 = vmatprep.subr.mxu1 %v1276_v49  ;;  %v1244_v28 = vld [vmem:[#allocation10 + $0x4e8] sm:$0xff] }
 0x1ae   :  { %964 = vmatmul.mubr.f32.gmra.mxu0 %v2705_v18  ;;  %1367 = vmatprep.subr.mxu0 %v1144_v33  ;;  %v1123_v18 = vld [vmem:[#allocation10 + $0x120] sm:$0xff]  ;;  %v1192_v31 = vld [vmem:[#allocation10 + $0x348] sm:$0xff] }
 0x1af   :  { %1041 = vmatmul.mubr.f32.gmra.mxu1 %v2707_v20  ;;  %1368 = vmatpush1.msra.mxu0 %v1143_v34  ;;  %v1119_v20 = vld [vmem:[#allocation10 + $0x100] sm:$0xff]  ;;  %v1240_v32 = vld [vmem:[#allocation10 + $0x4c8] sm:$0xff] }
 0x1b0   :  { %1369 = vmatprep.subr.mxu0 %v1140_v35  ;;  %1443 = vmatpush1.msra.mxu1 %v1275_v52  ;;  %v1191_v33 = vld [vmem:[#allocation10 + $0x340] sm:$0xff]  ;;  %v1188_v35 = vld [vmem:[#allocation10 + $0x328] sm:$0xff] }
 0x1b1   :  { %1370 = vmatpush1.msra.mxu0 %v1139_v36  ;;  %1444 = vmatprep.subr.mxu1 %v1272_v54  ;;  %v1239_v34 = vld [vmem:[#allocation10 + $0x4c0] sm:$0xff]  ;;  %v1236_v36 = vld [vmem:[#allocation10 + $0x4a8] sm:$0xff] }
 0x1b2   :  { %1371 = vmatprep.subr.mxu0 %v1136_v59  ;;  %1445 = vmatpush1.msra.mxu1 %v1271_v56  ;;  %v1187_v59 = vld [vmem:[#allocation10 + $0x320] sm:$0xff]  ;;  %v1168_v49 = vld [vmem:[#allocation10 + $0x288] sm:$0xff] }
 0x1b3   :  { %1372 = vmatpush1.msra.mxu0 %v1135_v37  ;;  %1446 = vmatprep.subr.mxu1 %v1268_v58  ;;  %v1235_v37 = vld [vmem:[#allocation10 + $0x4a0] sm:$0xff]  ;;  %v1340_v54 = vld [vmem:[#allocation10 + $0x7e8] sm:$0xff] }
 0x1b4   :  { %1373 = vmatprep.subr.mxu0 %v1132_v1  ;;  %1447 = vmatpush1.msra.mxu1 %v1267_v63  ;;  %v1184_v1 = vld [vmem:[#allocation10 + $0x308] sm:$0xff]  ;;  %v1215_v52 = vld [vmem:[#allocation10 + $0x400] sm:$0xff] }
 0x1b5   :  { %1374 = vmatpush1.msra.mxu0 %v1131_v15  ;;  %1448 = vmatprep.subr.mxu1 %v1264_v2  ;;  %v1232_v15 = vld [vmem:[#allocation10 + $0x488] sm:$0xff]  ;;  %v1339_v56 = vld [vmem:[#allocation10 + $0x7e0] sm:$0xff] }
 0x1b6   :  { %1375 = vmatprep.subr.mxu0 %v1128_v16  ;;  %1449 = vmatpush1.msra.mxu1 %v1263_v3  ;;  %v1183_v16 = vld [vmem:[#allocation10 + $0x300] sm:$0xff]  ;;  %v1336_v58 = vld [vmem:[#allocation10 + $0x7c8] sm:$0xff] }
 0x1b7   :  { %1376 = vmatpush1.msra.mxu0 %v1127_v38  ;;  %1450 = vmatprep.subr.mxu1 %v1260_v5  ;;  %v1231_v38 = vld [vmem:[#allocation10 + $0x480] sm:$0xff]  ;;  %v1332_v63 = vld [vmem:[#allocation10 + $0x7a8] sm:$0xff] }
 0x1b8   :  { %1377 = vmatprep.subr.mxu0 %v1124_v39  ;;  %1451 = vmatpush1.msra.mxu1 %v1259_v7  ;;  %v1180_v39 = vld [vmem:[#allocation10 + $0x2e8] sm:$0xff]  ;;  %v1151_v3 = vld [vmem:[#allocation10 + $0x200] sm:$0xff] }
 0x1b9   :  { %1378 = vmatpush1.msra.mxu0 %v1123_v18  ;;  %1452 = vmatprep.subr.mxu1 %v1256_v10  ;;  %v1228_v18 = vld [vmem:[#allocation10 + $0x468] sm:$0xff]  ;;  %v1331_v5 = vld [vmem:[#allocation10 + $0x7a0] sm:$0xff] }
 0x1ba   :  { %1379 = vmatprep.subr.mxu0 %v1120_v40  ;;  %1453 = vmatpush1.msra.mxu1 %v1255_v14  ;;  %v1179_v40 = vld [vmem:[#allocation10 + $0x2e0] sm:$0xff]  ;;  %v1152_v2 = vld [vmem:[#allocation10 + $0x208] sm:$0xff] }
 0x1bb   :  { %1380 = vmatpush1.msra.mxu0 %v1119_v20  ;;  %1454 = vmatprep.subr.mxu1 %v1252_v19  ;;  %v1227_v20 = vld [vmem:[#allocation10 + $0x460] sm:$0xff]  ;;  %v1324_v10 = vld [vmem:[#allocation10 + $0x768] sm:$0xff] }
 0x1bc   :  { %1381 = vmatprep.subr.mxu0 %v1116_v41  ;;  %1455 = vmatpush1.msra.mxu1 %v1251_v22  ;;  %v1176_v41 = vld [vmem:[#allocation10 + $0x2c8] sm:$0xff]  ;;  %v1327_v7 = vld [vmem:[#allocation10 + $0x780] sm:$0xff] }
 0x1bd   :  { %1382 = vmatpush1.msra.mxu0 %v1115_v42  ;;  %1456 = vmatprep.subr.mxu1 %v1248_v24  ;;  %v1224_v42 = vld [vmem:[#allocation10 + $0x448] sm:$0xff] }
 0x1be   :  { %1383 = vmatprep.subr.mxu0 %v1112_v43  ;;  %1457 = vmatpush1.msra.mxu1 %v1247_v26  ;;  %v1175_v43 = vld [vmem:[#allocation10 + $0x2c0] sm:$0xff]  ;;  %v1320_v14 = vld [vmem:[#allocation10 + $0x748] sm:$0xff] }
 0x1bf   :  { %1384 = vmatpush1.msra.mxu0 %v1111_v44  ;;  %1458 = vmatprep.subr.mxu1 %v1244_v28  ;;  %v1223_v44 = vld [vmem:[#allocation10 + $0x440] sm:$0xff]  ;;  %v1316_v19 = vld [vmem:[#allocation10 + $0x728] sm:$0xff] }
 0x1c0   :  { %1385 = vmatprep.subr.mxu0 %v1108_v45  ;;  %1459 = vmatpush1.msra.mxu1 %v1243_v30  ;;  %v1172_v45 = vld [vmem:[#allocation10 + $0x2a8] sm:$0xff] }
 0x1c1   :  { %1386 = vmatpush1.msra.mxu0 %v1107_v46  ;;  %1460 = vmatprep.subr.mxu1 %v1240_v32  ;;  %v1220_v46 = vld [vmem:[#allocation10 + $0x428] sm:$0xff] }
 0x1c2   :  { %1387 = vmatprep.subr.mxu0 %v1104_v47  ;;  %1461 = vmatpush1.msra.mxu1 %v1239_v34  ;;  %v1171_v47 = vld [vmem:[#allocation10 + $0x2a0] sm:$0xff]  ;;  %v1312_v22 = vld [vmem:[#allocation10 + $0x708] sm:$0xff] }
 0x1c3   :  { %1388 = vmatpush1.msra.mxu0 %v1103_v48  ;;  %1462 = vmatprep.subr.mxu1 %v1236_v36  ;;  %v1219_v48 = vld [vmem:[#allocation10 + $0x420] sm:$0xff]  ;;  %v1308_v24 = vld [vmem:[#allocation10 + $0x6e8] sm:$0xff] }
 0x1c4   :  { %1389 = vmatprep.subr.mxu0 %v1100_v50  ;;  %1463 = vmatpush1.msra.mxu1 %v1235_v37  ;;  %v1216_v50 = vld [vmem:[#allocation10 + $0x408] sm:$0xff] }
 0x1c5   :  { %1390 = vmatpush1.msra.mxu0 %v1099_v51  ;;  %1464 = vmatprep.subr.mxu1 %v1232_v15  ;;  %v1167_v51 = vld [vmem:[#allocation10 + $0x280] sm:$0xff]  ;;  %v1304_v26 = vld [vmem:[#allocation10 + $0x6c8] sm:$0xff]  ;;  %v1278_v15 = vld [vmem:[#allocation10 + $0x5f8] sm:$0xff] }
 0x1c6   :  { %1391 = vmatprep.subr.mxu0 %v1096_v53  ;;  %1465 = vmatpush1.msra.mxu1 %v1231_v38  ;;  %v1164_v53 = vld [vmem:[#allocation10 + $0x268] sm:$0xff] }
 0x1c7   :  { %1392 = vmatpush1.msra.mxu0 %v1095_v55  ;;  %1466 = vmatprep.subr.mxu1 %v1228_v18  ;;  %v1163_v55 = vld [vmem:[#allocation10 + $0x260] sm:$0xff]  ;;  %v1300_v28 = vld [vmem:[#allocation10 + $0x6a8] sm:$0xff] }
 0x1c8   :  { %1393 = vmatprep.subr.mxu0 %v1092_v57  ;;  %1467 = vmatpush1.msra.mxu1 %v1227_v20  ;;  %v1160_v57 = vld [vmem:[#allocation10 + $0x248] sm:$0xff] }
 0x1c9   :  { %1394 = vmatpush1.msra.mxu0 %v1091_v60  ;;  %1468 = vmatprep.subr.mxu1 %v1224_v42  ;;  %v1159_v60 = vld [vmem:[#allocation10 + $0x240] sm:$0xff]  ;;  %v1296_v30 = vld [vmem:[#allocation10 + $0x688] sm:$0xff] }
 0x1ca   :  { %1395 = vmatprep.subr.mxu0 %v1088_v61  ;;  %1469 = vmatpush1.msra.mxu1 %v1223_v44  ;;  %v1335_v61 = vld [vmem:[#allocation10 + $0x7c0] sm:$0xff]  ;;  %v1292_v32 = vld [vmem:[#allocation10 + $0x668] sm:$0xff] }
 0x1cb   :  { %1396 = vmatpush1.msra.mxu0 %v1087_v62  ;;  %1470 = vmatprep.subr.mxu1 %v1220_v46  ;;  %v1156_v62 = vld [vmem:[#allocation10 + $0x228] sm:$0xff] }
 0x1cc   :  { %1397 = vmatprep.subr.mxu0 %v1212_v0  ;;  %1471 = vmatpush1.msra.mxu1 %v1219_v48  ;;  %v1155_v0 = vld [vmem:[#allocation10 + $0x220] sm:$0xff]  ;;  %v1288_v34 = vld [vmem:[#allocation10 + $0x648] sm:$0xff] }
 0x1cd   :  { %1398 = vmatpush2.msra.mxu0 %v1211_v4  ;;  %1472 = vmatprep.subr.mxu1 %v1216_v50  ;;  %v1150_v4 = vld [vmem:[#allocation10 + $0x1f8] sm:$0xff]  ;;  %v1284_v36 = vld [vmem:[#allocation10 + $0x628] sm:$0xff] }
 0x1ce   :  { %1399 = vmatprep.subr.mxu0 %v1208_v6  ;;  %1473 = vmatpush1.msra.mxu1 %v1215_v52  ;;  %v1328_v6 = vld [vmem:[#allocation10 + $0x788] sm:$0xff] }
 0x1cf   :  { %1400 = vmatpush2.msra.mxu0 %v1207_v13  ;;  %1474 = vmatprep.subr.mxu1 %v1340_v54  ;;  %v1323_v13 = vld [vmem:[#allocation10 + $0x760] sm:$0xff]  ;;  %v1280_v37 = vld [vmem:[#allocation10 + $0x608] sm:$0xff] }
 0x1d0   :  { %1401 = vmatprep.subr.mxu0 %v1204_v17  ;;  %1475 = vmatpush2.msra.mxu1 %v1339_v56  ;;  %v1319_v17 = vld [vmem:[#allocation10 + $0x740] sm:$0xff] }
 0x1d1   :  { %1402 = vmatpush2.msra.mxu0 %v1203_v21  ;;  %1476 = vmatprep.subr.mxu1 %v1336_v58  ;;  %v1315_v21 = vld [vmem:[#allocation10 + $0x720] sm:$0xff] }
 0x1d2   :  { %1403 = vmatprep.subr.mxu0 %v1200_v23  ;;  %1477 = vmatpush2.msra.mxu1 %v1335_v61  ;;  %v1311_v23 = vld [vmem:[#allocation10 + $0x700] sm:$0xff] }
 0x1d3   :  { %1404 = vmatpush2.msra.mxu0 %v1199_v25  ;;  %1478 = vmatprep.subr.mxu1 %v1332_v63  ;;  %v1307_v25 = vld [vmem:[#allocation10 + $0x6e0] sm:$0xff] }
 0x1d4   :  { %1405 = vmatprep.subr.mxu0 %v1196_v27  ;;  %1479 = vmatpush2.msra.mxu1 %v1331_v5  ;;  %v1303_v27 = vld [vmem:[#allocation10 + $0x6c0] sm:$0xff] }
 0x1d5   :  { %1406 = vmatpush2.msra.mxu0 %v1195_v29  ;;  %1480 = vmatprep.subr.mxu1 %v1328_v6  ;;  %v1299_v29 = vld [vmem:[#allocation10 + $0x6a0] sm:$0xff]  ;;  %v1149_v6 = vld [vmem:[#allocation10 + $0x1f0] sm:$0xff] }
 0x1d6   :  { %1407 = vmatprep.subr.mxu0 %v1192_v31  ;;  %1481 = vmatpush2.msra.mxu1 %v1327_v7  ;;  %v1295_v31 = vld [vmem:[#allocation10 + $0x680] sm:$0xff] }
 0x1d7   :  { %1408 = vmatpush2.msra.mxu0 %v1191_v33  ;;  %1482 = vmatprep.subr.mxu1 %v1324_v10  ;;  %v1291_v33 = vld [vmem:[#allocation10 + $0x660] sm:$0xff]  ;;  %v1146_v10 = vld [vmem:[#allocation10 + $0x1d8] sm:$0xff] }
 0x1d8   :  { %1409 = vmatprep.subr.mxu0 %v1188_v35  ;;  %1483 = vmatpush2.msra.mxu1 %v1323_v13  ;;  %v1287_v35 = vld [vmem:[#allocation10 + $0x640] sm:$0xff] }
 0x1d9   :  { %1410 = vmatpush2.msra.mxu0 %v1187_v59  ;;  %1484 = vmatprep.subr.mxu1 %v1320_v14  ;;  %v1283_v59 = vld [vmem:[#allocation10 + $0x620] sm:$0xff] }
 0x1da   :  { %1411 = vmatprep.subr.mxu0 %v1184_v1  ;;  %1485 = vmatpush2.msra.mxu1 %v1319_v17  ;;  %v1279_v1 = vld [vmem:[#allocation10 + $0x600] sm:$0xff]  ;;  %v1145_v17 = vld [vmem:[#allocation10 + $0x1d0] sm:$0xff] }
 0x1db   :  { %1412 = vmatpush2.msra.mxu0 %v1183_v16  ;;  %1486 = vmatprep.subr.mxu1 %v1316_v19  ;;  %v2722_v16 = vld [vmem:[%s2818_s4] sm:$0xf] }
 0x1dc   :  { %1413 = vmatprep.subr.mxu0 %v1180_v39  ;;  %1487 = vmatpush2.msra.mxu1 %v1315_v21  ;;  %v722_v38 = vrot.slane %v2722_v16, %v2683_v8  ;;  %v726_v39 = vrot.slane %v2722_v16, %v2687_v11  ;;  %v1142_v21 = vld [vmem:[#allocation10 + $0x1b8] sm:$0xff] }
 0x1dd   :  { %1414 = vmatpush2.msra.mxu0 %v1179_v40  ;;  %1488 = vmatprep.subr.mxu1 %v1312_v22 }
 0x1de   :  { %1415 = vmatprep.subr.mxu0 %v1176_v41  ;;  %1489 = vmatpush2.msra.mxu1 %v1311_v23  ;;  %v1141_v23 = vld [vmem:[#allocation10 + $0x1b0] sm:$0xff] }
 0x1df   :  { %1416 = vmatpush2.msra.mxu0 %v1175_v43  ;;  %1490 = vmatprep.subr.mxu1 %v1308_v24 }
 0x1e0   :  { %1417 = vmatprep.subr.mxu0 %v1172_v45  ;;  %1491 = vmatpush2.msra.mxu1 %v1307_v25  ;;  %v1138_v25 = vld [vmem:[#allocation10 + $0x198] sm:$0xff] }
 0x1e1   :  { %1418 = vmatpush2.msra.mxu0 %v1171_v47  ;;  %1492 = vmatprep.subr.mxu1 %v1304_v26  ;;  %v1137_v26 = vld [vmem:[#allocation10 + $0x190] sm:$0xff] }
 0x1e2   :  { %1419 = vmatprep.subr.mxu0 %v1168_v49  ;;  %1493 = vmatpush2.msra.mxu1 %v1303_v27  ;;  %v1134_v27 = vld [vmem:[#allocation10 + $0x178] sm:$0xff] }
 0x1e3   :  { %1420 = vmatpush2.msra.mxu0 %v1167_v51  ;;  %1494 = vmatprep.subr.mxu1 %v1300_v28  ;;  %v1133_v28 = vld [vmem:[#allocation10 + $0x170] sm:$0xff] }
 0x1e4   :  { %1421 = vmatprep.subr.mxu0 %v1164_v53  ;;  %1495 = vmatpush2.msra.mxu1 %v1299_v29  ;;  %v1130_v29 = vld [vmem:[#allocation10 + $0x158] sm:$0xff] }
 0x1e5   :  { %1422 = vmatpush2.msra.mxu0 %v1163_v55  ;;  %1496 = vmatprep.subr.mxu1 %v1296_v30  ;;  %v1129_v30 = vld [vmem:[#allocation10 + $0x150] sm:$0xff] }
 0x1e6   :  { %1423 = vmatprep.subr.mxu0 %v1160_v57  ;;  %1497 = vmatpush2.msra.mxu1 %v1295_v31  ;;  %v1126_v31 = vld [vmem:[#allocation10 + $0x138] sm:$0xff] }
 0x1e7   :  { %1424 = vmatpush2.msra.mxu0 %v1159_v60  ;;  %1498 = vmatprep.subr.mxu1 %v1292_v32  ;;  %v1125_v32 = vld [vmem:[#allocation10 + $0x130] sm:$0xff] }
 0x1e8   :  { %1425 = vmatprep.subr.mxu0 %v1156_v62  ;;  %1499 = vmatpush2.msra.mxu1 %v1291_v33  ;;  %v1122_v33 = vld [vmem:[#allocation10 + $0x118] sm:$0xff] }
 0x1e9   :  { %1426 = vmatpush2.msra.mxu0 %v1155_v0  ;;  %1500 = vmatprep.subr.mxu1 %v1288_v34  ;;  %v1121_v34 = vld [vmem:[#allocation10 + $0x110] sm:$0xff] }
 0x1ea   :  { %1427 = vmatprep.subr.mxu0 %v1152_v2  ;;  %1501 = vmatpush2.msra.mxu1 %v1287_v35  ;;  %v1118_v35 = vld [vmem:[#allocation10 + $0xf8] sm:$0xff] }
 0x1eb   :  { %1428 = vmatpush2.msra.mxu0 %v1151_v3  ;;  %1502 = vmatprep.subr.mxu1 %v1284_v36  ;;  %v1117_v36 = vld [vmem:[#allocation10 + $0xf0] sm:$0xff] }
 0x1ec   :  { %1519 = vmatprep.subr.mxu0 %v1150_v4  ;;  %1503 = vmatpush2.msra.mxu1 %v1283_v59  ;;  %v1114_v59 = vld [vmem:[#allocation10 + $0xd8] sm:$0xff] }
 0x1ed   :  { %1504 = vmatprep.subr.mxu1 %v1280_v37  ;;  %v1113_v37 = vld [vmem:[#allocation10 + $0xd0] sm:$0xff] }
 0x1ee   :  { %1505 = vmatpush2.msra.mxu1 %v1279_v1  ;;  %v1110_v1 = vld [vmem:[#allocation10 + $0xb8] sm:$0xff] }
 0x1ef   :  { %1596 = vmatprep.subr.mxu1 %v1278_v15  ;;  %v1109_v15 = vld [vmem:[#allocation10 + $0xb0] sm:$0xff] }
 0x227   :  { %v805_v18 = vpop.f32.mrf.mxu0 }
 0x228   :  { %v806_v40 = vadd.f32 %v805_v18, %v722_v38  ;;  %v882_v20 = vpop.f32.mrf.mxu1  ;;  %v1102_v18 = vld [vmem:[#allocation10 + $0x78] sm:$0xff] }
 0x229   :  { %v807_v41 = vpop.f32.mrf.mxu0 }
 0x22a   :  { %v883_v42 = vadd.f32 %v882_v20, %v806_v40  ;;  %v808_v43 = vadd.f32 %v807_v41, %v726_v39  ;;  %v884_v44 = vpop.f32.mrf.mxu1  ;;  %v1101_v40 = vld [vmem:[#allocation10 + $0x70] sm:$0xff]  ;;  %v1098_v20 = vld [vmem:[#allocation10 + $0x58] sm:$0xff] }
 0x22b   :  { %v1097_v41 = vld [vmem:[#allocation10 + $0x50] sm:$0xff] }
 0x22c   :  { %v1055_v45 = vmul.f32 0.70710677, %v883_v42  ;;  %v885_v46 = vadd.f32 %v884_v44, %v808_v43  ;;  %v1047_v0 = vmul.f32 0.5, %v883_v42  ;;  %v1094_v42 = vld [vmem:[#allocation10 + $0x38] sm:$0xff]  ;;  %v1093_v43 = vld [vmem:[#allocation10 + $0x30] sm:$0xff] }
 0x22d   :  { %v811_v47 = vpop.f32.mrf.mxu0  ;;  %v1090_v44 = vld [vmem:[#allocation10 + $0x18] sm:$0xff] }
 0x22e   :  { %2394 = verf.f32 %v1055_v45  ;;  %v1056_v48 = vmul.f32 0.70710677, %v885_v46  ;;  %v812_v49 = vadd.f32 %v811_v47, %v722_v38  ;;  %v888_v50 = vpop.f32.mrf.mxu1  ;;  %v1048_v62 = vmul.f32 0.5, %v885_v46  ;;  %v1106_v38 = vld [vmem:[#allocation10 + $0x98] sm:$0xff]  ;;  %v1089_v45 = vld [vmem:[#allocation10 + $0x10] sm:$0xff] }
 0x22f   :  { %v813_v51 = vpop.f32.mrf.mxu0  ;;  %v1214_v46 = vld [vmem:[#allocation10 + $0x3f8] sm:$0xff]  ;;  %v1213_v47 = vld [vmem:[#allocation10 + $0x3f0] sm:$0xff] }
 0x230   :  { %2396 = verf.f32 %v1056_v48  ;;  %v814_v52 = vadd.f32 %v813_v51, %v726_v39  ;;  %v889_v53 = vadd.f32 %v888_v50, %v812_v49  ;;  %v890_v54 = vpop.f32.mrf.mxu1  ;;  %v1105_v39 = vld [vmem:[#allocation10 + $0x90] sm:$0xff]  ;;  %v1210_v48 = vld [vmem:[#allocation10 + $0x3d8] sm:$0xff] }
 0x231   :  { %v1209_v49 = vld [vmem:[#allocation10 + $0x3d0] sm:$0xff]  ;;  %v1206_v50 = vld [vmem:[#allocation10 + $0x3b8] sm:$0xff] }
 0x232   :  { %v1059_v55 = vmul.f32 0.70710677, %v889_v53  ;;  %v891_v56 = vadd.f32 %v890_v54, %v814_v52  ;;  %v1051_v5 = vmul.f32 0.5, %v889_v53  ;;  %v1205_v51 = vld [vmem:[#allocation10 + $0x3b0] sm:$0xff]  ;;  %v1202_v52 = vld [vmem:[#allocation10 + $0x398] sm:$0xff]  ;;  %v730_v53 = vrot.slane %v2722_v16, %v2685_v9 }
 0x233   :  { %v1201_v54 = vld [vmem:[#allocation10 + $0x390] sm:$0xff] }
 0x234   :  { %2398 = verf.f32 %v1059_v55  ;;  %v1060_v57 = vmul.f32 0.70710677, %v891_v56  ;;  %v1052_v7 = vmul.f32 0.5, %v891_v56  ;;  %v1198_v55 = vld [vmem:[#allocation10 + $0x378] sm:$0xff]  ;;  %v734_v56 = vrot.slane %v2722_v16, %v2689_v12 }
 0x235   :  { %v1186_v16 = vld [vmem:[#allocation10 + $0x318] sm:$0xff] }
 0x236   :  { %2400 = verf.f32 %v1060_v57  ;;  %v1197_v57 = vld [vmem:[#allocation10 + $0x370] sm:$0xff] }
 0x23b   :  { %v2395_v58 = vpop.eup %2394 }
 0x23c   :  { %v1071_v61 = vadd.f32 1.0, %v2395_v58 }
 0x23d   :  { %v2397_v60 = vpop.eup %2396 }
 0x23e   :  { %v1072_v63 = vadd.f32 1.0, %v2397_v60  ;;  %v2728_v4 = vmul.f32 %v1071_v61, %v1047_v0  ;;  %v1194_v60 = vld [vmem:[#allocation10 + $0x358] sm:$0xff] }
 0x240   :  { %v1080_v2 = vmul.f32 %v1072_v63, %v1048_v62  ;;  %v1193_v63 = vld [vmem:[#allocation10 + $0x350] sm:$0xff] }
 0x241   :  { %v2399_v3 = vpop.eup %2398 }
 0x242   :  { %1429 = vmatprep.mubr.f32.mxu0 %v1080_v2  ;;  %v1075_v13 = vadd.f32 1.0, %v2399_v3 }
 0x243   :  { %v2401_v14 = vpop.eup %2400  ;;  %1430 = vmatmul.mubr.f32.vlgmr.msra.gmra.mxu0 %v2728_v4 }
 0x244   :  { %1520 = vmatpush1.msra.mxu0 %v1149_v6  ;;  %v1076_v19 = vadd.f32 1.0, %v2401_v14  ;;  %v2731_v22 = vmul.f32 %v1075_v13, %v1051_v5 }
 0x245   :  { %1521 = vmatprep.subr.mxu0 %v1146_v10 }
 0x246   :  { %1522 = vmatpush1.msra.mxu0 %v1145_v17  ;;  %v2733_v24 = vmul.f32 %v1076_v19, %v1052_v7  ;;  %v1189_v7 = vld [vmem:[#allocation10 + $0x330] sm:$0xff] }
 0x247   :  { %1523 = vmatprep.subr.mxu0 %v1142_v21  ;;  %v1185_v21 = vld [vmem:[#allocation10 + $0x310] sm:$0xff] }
 0x248   :  { %1435 = vmatprep.mubr.f32.mxu0 %v2733_v24  ;;  %1524 = vmatpush1.msra.mxu0 %v1141_v23 }
 0x249   :  { %1436 = vmatmul.mubr.f32.gmra.mxu0 %v2731_v22  ;;  %1525 = vmatprep.subr.mxu0 %v1138_v25  ;;  %v1182_v25 = vld [vmem:[#allocation10 + $0x2f8] sm:$0xff] }
 0x24a   :  { %1583 = vmatprep.mubr.f32.mxu0 %v1080_v2  ;;  %1526 = vmatpush1.msra.mxu0 %v1137_v26  ;;  %v1190_v2 = vld [vmem:[#allocation10 + $0x338] sm:$0xff] }
 0x24b   :  { %1527 = vmatprep.subr.mxu0 %v1134_v27 }
 0x24c   :  { %1528 = vmatpush1.msra.mxu0 %v1133_v28  ;;  %v1181_v28 = vld [vmem:[#allocation10 + $0x2f0] sm:$0xff] }
 0x24d   :  { %1529 = vmatprep.subr.mxu0 %v1130_v29 }
 0x24e   :  { %1530 = vmatpush1.msra.mxu0 %v1129_v30  ;;  %v1178_v30 = vld [vmem:[#allocation10 + $0x2d8] sm:$0xff] }
 0x24f   :  { %1531 = vmatprep.subr.mxu0 %v1126_v31 }
 0x250   :  { %1532 = vmatpush1.msra.mxu0 %v1125_v32 }
 0x251   :  { %1533 = vmatprep.subr.mxu0 %v1122_v33  ;;  %v1177_v33 = vld [vmem:[#allocation10 + $0x2d0] sm:$0xff] }
 0x252   :  { %1534 = vmatpush1.msra.mxu0 %v1121_v34 }
 0x253   :  { %1535 = vmatprep.subr.mxu0 %v1118_v35  ;;  %v1174_v35 = vld [vmem:[#allocation10 + $0x2b8] sm:$0xff] }
 0x254   :  { %1536 = vmatpush1.msra.mxu0 %v1117_v36  ;;  %v1173_v36 = vld [vmem:[#allocation10 + $0x2b0] sm:$0xff] }
 0x255   :  { %1537 = vmatprep.subr.mxu0 %v1114_v59 }
 0x256   :  { %1538 = vmatpush1.msra.mxu0 %v1113_v37  ;;  %v1170_v37 = vld [vmem:[#allocation10 + $0x298] sm:$0xff] }
 0x257   :  { %1539 = vmatprep.subr.mxu0 %v1110_v1  ;;  %v1169_v1 = vld [vmem:[#allocation10 + $0x290] sm:$0xff] }
 0x258   :  { %1540 = vmatpush1.msra.mxu0 %v1109_v15  ;;  %v1166_v15 = vld [vmem:[#allocation10 + $0x278] sm:$0xff] }
 0x259   :  { %1541 = vmatprep.subr.mxu0 %v1106_v38  ;;  %v1165_v38 = vld [vmem:[#allocation10 + $0x270] sm:$0xff] }
 0x25a   :  { %1542 = vmatpush1.msra.mxu0 %v1105_v39  ;;  %v1162_v39 = vld [vmem:[#allocation10 + $0x258] sm:$0xff] }
 0x25b   :  { %1543 = vmatprep.subr.mxu0 %v1102_v18  ;;  %v1161_v18 = vld [vmem:[#allocation10 + $0x250] sm:$0xff] }
 0x25c   :  { %1544 = vmatpush1.msra.mxu0 %v1101_v40  ;;  %v1158_v40 = vld [vmem:[#allocation10 + $0x238] sm:$0xff] }
 0x25d   :  { %1545 = vmatprep.subr.mxu0 %v1098_v20  ;;  %v1157_v20 = vld [vmem:[#allocation10 + $0x230] sm:$0xff] }
 0x25e   :  { %1546 = vmatpush1.msra.mxu0 %v1097_v41 }
 0x25f   :  { %1547 = vmatprep.subr.mxu0 %v1094_v42  ;;  %v1154_v42 = vld [vmem:[#allocation10 + $0x218] sm:$0xff] }
 0x260   :  { %1548 = vmatpush1.msra.mxu0 %v1093_v43  ;;  %v1153_v43 = vld [vmem:[#allocation10 + $0x210] sm:$0xff] }
 0x261   :  { %1549 = vmatprep.subr.mxu0 %v1090_v44 }
 0x262   :  { %1550 = vmatpush1.msra.mxu0 %v1089_v45 }
 0x263   :  { %1551 = vmatprep.subr.mxu0 %v1214_v46 }
 0x264   :  { %1552 = vmatpush2.msra.mxu0 %v1213_v47 }
 0x265   :  { %1553 = vmatprep.subr.mxu0 %v1210_v48 }
 0x266   :  { %1554 = vmatpush2.msra.mxu0 %v1209_v49 }
 0x267   :  { %1555 = vmatprep.subr.mxu0 %v1206_v50 }
 0x268   :  { %1556 = vmatpush2.msra.mxu0 %v1205_v51 }
 0x269   :  { %1557 = vmatprep.subr.mxu0 %v1202_v52  ;;  %v1277_v52 = vld [vmem:[#allocation10 + $0x5f0] sm:$0xff] }
 0x26a   :  { %v959_v58 = vpop.f32.mrf.mxu0  ;;  %1558 = vmatpush2.msra.mxu0 %v1201_v54  ;;  %v1274_v54 = vld [vmem:[#allocation10 + $0x5d8] sm:$0xff] }
 0x26b   :  { %v960_v61 = vadd.f32 %v959_v58, %v730_v53  ;;  %v1036_v62 = vpop.f32.mrf.mxu1  ;;  %1559 = vmatprep.subr.mxu0 %v1198_v55 }
 0x26c   :  { %v961_v0 = vpop.f32.mrf.mxu0  ;;  %1560 = vmatpush2.msra.mxu0 %v1197_v57  ;;  %v1273_v57 = vld [vmem:[#allocation10 + $0x5d0] sm:$0xff] }
 0x26d   :  { %v2741_v3 = vadd.f32 %v1036_v62, %v960_v61  ;;  %v962_v5 = vadd.f32 %v961_v0, %v734_v56  ;;  %v1038_v6 = vpop.f32.mrf.mxu1  ;;  %1561 = vmatprep.subr.mxu0 %v1194_v60  ;;  %v1270_v61 = vld [vmem:[#allocation10 + $0x5b8] sm:$0xff]  ;;  %v1265_v0 = vld [vmem:[#allocation10 + $0x590] sm:$0xff] }
 0x26e   :  { %v965_v10 = vpop.f32.mrf.mxu0  ;;  %1562 = vmatpush2.msra.mxu0 %v1193_v63  ;;  %v1266_v63 = vld [vmem:[#allocation10 + $0x598] sm:$0xff] }
 0x26f   :  { %v1057_v13 = vmul.f32 0.70710677, %v2741_v3  ;;  %v1039_v14 = vadd.f32 %v1038_v6, %v962_v5  ;;  %v966_v17 = vadd.f32 %v965_v10, %v730_v53  ;;  %v1042_v19 = vpop.f32.mrf.mxu1  ;;  %1563 = vmatprep.subr.mxu0 %v1190_v2  ;;  %v1049_v49 = vmul.f32 0.5, %v2741_v3  ;;  %v1262_v2 = vld [vmem:[#allocation10 + $0x578] sm:$0xff]  ;;  %v1774_v3 = vld [vmem:[#allocation11 + $0x1e8] sm:$0xff]  ;;  %v1773_v5 = vld [vmem:[#allocation11 + $0x1e0] sm:$0xff] }
 0x270   :  { %v967_v23 = vpop.f32.mrf.mxu0  ;;  %1564 = vmatpush2.msra.mxu0 %v1189_v7  ;;  %v1261_v6 = vld [vmem:[#allocation10 + $0x570] sm:$0xff]  ;;  %v1769_v7 = vld [vmem:[#allocation11 + $0x1c0] sm:$0xff]  ;;  %v1258_v10 = vld [vmem:[#allocation10 + $0x558] sm:$0xff] }
 0x271   :  { %2402 = verf.f32 %v1057_v13  ;;  %v1058_v26 = vmul.f32 0.70710677, %v1039_v14  ;;  %v1043_v27 = vadd.f32 %v1042_v19, %v966_v17  ;;  %1565 = vmatprep.subr.mxu0 %v1186_v16  ;;  %v968_v29 = vadd.f32 %v967_v23, %v734_v56  ;;  %v1044_v32 = vpop.f32.mrf.mxu1  ;;  %v1766_v16 = vld [vmem:[#allocation11 + $0x1a8] sm:$0xff]  ;;  %v1257_v13 = vld [vmem:[#allocation10 + $0x550] sm:$0xff]  ;;  %v1254_v17 = vld [vmem:[#allocation10 + $0x538] sm:$0xff] }
 0x272   :  { %1566 = vmatpush2.msra.mxu0 %v1185_v21  ;;  %v1050_v46 = vmul.f32 0.5, %v1039_v14  ;;  %v1765_v14 = vld [vmem:[#allocation11 + $0x1a0] sm:$0xff]  ;;  %v1762_v19 = vld [vmem:[#allocation11 + $0x188] sm:$0xff]  ;;  %v1253_v21 = vld [vmem:[#allocation10 + $0x530] sm:$0xff] }
 0x273   :  { %2404 = verf.f32 %v1058_v26  ;;  %v1061_v31 = vmul.f32 0.70710677, %v1043_v27  ;;  %1567 = vmatprep.subr.mxu0 %v1182_v25  ;;  %v1045_v34 = vadd.f32 %v1044_v32, %v968_v29  ;;  %v1053_v60 = vmul.f32 0.5, %v1043_v27  ;;  %v1761_v23 = vld [vmem:[#allocation11 + $0x180] sm:$0xff]  ;;  %v1250_v25 = vld [vmem:[#allocation10 + $0x518] sm:$0xff]  ;;  %v1758_v26 = vld [vmem:[#allocation11 + $0x168] sm:$0xff] }
 0x274   :  { %1568 = vmatpush2.msra.mxu0 %v1181_v28  ;;  %v1249_v27 = vld [vmem:[#allocation10 + $0x510] sm:$0xff]  ;;  %v1757_v28 = vld [vmem:[#allocation11 + $0x160] sm:$0xff]  ;;  %v1246_v29 = vld [vmem:[#allocation10 + $0x4f8] sm:$0xff] }
 0x275   :  { %2406 = verf.f32 %v1061_v31  ;;  %1569 = vmatprep.subr.mxu0 %v1178_v30  ;;  %v1062_v59 = vmul.f32 0.70710677, %v1045_v34  ;;  %v1054_v56 = vmul.f32 0.5, %v1045_v34  ;;  %v1754_v30 = vld [vmem:[#allocation11 + $0x148] sm:$0xff]  ;;  %v1245_v31 = vld [vmem:[#allocation10 + $0x4f0] sm:$0xff]  ;;  %v1753_v32 = vld [vmem:[#allocation11 + $0x140] sm:$0xff] }
 0x276   :  { %1570 = vmatpush2.msra.mxu0 %v1177_v33  ;;  %v1242_v33 = vld [vmem:[#allocation10 + $0x4d8] sm:$0xff]  ;;  %v1750_v34 = vld [vmem:[#allocation11 + $0x128] sm:$0xff] }
 0x277   :  { %1571 = vmatprep.subr.mxu0 %v1174_v35  ;;  %2408 = verf.f32 %v1062_v59  ;;  %v1241_v35 = vld [vmem:[#allocation10 + $0x4d0] sm:$0xff]  ;;  %v1238_v59 = vld [vmem:[#allocation10 + $0x4b8] sm:$0xff] }
 0x278   :  { %1572 = vmatpush2.msra.mxu0 %v1173_v36  ;;  %v1749_v36 = vld [vmem:[#allocation11 + $0x120] sm:$0xff] }
 0x279   :  { %1573 = vmatprep.subr.mxu0 %v1170_v37  ;;  %v1746_v37 = vld [vmem:[#allocation11 + $0x108] sm:$0xff] }
 0x27a   :  { %1574 = vmatpush2.msra.mxu0 %v1169_v1  ;;  %v1237_v1 = vld [vmem:[#allocation10 + $0x4b0] sm:$0xff] }
 0x27b   :  { %1575 = vmatprep.subr.mxu0 %v1166_v15  ;;  %v1745_v15 = vld [vmem:[#allocation11 + $0x100] sm:$0xff] }
 0x27c   :  { %1576 = vmatpush2.msra.mxu0 %v1165_v38  ;;  %v1234_v38 = vld [vmem:[#allocation10 + $0x498] sm:$0xff] }
 0x27d   :  { %1577 = vmatprep.subr.mxu0 %v1162_v39  ;;  %v1742_v39 = vld [vmem:[#allocation11 + $0xe8] sm:$0xff] }
 0x27e   :  { %v2403_v41 = vpop.eup %2402  ;;  %1578 = vmatpush2.msra.mxu0 %v1161_v18  ;;  %v1233_v18 = vld [vmem:[#allocation10 + $0x490] sm:$0xff] }
 0x27f   :  { %1579 = vmatprep.subr.mxu0 %v1158_v40  ;;  %v1073_v45 = vadd.f32 1.0, %v2403_v41  ;;  %v1741_v40 = vld [vmem:[#allocation11 + $0xe0] sm:$0xff]  ;;  %v1738_v41 = vld [vmem:[#allocation11 + $0xc8] sm:$0xff] }
 0x280   :  { %v2405_v44 = vpop.eup %2404  ;;  %1580 = vmatpush2.msra.mxu0 %v1157_v20  ;;  %v1230_v20 = vld [vmem:[#allocation10 + $0x478] sm:$0xff] }
 0x281   :  { %1581 = vmatprep.subr.mxu0 %v1154_v42  ;;  %v1074_v47 = vadd.f32 1.0, %v2405_v44  ;;  %v2746_v51 = vmul.f32 %v1073_v45, %v1049_v49  ;;  %v1229_v42 = vld [vmem:[#allocation10 + $0x470] sm:$0xff]  ;;  %v1226_v44 = vld [vmem:[#allocation10 + $0x458] sm:$0xff]  ;;  %v1734_v45 = vld [vmem:[#allocation11 + $0xa8] sm:$0xff] }
 0x282   :  { %v2407_v48 = vpop.eup %2406  ;;  %1582 = vmatpush2.msra.mxu0 %v1153_v43  ;;  %v1737_v43 = vld [vmem:[#allocation11 + $0xc0] sm:$0xff]  ;;  %v1730_v49 = vld [vmem:[#allocation11 + $0x88] sm:$0xff] }
 0x283   :  { %v1082_v50 = vmul.f32 %v1074_v47, %v1050_v46  ;;  %1584 = vmatmul.mubr.f32.vlgmr.msra.gmra.mxu0 %v2728_v4  ;;  %v1077_v55 = vadd.f32 1.0, %v2407_v48  ;;  %1991 = vmatprep.subr.mxu0 %v1774_v3  ;;  %v1225_v46 = vld [vmem:[#allocation10 + $0x450] sm:$0xff]  ;;  %v1733_v47 = vld [vmem:[#allocation11 + $0xa0] sm:$0xff]  ;;  %v1222_v48 = vld [vmem:[#allocation10 + $0x438] sm:$0xff] }
 0x284   :  { %1589 = vmatprep.mubr.f32.mxu0 %v2733_v24  ;;  %v2409_v53 = vpop.eup %2408  ;;  %v1269_v24 = vld [vmem:[#allocation10 + $0x5b0] sm:$0xff]  ;;  %1992 = vmatpush1.msra.mxu0 %v1773_v5  ;;  %v1334_v3 = vld [vmem:[#allocation10 + $0x7b8] sm:$0xff]  ;;  %v1714_v5 = vld [vmem:[#allocation11 + $0x8] sm:$0xff] }
 0x285   :  { %1506 = vmatprep.mubr.f32.mxu1 %v1082_v50  ;;  %v1078_v58 = vadd.f32 1.0, %v2409_v53  ;;  %v2753_v62 = vmul.f32 %v1077_v55, %v1053_v60  ;;  %v1218_v53 = vld [vmem:[#allocation10 + $0x418] sm:$0xff]  ;;  %v1217_v55 = vld [vmem:[#allocation10 + $0x410] sm:$0xff] }
 0x286   :  { %1507 = vmatmul.mubr.f32.vlgmr.msra.gmra.mxu1 %v2746_v51  ;;  %v1341_v60 = vld [vmem:[#allocation10 + $0x7f0] sm:$0xff] }
 0x287   :  { %1597 = vmatpush1.msra.mxu1 %v1277_v52  ;;  %1590 = vmatmul.mubr.f32.gmra.mxu0 %v2731_v22  ;;  %v2751_v4 = vmul.f32 %v1078_v58, %v1054_v56  ;;  %v1770_v22 = vld [vmem:[#allocation11 + $0x1c8] sm:$0xff]  ;;  %v1729_v52 = vld [vmem:[#allocation11 + $0x80] sm:$0xff] }
 0x288   :  { %1598 = vmatprep.subr.mxu1 %v1274_v54  ;;  %1993 = vmatprep.subr.mxu0 %v1770_v22  ;;  %v1726_v54 = vld [vmem:[#allocation11 + $0x68] sm:$0xff]  ;;  %v1725_v56 = vld [vmem:[#allocation11 + $0x60] sm:$0xff]  ;;  %v1333_v22 = vld [vmem:[#allocation10 + $0x7b0] sm:$0xff] }
 0x289   :  { %1599 = vmatpush1.msra.mxu1 %v1273_v57  ;;  %1512 = vmatprep.mubr.f32.mxu1 %v2751_v4  ;;  %v1342_v57 = vld [vmem:[#allocation10 + $0x7f8] sm:$0xff]  ;;  %v1722_v58 = vld [vmem:[#allocation11 + $0x48] sm:$0xff] }
 0x28a   :  { %1600 = vmatprep.subr.mxu1 %v1270_v61  ;;  %1513 = vmatmul.mubr.f32.gmra.mxu1 %v2753_v62  ;;  %v1721_v61 = vld [vmem:[#allocation11 + $0x40] sm:$0xff] }
 0x28b   :  { %1601 = vmatpush1.msra.mxu1 %v1269_v24  ;;  %1660 = vmatprep.mubr.f32.mxu1 %v1082_v50  ;;  %v1221_v50 = vld [vmem:[#allocation10 + $0x430] sm:$0xff]  ;;  %v1338_v24 = vld [vmem:[#allocation10 + $0x7d8] sm:$0xff] }
 0x28c   :  { %1602 = vmatprep.subr.mxu1 %v1266_v63  ;;  %1994 = vmatpush1.msra.mxu0 %v1769_v7  ;;  %v1718_v63 = vld [vmem:[#allocation11 + $0x28] sm:$0xff]  ;;  %v1330_v7 = vld [vmem:[#allocation10 + $0x798] sm:$0xff] }
 0x28d   :  { %1603 = vmatpush1.msra.mxu1 %v1265_v0  ;;  %1995 = vmatprep.subr.mxu0 %v1766_v16  ;;  %v1337_v0 = vld [vmem:[#allocation10 + $0x7d0] sm:$0xff] }
 0x28e   :  { %1604 = vmatprep.subr.mxu1 %v1262_v2  ;;  %1996 = vmatpush1.msra.mxu0 %v1765_v14  ;;  %v1717_v2 = vld [vmem:[#allocation11 + $0x20] sm:$0xff]  ;;  %v1329_v16 = vld [vmem:[#allocation10 + $0x790] sm:$0xff]  ;;  %v1326_v14 = vld [vmem:[#allocation10 + $0x778] sm:$0xff] }
 0x28f   :  { %1605 = vmatpush1.msra.mxu1 %v1261_v6  ;;  %1997 = vmatprep.subr.mxu0 %v1762_v19  ;;  %v1713_v6 = vld [vmem:[#allocation11] sm:$0xff]  ;;  %v1325_v19 = vld [vmem:[#allocation10 + $0x770] sm:$0xff] }
 0x290   :  { %1606 = vmatprep.subr.mxu1 %v1258_v10  ;;  %1998 = vmatpush1.msra.mxu0 %v1761_v23  ;;  %v1838_v10 = vld [vmem:[#allocation11 + $0x3e8] sm:$0xff]  ;;  %v1322_v23 = vld [vmem:[#allocation10 + $0x758] sm:$0xff] }
 0x291   :  { %1607 = vmatpush1.msra.mxu1 %v1257_v13  ;;  %1999 = vmatprep.subr.mxu0 %v1758_v26  ;;  %v1837_v13 = vld [vmem:[#allocation11 + $0x3e0] sm:$0xff]  ;;  %v1321_v26 = vld [vmem:[#allocation10 + $0x750] sm:$0xff] }
 0x292   :  { %1608 = vmatprep.subr.mxu1 %v1254_v17  ;;  %2000 = vmatpush1.msra.mxu0 %v1757_v28  ;;  %v1834_v17 = vld [vmem:[#allocation11 + $0x3c8] sm:$0xff]  ;;  %v1318_v28 = vld [vmem:[#allocation10 + $0x738] sm:$0xff] }
 0x293   :  { %1609 = vmatpush1.msra.mxu1 %v1253_v21  ;;  %2001 = vmatprep.subr.mxu0 %v1754_v30  ;;  %v1833_v21 = vld [vmem:[#allocation11 + $0x3c0] sm:$0xff]  ;;  %v1317_v30 = vld [vmem:[#allocation10 + $0x730] sm:$0xff] }
 0x294   :  { %1610 = vmatprep.subr.mxu1 %v1250_v25  ;;  %2002 = vmatpush1.msra.mxu0 %v1753_v32  ;;  %v1830_v25 = vld [vmem:[#allocation11 + $0x3a8] sm:$0xff]  ;;  %v1313_v32 = vld [vmem:[#allocation10 + $0x710] sm:$0xff] }
 0x295   :  { %1611 = vmatpush1.msra.mxu1 %v1249_v27  ;;  %2003 = vmatprep.subr.mxu0 %v1750_v34  ;;  %v1829_v27 = vld [vmem:[#allocation11 + $0x3a0] sm:$0xff]  ;;  %v1309_v34 = vld [vmem:[#allocation10 + $0x6f0] sm:$0xff] }
 0x296   :  { %1612 = vmatprep.subr.mxu1 %v1246_v29  ;;  %2004 = vmatpush1.msra.mxu0 %v1749_v36  ;;  %v1826_v29 = vld [vmem:[#allocation11 + $0x388] sm:$0xff]  ;;  %v1305_v36 = vld [vmem:[#allocation10 + $0x6d0] sm:$0xff] }
 0x297   :  { %1613 = vmatpush1.msra.mxu1 %v1245_v31  ;;  %2005 = vmatprep.subr.mxu0 %v1746_v37  ;;  %v1314_v31 = vld [vmem:[#allocation10 + $0x718] sm:$0xff]  ;;  %v1301_v37 = vld [vmem:[#allocation10 + $0x6b0] sm:$0xff] }
 0x298   :  { %1614 = vmatprep.subr.mxu1 %v1242_v33  ;;  %2006 = vmatpush1.msra.mxu0 %v1745_v15  ;;  %v1310_v33 = vld [vmem:[#allocation10 + $0x6f8] sm:$0xff]  ;;  %v1297_v15 = vld [vmem:[#allocation10 + $0x690] sm:$0xff] }
 0x299   :  { %1615 = vmatpush1.msra.mxu1 %v1241_v35  ;;  %2007 = vmatprep.subr.mxu0 %v1742_v39  ;;  %v1306_v35 = vld [vmem:[#allocation10 + $0x6d8] sm:$0xff]  ;;  %v1293_v39 = vld [vmem:[#allocation10 + $0x670] sm:$0xff] }
 0x29a   :  { %1616 = vmatprep.subr.mxu1 %v1238_v59  ;;  %2008 = vmatpush1.msra.mxu0 %v1741_v40  ;;  %v1302_v59 = vld [vmem:[#allocation10 + $0x6b8] sm:$0xff]  ;;  %v1289_v40 = vld [vmem:[#allocation10 + $0x650] sm:$0xff] }
 0x29b   :  { %1617 = vmatpush1.msra.mxu1 %v1237_v1  ;;  %2009 = vmatprep.subr.mxu0 %v1738_v41  ;;  %v1298_v1 = vld [vmem:[#allocation10 + $0x698] sm:$0xff]  ;;  %v1285_v41 = vld [vmem:[#allocation10 + $0x630] sm:$0xff] }
 0x29c   :  { %1618 = vmatprep.subr.mxu1 %v1234_v38  ;;  %2010 = vmatpush1.msra.mxu0 %v1737_v43  ;;  %v1294_v38 = vld [vmem:[#allocation10 + $0x678] sm:$0xff]  ;;  %v1281_v43 = vld [vmem:[#allocation10 + $0x610] sm:$0xff] }
 0x29d   :  { %1619 = vmatpush1.msra.mxu1 %v1233_v18  ;;  %2011 = vmatprep.subr.mxu0 %v1734_v45  ;;  %v1290_v18 = vld [vmem:[#allocation10 + $0x658] sm:$0xff]  ;;  %v1822_v45 = vld [vmem:[#allocation11 + $0x368] sm:$0xff] }
 0x29e   :  { %1620 = vmatprep.subr.mxu1 %v1230_v20  ;;  %2012 = vmatpush1.msra.mxu0 %v1733_v47  ;;  %v1286_v20 = vld [vmem:[#allocation10 + $0x638] sm:$0xff]  ;;  %v1818_v47 = vld [vmem:[#allocation11 + $0x348] sm:$0xff] }
 0x29f   :  { %1621 = vmatpush1.msra.mxu1 %v1229_v42  ;;  %2013 = vmatprep.subr.mxu0 %v1730_v49  ;;  %v1282_v42 = vld [vmem:[#allocation10 + $0x618] sm:$0xff]  ;;  %v1814_v49 = vld [vmem:[#allocation11 + $0x328] sm:$0xff] }
 0x2a0   :  { %1622 = vmatprep.subr.mxu1 %v1226_v44  ;;  %2014 = vmatpush1.msra.mxu0 %v1729_v52  ;;  %v1825_v44 = vld [vmem:[#allocation11 + $0x380] sm:$0xff]  ;;  %v1810_v52 = vld [vmem:[#allocation11 + $0x308] sm:$0xff] }
 0x2a1   :  { %1623 = vmatpush1.msra.mxu1 %v1225_v46  ;;  %2015 = vmatprep.subr.mxu0 %v1726_v54  ;;  %v1821_v46 = vld [vmem:[#allocation11 + $0x360] sm:$0xff]  ;;  %v1802_v54 = vld [vmem:[#allocation11 + $0x2c8] sm:$0xff] }
 0x2a2   :  { %1624 = vmatprep.subr.mxu1 %v1222_v48  ;;  %2016 = vmatpush1.msra.mxu0 %v1725_v56  ;;  %v1817_v48 = vld [vmem:[#allocation11 + $0x340] sm:$0xff] }
 0x2a3   :  { %1625 = vmatpush1.msra.mxu1 %v1221_v50  ;;  %2017 = vmatprep.subr.mxu0 %v1722_v58  ;;  %v1813_v50 = vld [vmem:[#allocation11 + $0x320] sm:$0xff] }
 0x2a4   :  { %1626 = vmatprep.subr.mxu1 %v1218_v53  ;;  %2018 = vmatpush1.msra.mxu0 %v1721_v61  ;;  %v1805_v53 = vld [vmem:[#allocation11 + $0x2e0] sm:$0xff] }
 0x2a5   :  { %1627 = vmatpush1.msra.mxu1 %v1217_v55  ;;  %2019 = vmatprep.subr.mxu0 %v1718_v63  ;;  %v1801_v55 = vld [vmem:[#allocation11 + $0x2c0] sm:$0xff] }
 0x2a6   :  { %1628 = vmatprep.subr.mxu1 %v1342_v57  ;;  %2020 = vmatpush1.msra.mxu0 %v1717_v2  ;;  %v1797_v56 = vld [vmem:[#allocation11 + $0x2a0] sm:$0xff]  ;;  %v1794_v57 = vld [vmem:[#allocation11 + $0x288] sm:$0xff] }
 0x2a7   :  { %1629 = vmatpush2.msra.mxu1 %v1341_v60  ;;  %2021 = vmatprep.subr.mxu0 %v1714_v5  ;;  %v1793_v58 = vld [vmem:[#allocation11 + $0x280] sm:$0xff]  ;;  %v1790_v60 = vld [vmem:[#allocation11 + $0x268] sm:$0xff] }
 0x2a8   :  { %1630 = vmatprep.subr.mxu1 %v1338_v24  ;;  %2022 = vmatpush1.msra.mxu0 %v1713_v6  ;;  %v1789_v61 = vld [vmem:[#allocation11 + $0x260] sm:$0xff]  ;;  %v1786_v24 = vld [vmem:[#allocation11 + $0x248] sm:$0xff] }
 0x2a9   :  { %1631 = vmatpush2.msra.mxu1 %v1337_v0  ;;  %2023 = vmatprep.subr.mxu0 %v1838_v10  ;;  %v1785_v63 = vld [vmem:[#allocation11 + $0x240] sm:$0xff]  ;;  %v1782_v0 = vld [vmem:[#allocation11 + $0x228] sm:$0xff] }
 0x2aa   :  { %1632 = vmatprep.subr.mxu1 %v1334_v3  ;;  %2024 = vmatpush2.msra.mxu0 %v1837_v13  ;;  %v1781_v2 = vld [vmem:[#allocation11 + $0x220] sm:$0xff]  ;;  %v1778_v3 = vld [vmem:[#allocation11 + $0x208] sm:$0xff] }
 0x2ab   :  { %1633 = vmatpush2.msra.mxu1 %v1333_v22  ;;  %2025 = vmatprep.subr.mxu0 %v1834_v17  ;;  %v1902_v5 = vld [vmem:[#allocation11 + $0x5e8] sm:$0xff]  ;;  %v1777_v22 = vld [vmem:[#allocation11 + $0x200] sm:$0xff] }
 0x2ac   :  { %1634 = vmatprep.subr.mxu1 %v1330_v7  ;;  %2026 = vmatpush2.msra.mxu0 %v1833_v21  ;;  %v1901_v6 = vld [vmem:[#allocation11 + $0x5e0] sm:$0xff]  ;;  %v1776_v7 = vld [vmem:[#allocation11 + $0x1f8] sm:$0xff]  ;;  %v1898_v10 = vld [vmem:[#allocation11 + $0x5c8] sm:$0xff] }
 0x2ad   :  { %1635 = vmatpush2.msra.mxu1 %v1329_v16  ;;  %2027 = vmatprep.subr.mxu0 %v1830_v25  ;;  %v1897_v16 = vld [vmem:[#allocation11 + $0x5c0] sm:$0xff]  ;;  %v1894_v13 = vld [vmem:[#allocation11 + $0x5a8] sm:$0xff] }
 0x2ae   :  { %1636 = vmatprep.subr.mxu1 %v1326_v14  ;;  %2028 = vmatpush2.msra.mxu0 %v1829_v27  ;;  %v1893_v14 = vld [vmem:[#allocation11 + $0x5a0] sm:$0xff]  ;;  %v1890_v17 = vld [vmem:[#allocation11 + $0x588] sm:$0xff] }
 0x2af   :  { %1637 = vmatpush2.msra.mxu1 %v1325_v19  ;;  %2029 = vmatprep.subr.mxu0 %v1826_v29  ;;  %v1889_v19 = vld [vmem:[#allocation11 + $0x580] sm:$0xff]  ;;  %v1886_v21 = vld [vmem:[#allocation11 + $0x568] sm:$0xff] }
 0x2b0   :  { %1638 = vmatprep.subr.mxu1 %v1322_v23  ;;  %2030 = vmatpush2.msra.mxu0 %v1825_v44  ;;  %v1885_v23 = vld [vmem:[#allocation11 + $0x560] sm:$0xff]  ;;  %v1882_v25 = vld [vmem:[#allocation11 + $0x548] sm:$0xff] }
 0x2b1   :  { %1639 = vmatpush2.msra.mxu1 %v1321_v26  ;;  %2031 = vmatprep.subr.mxu0 %v1822_v45  ;;  %v1881_v26 = vld [vmem:[#allocation11 + $0x540] sm:$0xff]  ;;  %v1878_v27 = vld [vmem:[#allocation11 + $0x528] sm:$0xff] }
 0x2b2   :  { %1640 = vmatprep.subr.mxu1 %v1318_v28  ;;  %2032 = vmatpush2.msra.mxu0 %v1821_v46  ;;  %v1877_v28 = vld [vmem:[#allocation11 + $0x520] sm:$0xff]  ;;  %v1874_v29 = vld [vmem:[#allocation11 + $0x508] sm:$0xff] }
 0x2b3   :  { %1641 = vmatpush2.msra.mxu1 %v1317_v30  ;;  %2033 = vmatprep.subr.mxu0 %v1818_v47  ;;  %v1873_v30 = vld [vmem:[#allocation11 + $0x500] sm:$0xff]  ;;  %v1962_v44 = vld [vmem:[#allocation11 + $0x7c8] sm:$0xff] }
 0x2b4   :  { %1642 = vmatprep.subr.mxu1 %v1314_v31  ;;  %2034 = vmatpush2.msra.mxu0 %v1817_v48  ;;  %v1870_v31 = vld [vmem:[#allocation11 + $0x4e8] sm:$0xff]  ;;  %v1961_v45 = vld [vmem:[#allocation11 + $0x7c0] sm:$0xff] }
 0x2b5   :  { %1643 = vmatpush2.msra.mxu1 %v1313_v32  ;;  %2035 = vmatprep.subr.mxu0 %v1814_v49  ;;  %v1869_v32 = vld [vmem:[#allocation11 + $0x4e0] sm:$0xff]  ;;  %v1958_v46 = vld [vmem:[#allocation11 + $0x7a8] sm:$0xff] }
 0x2b6   :  { %1644 = vmatprep.subr.mxu1 %v1310_v33  ;;  %2036 = vmatpush2.msra.mxu0 %v1813_v50  ;;  %v1866_v33 = vld [vmem:[#allocation11 + $0x4c8] sm:$0xff]  ;;  %v1957_v47 = vld [vmem:[#allocation11 + $0x7a0] sm:$0xff] }
 0x2b7   :  { %1645 = vmatpush2.msra.mxu1 %v1309_v34  ;;  %2037 = vmatprep.subr.mxu0 %v1810_v52  ;;  %v1865_v34 = vld [vmem:[#allocation11 + $0x4c0] sm:$0xff]  ;;  %v1954_v48 = vld [vmem:[#allocation11 + $0x788] sm:$0xff] }
 0x2b8   :  { %1646 = vmatprep.subr.mxu1 %v1306_v35  ;;  %v1862_v35 = vld [vmem:[#allocation11 + $0x4a8] sm:$0xff]  ;;  %v1953_v49 = vld [vmem:[#allocation11 + $0x780] sm:$0xff] }
 0x2b9   :  { %1647 = vmatpush2.msra.mxu1 %v1305_v36  ;;  %v1861_v36 = vld [vmem:[#allocation11 + $0x4a0] sm:$0xff]  ;;  %v1950_v50 = vld [vmem:[#allocation11 + $0x768] sm:$0xff] }
 0x2ba   :  { %1648 = vmatprep.subr.mxu1 %v1302_v59  ;;  %v1858_v59 = vld [vmem:[#allocation11 + $0x488] sm:$0xff]  ;;  %v1949_v52 = vld [vmem:[#allocation11 + $0x760] sm:$0xff] }
 0x2bb   :  { %1649 = vmatpush2.msra.mxu1 %v1301_v37  ;;  %v1857_v37 = vld [vmem:[#allocation11 + $0x480] sm:$0xff] }
 0x2bc   :  { %1650 = vmatprep.subr.mxu1 %v1298_v1  ;;  %v1854_v1 = vld [vmem:[#allocation11 + $0x468] sm:$0xff] }
 0x2bd   :  { %1651 = vmatpush2.msra.mxu1 %v1297_v15  ;;  %v1853_v15 = vld [vmem:[#allocation11 + $0x460] sm:$0xff] }
 0x2be   :  { %1652 = vmatprep.subr.mxu1 %v1294_v38  ;;  %v1850_v38 = vld [vmem:[#allocation11 + $0x448] sm:$0xff] }
 0x2bf   :  { %1653 = vmatpush2.msra.mxu1 %v1293_v39  ;;  %v1849_v39 = vld [vmem:[#allocation11 + $0x440] sm:$0xff] }
 0x2c0   :  { %1654 = vmatprep.subr.mxu1 %v1290_v18  ;;  %v1846_v18 = vld [vmem:[#allocation11 + $0x428] sm:$0xff] }
 0x2c1   :  { %1655 = vmatpush2.msra.mxu1 %v1289_v40  ;;  %v1845_v40 = vld [vmem:[#allocation11 + $0x420] sm:$0xff] }
 0x2c2   :  { %1656 = vmatprep.subr.mxu1 %v1286_v20  ;;  %v1842_v20 = vld [vmem:[#allocation11 + $0x408] sm:$0xff] }
 0x2c3   :  { %1657 = vmatpush2.msra.mxu1 %v1285_v41  ;;  %v1841_v41 = vld [vmem:[#allocation11 + $0x400] sm:$0xff] }
 0x2c4   :  { %1658 = vmatprep.subr.mxu1 %v1282_v42  ;;  %v1966_v42 = vld [vmem:[#allocation11 + $0x7e8] sm:$0xff] }
 0x2c5   :  { %1659 = vmatpush2.msra.mxu1 %v1281_v43  ;;  %v1965_v43 = vld [vmem:[#allocation11 + $0x7e0] sm:$0xff] }
 0x2c6   :  { %1661 = vmatmul.mubr.f32.vlgmr.msra.gmra.mxu1 %v2746_v51  ;;  %v1809_v51 = vld [vmem:[#allocation11 + $0x300] sm:$0xff]  ;;  %2068 = vmatprep.subr.mxu1 %v1902_v5  ;;  %v1914_v5 = vld [vmem:[#allocation11 + $0x648] sm:$0xff] }
 0x2c7   :  { %1666 = vmatprep.mubr.f32.mxu1 %v2751_v4  ;;  %2038 = vmatpush2.msra.mxu0 %v1809_v51  ;;  %v1806_v4 = vld [vmem:[#allocation11 + $0x2e8] sm:$0xff] }
 0x2c8   :  { %2039 = vmatprep.subr.mxu0 %v1806_v4  ;;  %2069 = vmatpush1.msra.mxu1 %v1901_v6  ;;  %v1946_v51 = vld [vmem:[#allocation11 + $0x748] sm:$0xff]  ;;  %v1945_v4 = vld [vmem:[#allocation11 + $0x740] sm:$0xff] }
 0x2c9   :  { %2040 = vmatpush2.msra.mxu0 %v1805_v53  ;;  %2070 = vmatprep.subr.mxu1 %v1898_v10  ;;  %v1942_v53 = vld [vmem:[#allocation11 + $0x728] sm:$0xff] }
 0x2ca   :  { %1667 = vmatmul.mubr.f32.gmra.mxu1 %v2753_v62  ;;  %2041 = vmatprep.subr.mxu0 %v1802_v54  ;;  %v1798_v62 = vld [vmem:[#allocation11 + $0x2a8] sm:$0xff]  ;;  %v1941_v54 = vld [vmem:[#allocation11 + $0x720] sm:$0xff] }
 0x2cb   :  { %2042 = vmatpush2.msra.mxu0 %v1801_v55  ;;  %2071 = vmatpush1.msra.mxu1 %v1897_v16  ;;  %v1938_v55 = vld [vmem:[#allocation11 + $0x708] sm:$0xff]  ;;  %v1905_v16 = vld [vmem:[#allocation11 + $0x600] sm:$0xff] }
 0x2cc   :  { %2043 = vmatprep.subr.mxu0 %v1798_v62  ;;  %2072 = vmatprep.subr.mxu1 %v1894_v13  ;;  %v1937_v62 = vld [vmem:[#allocation11 + $0x700] sm:$0xff]  ;;  %v1910_v6 = vld [vmem:[#allocation11 + $0x628] sm:$0xff]  ;;  %v1904_v13 = vld [vmem:[#allocation11 + $0x5f8] sm:$0xff] }
 0x2cd   :  { %2044 = vmatpush2.msra.mxu0 %v1797_v56  ;;  %2073 = vmatpush1.msra.mxu1 %v1893_v14  ;;  %v1934_v56 = vld [vmem:[#allocation11 + $0x6e8] sm:$0xff]  ;;  %v2763_v14 = vld [vmem:[%s2820_s6] sm:$0xf] }
 0x2ce   :  { %2045 = vmatprep.subr.mxu0 %v1794_v57  ;;  %2074 = vmatprep.subr.mxu1 %v1890_v17  ;;  %v1933_v57 = vld [vmem:[#allocation11 + $0x6e0] sm:$0xff]  ;;  %v1906_v10 = vld [vmem:[#allocation11 + $0x608] sm:$0xff] }
 0x2cf   :  { %2046 = vmatpush2.msra.mxu0 %v1793_v58  ;;  %2075 = vmatpush1.msra.mxu1 %v1889_v19  ;;  %v1930_v58 = vld [vmem:[#allocation11 + $0x6c8] sm:$0xff]  ;;  %v1348_v19 = vrot.slane %v2763_v14, %v2683_v8 }
 0x2d0   :  { %2047 = vmatprep.subr.mxu0 %v1790_v60  ;;  %2076 = vmatprep.subr.mxu1 %v1886_v21  ;;  %v1929_v60 = vld [vmem:[#allocation11 + $0x6c0] sm:$0xff]  ;;  %v1352_v21 = vrot.slane %v2763_v14, %v2687_v11 }
 0x2d1   :  { %2048 = vmatpush2.msra.mxu0 %v1789_v61  ;;  %2077 = vmatpush1.msra.mxu1 %v1885_v23  ;;  %v1926_v61 = vld [vmem:[#allocation11 + $0x6a8] sm:$0xff] }
 0x2d2   :  { %2049 = vmatprep.subr.mxu0 %v1786_v24  ;;  %2078 = vmatprep.subr.mxu1 %v1882_v25  ;;  %v1925_v24 = vld [vmem:[#allocation11 + $0x6a0] sm:$0xff] }
 0x2d3   :  { %2050 = vmatpush2.msra.mxu0 %v1785_v63  ;;  %2079 = vmatpush1.msra.mxu1 %v1881_v26  ;;  %v1922_v63 = vld [vmem:[#allocation11 + $0x688] sm:$0xff] }
 0x2d4   :  { %2051 = vmatprep.subr.mxu0 %v1782_v0  ;;  %2080 = vmatprep.subr.mxu1 %v1878_v27  ;;  %v1921_v0 = vld [vmem:[#allocation11 + $0x680] sm:$0xff] }
 0x2d5   :  { %2052 = vmatpush2.msra.mxu0 %v1781_v2  ;;  %2081 = vmatpush1.msra.mxu1 %v1877_v28  ;;  %v1918_v2 = vld [vmem:[#allocation11 + $0x668] sm:$0xff] }
 0x2d6   :  { %2053 = vmatprep.subr.mxu0 %v1778_v3  ;;  %2082 = vmatprep.subr.mxu1 %v1874_v29  ;;  %v1917_v3 = vld [vmem:[#allocation11 + $0x660] sm:$0xff] }
 0x2d7   :  { %2054 = vmatpush2.msra.mxu0 %v1777_v22  ;;  %2083 = vmatpush1.msra.mxu1 %v1873_v30  ;;  %v1913_v22 = vld [vmem:[#allocation11 + $0x640] sm:$0xff] }
 0x2d8   :  { %2145 = vmatprep.subr.mxu0 %v1776_v7  ;;  %2084 = vmatprep.subr.mxu1 %v1870_v31  ;;  %v1909_v7 = vld [vmem:[#allocation11 + $0x620] sm:$0xff] }
 0x2d9   :  { %2085 = vmatpush1.msra.mxu1 %v1869_v32 }
 0x2da   :  { %2086 = vmatprep.subr.mxu1 %v1866_v33 }
 0x2db   :  { %2087 = vmatpush1.msra.mxu1 %v1865_v34 }
 0x2dc   :  { %2088 = vmatprep.subr.mxu1 %v1862_v35 }
 0x2dd   :  { %2089 = vmatpush1.msra.mxu1 %v1861_v36 }
 0x2de   :  { %2090 = vmatprep.subr.mxu1 %v1858_v59 }
 0x2df   :  { %2091 = vmatpush1.msra.mxu1 %v1857_v37 }
 0x2e0   :  { %2092 = vmatprep.subr.mxu1 %v1854_v1 }
 0x2e1   :  { %2093 = vmatpush1.msra.mxu1 %v1853_v15 }
 0x2e2   :  { %2094 = vmatprep.subr.mxu1 %v1850_v38 }
 0x2e3   :  { %2095 = vmatpush1.msra.mxu1 %v1849_v39 }
 0x2e4   :  { %2096 = vmatprep.subr.mxu1 %v1846_v18 }
 0x2e5   :  { %2097 = vmatpush1.msra.mxu1 %v1845_v40 }
 0x2e6   :  { %2098 = vmatprep.subr.mxu1 %v1842_v20 }
 0x2e7   :  { %2099 = vmatpush1.msra.mxu1 %v1841_v41 }
 0x2e8   :  { %2100 = vmatprep.subr.mxu1 %v1966_v42 }
 0x2e9   :  { %2101 = vmatpush2.msra.mxu1 %v1965_v43 }
 0x2ea   :  { %2102 = vmatprep.subr.mxu1 %v1962_v44 }
 0x2eb   :  { %2103 = vmatpush2.msra.mxu1 %v1961_v45 }
 0x2ec   :  { %2104 = vmatprep.subr.mxu1 %v1958_v46 }
 0x2ed   :  { %2105 = vmatpush2.msra.mxu1 %v1957_v47  ;;  %v1775_v47 = vld [vmem:[#allocation11 + $0x1f0] sm:$0xff] }
 0x2ee   :  { %2106 = vmatprep.subr.mxu1 %v1954_v48 }
 0x2ef   :  { %2107 = vmatpush2.msra.mxu1 %v1953_v49  ;;  %v1772_v49 = vld [vmem:[#allocation11 + $0x1d8] sm:$0xff] }
 0x2f0   :  { %2108 = vmatprep.subr.mxu1 %v1950_v50 }
 0x2f1   :  { %2109 = vmatpush2.msra.mxu1 %v1949_v52 }
 0x2f2   :  { %2110 = vmatprep.subr.mxu1 %v1946_v51  ;;  %v1771_v51 = vld [vmem:[#allocation11 + $0x1d0] sm:$0xff] }
 0x2f3   :  { %2111 = vmatpush2.msra.mxu1 %v1945_v4 }
 0x2f4   :  { %2112 = vmatprep.subr.mxu1 %v1942_v53 }
 0x2f5   :  { %2113 = vmatpush2.msra.mxu1 %v1941_v54  ;;  %v1768_v54 = vld [vmem:[#allocation11 + $0x1b8] sm:$0xff] }
 0x2f6   :  { %2114 = vmatprep.subr.mxu1 %v1938_v55 }
 0x2f7   :  { %2115 = vmatpush2.msra.mxu1 %v1937_v62 }
 0x2f8   :  { %2116 = vmatprep.subr.mxu1 %v1934_v56  ;;  %v1767_v56 = vld [vmem:[#allocation11 + $0x1b0] sm:$0xff] }
 0x2f9   :  { %2117 = vmatpush2.msra.mxu1 %v1933_v57  ;;  %v1764_v57 = vld [vmem:[#allocation11 + $0x198] sm:$0xff] }
 0x2fa   :  { %2118 = vmatprep.subr.mxu1 %v1930_v58  ;;  %v1763_v58 = vld [vmem:[#allocation11 + $0x190] sm:$0xff] }
 0x2fb   :  { %2119 = vmatpush2.msra.mxu1 %v1929_v60  ;;  %v1760_v60 = vld [vmem:[#allocation11 + $0x178] sm:$0xff] }
 0x2fc   :  { %2120 = vmatprep.subr.mxu1 %v1926_v61  ;;  %v1759_v61 = vld [vmem:[#allocation11 + $0x170] sm:$0xff] }
 0x2fd   :  { %2121 = vmatpush2.msra.mxu1 %v1925_v24  ;;  %v1756_v24 = vld [vmem:[#allocation11 + $0x158] sm:$0xff] }
 0x2fe   :  { %2122 = vmatprep.subr.mxu1 %v1922_v63  ;;  %v1755_v63 = vld [vmem:[#allocation11 + $0x150] sm:$0xff] }
 0x2ff   :  { %2123 = vmatpush2.msra.mxu1 %v1921_v0  ;;  %v1752_v0 = vld [vmem:[#allocation11 + $0x138] sm:$0xff] }
 0x300   :  { %2124 = vmatprep.subr.mxu1 %v1918_v2  ;;  %v1751_v2 = vld [vmem:[#allocation11 + $0x130] sm:$0xff] }
 0x301   :  { %2125 = vmatpush2.msra.mxu1 %v1917_v3  ;;  %v1748_v3 = vld [vmem:[#allocation11 + $0x118] sm:$0xff] }
 0x302   :  { %2126 = vmatprep.subr.mxu1 %v1914_v5  ;;  %v1747_v5 = vld [vmem:[#allocation11 + $0x110] sm:$0xff] }
 0x303   :  { %2127 = vmatpush2.msra.mxu1 %v1913_v22  ;;  %v1431_v17 = vpop.f32.mrf.mxu0  ;;  %v1744_v22 = vld [vmem:[#allocation11 + $0xf8] sm:$0xff] }
 0x304   :  { %2128 = vmatprep.subr.mxu1 %v1910_v6  ;;  %v1432_v25 = vadd.f32 %v1431_v17, %v1348_v19  ;;  %v1743_v6 = vld [vmem:[#allocation11 + $0xf0] sm:$0xff]  ;;  %v1732_v17 = vld [vmem:[#allocation11 + $0x98] sm:$0xff] }
 0x305   :  { %2129 = vmatpush2.msra.mxu1 %v1909_v7  ;;  %v1433_v23 = vpop.f32.mrf.mxu0  ;;  %v1740_v7 = vld [vmem:[#allocation11 + $0xd8] sm:$0xff] }
 0x306   :  { %2130 = vmatprep.subr.mxu1 %v1906_v10  ;;  %v1434_v28 = vadd.f32 %v1433_v23, %v1352_v21  ;;  %v1739_v10 = vld [vmem:[#allocation11 + $0xd0] sm:$0xff] }
 0x307   :  { %2131 = vmatpush2.msra.mxu1 %v1905_v16  ;;  %v1736_v16 = vld [vmem:[#allocation11 + $0xb8] sm:$0xff]  ;;  %v1727_v23 = vld [vmem:[#allocation11 + $0x70] sm:$0xff] }
 0x308   :  { %2222 = vmatprep.subr.mxu1 %v1904_v13  ;;  %v1735_v13 = vld [vmem:[#allocation11 + $0xb0] sm:$0xff] }
 0x309   :  { %v1437_v26 = vpop.f32.mrf.mxu0 }
 0x30a   :  { %v1438_v34 = vadd.f32 %v1437_v26, %v1348_v19  ;;  %v1731_v19 = vld [vmem:[#allocation11 + $0x90] sm:$0xff] }
 0x30b   :  { %v1439_v31 = vpop.f32.mrf.mxu0  ;;  %v1723_v26 = vld [vmem:[#allocation11 + $0x50] sm:$0xff] }
 0x30c   :  { %v1440_v59 = vadd.f32 %v1439_v31, %v1352_v21  ;;  %v1728_v21 = vld [vmem:[#allocation11 + $0x78] sm:$0xff]  ;;  %v1715_v31 = vld [vmem:[#allocation11 + $0x10] sm:$0xff] }
 0x346   :  { %v1508_v27 = vpop.f32.mrf.mxu1 }
 0x347   :  { %v1509_v29 = vadd.f32 %v1508_v27, %v1432_v25  ;;  %v1724_v25 = vld [vmem:[#allocation11 + $0x58] sm:$0xff] }
 0x348   :  { %v1510_v30 = vpop.f32.mrf.mxu1  ;;  %v1720_v27 = vld [vmem:[#allocation11 + $0x38] sm:$0xff] }
 0x349   :  { %v1681_v32 = vmul.f32 0.70710677, %v1509_v29  ;;  %v1511_v33 = vadd.f32 %v1510_v30, %v1434_v28  ;;  %v1673_v43 = vmul.f32 0.5, %v1509_v29  ;;  %v1719_v28 = vld [vmem:[#allocation11 + $0x30] sm:$0xff]  ;;  %v1716_v29 = vld [vmem:[#allocation11 + $0x18] sm:$0xff]  ;;  %v1585_v30 = vpop.f32.mrf.mxu0 }
 0x34a   :  { %v1514_v36 = vpop.f32.mrf.mxu1 }
 0x34b   :  { %2410 = verf.f32 %v1681_v32  ;;  %v1682_v35 = vmul.f32 0.70710677, %v1511_v33  ;;  %v1515_v37 = vadd.f32 %v1514_v36, %v1438_v34  ;;  %v1674_v41 = vmul.f32 0.5, %v1511_v33  ;;  %v1840_v32 = vld [vmem:[#allocation11 + $0x3f8] sm:$0xff]  ;;  %v1839_v33 = vld [vmem:[#allocation11 + $0x3f0] sm:$0xff] }
 0x34c   :  { %v1516_v1 = vpop.f32.mrf.mxu1  ;;  %v1836_v34 = vld [vmem:[#allocation11 + $0x3d8] sm:$0xff]  ;;  %v1835_v36 = vld [vmem:[#allocation11 + $0x3d0] sm:$0xff] }
 0x34d   :  { %2412 = verf.f32 %v1682_v35  ;;  %v1685_v15 = vmul.f32 0.70710677, %v1515_v37  ;;  %v1517_v38 = vadd.f32 %v1516_v1, %v1440_v59  ;;  %v1677_v53 = vmul.f32 0.5, %v1515_v37  ;;  %v1587_v35 = vpop.f32.mrf.mxu0  ;;  %v1832_v37 = vld [vmem:[#allocation11 + $0x3b8] sm:$0xff]  ;;  %v1831_v1 = vld [vmem:[#allocation11 + $0x3b0] sm:$0xff] }
 0x34e   :  { %v1356_v59 = vrot.slane %v2763_v14, %v2685_v9 }
 0x34f   :  { %2414 = verf.f32 %v1685_v15  ;;  %v1686_v39 = vmul.f32 0.70710677, %v1517_v38  ;;  %v1678_v52 = vmul.f32 0.5, %v1517_v38  ;;  %v1360_v15 = vrot.slane %v2763_v14, %v2689_v12  ;;  %v1828_v38 = vld [vmem:[#allocation11 + $0x398] sm:$0xff]  ;;  %v1819_v14 = vld [vmem:[#allocation11 + $0x350] sm:$0xff] }
 0x351   :  { %2416 = verf.f32 %v1686_v39  ;;  %v1591_v39 = vpop.f32.mrf.mxu0 }
 0x358   :  { %v2411_v18 = vpop.eup %2410 }
 0x359   :  { %v1697_v20 = vadd.f32 1.0, %v2411_v18  ;;  %v1827_v18 = vld [vmem:[#allocation11 + $0x390] sm:$0xff] }
 0x35a   :  { %v2413_v40 = vpop.eup %2412 }
 0x35b   :  { %v1698_v42 = vadd.f32 1.0, %v2413_v40  ;;  %v2769_v46 = vmul.f32 %v1697_v20, %v1673_v43  ;;  %v1586_v40 = vadd.f32 %v1585_v30, %v1356_v59  ;;  %v1824_v20 = vld [vmem:[#allocation11 + $0x378] sm:$0xff]  ;;  %v1588_v43 = vadd.f32 %v1587_v35, %v1360_v15 }
 0x35c   :  { %v2415_v44 = vpop.eup %2414  ;;  %v1780_v30 = vld [vmem:[#allocation11 + $0x218] sm:$0xff] }
 0x35d   :  { %v1706_v45 = vmul.f32 %v1698_v42, %v1674_v41  ;;  %v1701_v50 = vadd.f32 1.0, %v2415_v44  ;;  %v1823_v42 = vld [vmem:[#allocation11 + $0x370] sm:$0xff] }
 0x35e   :  { %v2417_v48 = vpop.eup %2416 }
 0x35f   :  { %2055 = vmatprep.mubr.f32.mxu0 %v1706_v45  ;;  %v1702_v4 = vadd.f32 1.0, %v2417_v48  ;;  %v2774_v62 = vmul.f32 %v1701_v50, %v1677_v53  ;;  %v1815_v53 = vld [vmem:[#allocation11 + $0x330] sm:$0xff] }
 0x360   :  { %2056 = vmatmul.mubr.f32.vlgmr.msra.gmra.mxu0 %v2769_v46 }
 0x361   :  { %2146 = vmatpush1.msra.mxu0 %v1775_v47  ;;  %v2772_v55 = vmul.f32 %v1702_v4, %v1678_v52  ;;  %v1593_v47 = vpop.f32.mrf.mxu0 }
 0x362   :  { %2147 = vmatprep.subr.mxu0 %v1772_v49  ;;  %v1592_v49 = vadd.f32 %v1591_v39, %v1356_v59 }
 0x363   :  { %2148 = vmatpush1.msra.mxu0 %v1771_v51  ;;  %2061 = vmatprep.mubr.f32.mxu0 %v2772_v55  ;;  %v1816_v51 = vld [vmem:[#allocation11 + $0x338] sm:$0xff] }
 0x364   :  { %2149 = vmatprep.subr.mxu0 %v1768_v54  ;;  %2062 = vmatmul.mubr.f32.gmra.mxu0 %v2774_v62  ;;  %v1594_v54 = vadd.f32 %v1593_v47, %v1360_v15  ;;  %v1884_v47 = vld [vmem:[#allocation11 + $0x558] sm:$0xff] }
 0x365   :  { %2150 = vmatpush1.msra.mxu0 %v1767_v56  ;;  %2209 = vmatprep.mubr.f32.mxu0 %v1706_v45  ;;  %v1820_v45 = vld [vmem:[#allocation11 + $0x358] sm:$0xff] }
 0x366   :  { %2151 = vmatprep.subr.mxu0 %v1764_v57 }
 0x367   :  { %2152 = vmatpush1.msra.mxu0 %v1763_v58  ;;  %v1812_v58 = vld [vmem:[#allocation11 + $0x318] sm:$0xff] }
 0x368   :  { %2153 = vmatprep.subr.mxu0 %v1760_v60 }
 0x369   :  { %2154 = vmatpush1.msra.mxu0 %v1759_v61  ;;  %v1811_v61 = vld [vmem:[#allocation11 + $0x310] sm:$0xff] }
 0x36a   :  { %2155 = vmatprep.subr.mxu0 %v1756_v24 }
 0x36b   :  { %2156 = vmatpush1.msra.mxu0 %v1755_v63 }
 0x36c   :  { %2157 = vmatprep.subr.mxu0 %v1752_v0  ;;  %v1808_v0 = vld [vmem:[#allocation11 + $0x2f8] sm:$0xff] }
 0x36d   :  { %2158 = vmatpush1.msra.mxu0 %v1751_v2  ;;  %v1807_v2 = vld [vmem:[#allocation11 + $0x2f0] sm:$0xff] }
 0x36e   :  { %2159 = vmatprep.subr.mxu0 %v1748_v3 }
 0x36f   :  { %2160 = vmatpush1.msra.mxu0 %v1747_v5  ;;  %v1804_v5 = vld [vmem:[#allocation11 + $0x2d8] sm:$0xff] }
 0x370   :  { %2161 = vmatprep.subr.mxu0 %v1744_v22  ;;  %v1803_v22 = vld [vmem:[#allocation11 + $0x2d0] sm:$0xff] }
 0x371   :  { %2162 = vmatpush1.msra.mxu0 %v1743_v6  ;;  %v1800_v6 = vld [vmem:[#allocation11 + $0x2b8] sm:$0xff] }
 0x372   :  { %2163 = vmatprep.subr.mxu0 %v1740_v7  ;;  %v1799_v7 = vld [vmem:[#allocation11 + $0x2b0] sm:$0xff] }
 0x373   :  { %2164 = vmatpush1.msra.mxu0 %v1739_v10  ;;  %v1796_v10 = vld [vmem:[#allocation11 + $0x298] sm:$0xff] }
 0x374   :  { %2165 = vmatprep.subr.mxu0 %v1736_v16  ;;  %v1795_v16 = vld [vmem:[#allocation11 + $0x290] sm:$0xff] }
 0x375   :  { %2166 = vmatpush1.msra.mxu0 %v1735_v13  ;;  %v1792_v13 = vld [vmem:[#allocation11 + $0x278] sm:$0xff] }
 0x376   :  { %2167 = vmatprep.subr.mxu0 %v1732_v17  ;;  %v1791_v17 = vld [vmem:[#allocation11 + $0x270] sm:$0xff] }
 0x377   :  { %2168 = vmatpush1.msra.mxu0 %v1731_v19  ;;  %v1788_v19 = vld [vmem:[#allocation11 + $0x258] sm:$0xff] }
 0x378   :  { %2169 = vmatprep.subr.mxu0 %v1728_v21 }
 0x379   :  { %2170 = vmatpush1.msra.mxu0 %v1727_v23  ;;  %v1787_v23 = vld [vmem:[#allocation11 + $0x250] sm:$0xff] }
 0x37a   :  { %2171 = vmatprep.subr.mxu0 %v1724_v25  ;;  %v1784_v25 = vld [vmem:[#allocation11 + $0x238] sm:$0xff] }
 0x37b   :  { %2172 = vmatpush1.msra.mxu0 %v1723_v26 }
 0x37c   :  { %2173 = vmatprep.subr.mxu0 %v1720_v27 }
 0x37d   :  { %2174 = vmatpush1.msra.mxu0 %v1719_v28  ;;  %v1783_v28 = vld [vmem:[#allocation11 + $0x230] sm:$0xff] }
 0x37e   :  { %2175 = vmatprep.subr.mxu0 %v1716_v29 }
 0x37f   :  { %2176 = vmatpush1.msra.mxu0 %v1715_v31 }
 0x380   :  { %2177 = vmatprep.subr.mxu0 %v1840_v32 }
 0x381   :  { %2178 = vmatpush2.msra.mxu0 %v1839_v33 }
 0x382   :  { %2179 = vmatprep.subr.mxu0 %v1836_v34  ;;  %v1779_v34 = vld [vmem:[#allocation11 + $0x210] sm:$0xff] }
 0x383   :  { %2180 = vmatpush2.msra.mxu0 %v1835_v36 }
 0x384   :  { %2181 = vmatprep.subr.mxu0 %v1832_v37  ;;  %v1903_v37 = vld [vmem:[#allocation11 + $0x5f0] sm:$0xff] }
 0x385   :  { %2182 = vmatpush2.msra.mxu0 %v1831_v1 }
 0x386   :  { %v1662_v41 = vpop.f32.mrf.mxu1  ;;  %2183 = vmatprep.subr.mxu0 %v1828_v38  ;;  %v1900_v38 = vld [vmem:[#allocation11 + $0x5d8] sm:$0xff] }
 0x387   :  { %v2782_v44 = vadd.f32 %v1662_v41, %v1586_v40  ;;  %2184 = vmatpush2.msra.mxu0 %v1827_v18  ;;  %v1899_v40 = vld [vmem:[#allocation11 + $0x5d0] sm:$0xff]  ;;  %v1896_v41 = vld [vmem:[#allocation11 + $0x5b8] sm:$0xff] }
 0x388   :  { %v1664_v48 = vpop.f32.mrf.mxu1  ;;  %2185 = vmatprep.subr.mxu0 %v1824_v20 }
 0x389   :  { %v1683_v50 = vmul.f32 0.70710677, %v2782_v44  ;;  %v1665_v52 = vadd.f32 %v1664_v48, %v1588_v43  ;;  %2186 = vmatpush2.msra.mxu0 %v1823_v42  ;;  %v1675_v33 = vmul.f32 0.5, %v2782_v44  ;;  %v1895_v43 = vld [vmem:[#allocation11 + $0x5b0] sm:$0xff]  ;;  %v1892_v44 = vld [vmem:[#allocation11 + $0x598] sm:$0xff] }
 0x38a   :  { %v1668_v4 = vpop.f32.mrf.mxu1  ;;  %2187 = vmatprep.subr.mxu0 %v1820_v45  ;;  %v1891_v45 = vld [vmem:[#allocation11 + $0x590] sm:$0xff] }
 0x38b   :  { %2418 = verf.f32 %v1683_v50  ;;  %v1684_v56 = vmul.f32 0.70710677, %v1665_v52  ;;  %v1669_v57 = vadd.f32 %v1668_v4, %v1592_v49  ;;  %2188 = vmatpush2.msra.mxu0 %v1819_v14  ;;  %v1676_v29 = vmul.f32 0.5, %v1665_v52  ;;  %v1883_v48 = vld [vmem:[#allocation11 + $0x550] sm:$0xff]  ;;  %v1880_v14 = vld [vmem:[#allocation11 + $0x538] sm:$0xff] }
 0x38c   :  { %v1670_v60 = vpop.f32.mrf.mxu1  ;;  %2189 = vmatprep.subr.mxu0 %v1816_v51  ;;  %v1879_v49 = vld [vmem:[#allocation11 + $0x530] sm:$0xff]  ;;  %v1876_v50 = vld [vmem:[#allocation11 + $0x518] sm:$0xff] }
 0x38d   :  { %2420 = verf.f32 %v1684_v56  ;;  %v1687_v24 = vmul.f32 0.70710677, %v1669_v57  ;;  %v1671_v63 = vadd.f32 %v1670_v60, %v1594_v54  ;;  %2190 = vmatpush2.msra.mxu0 %v1815_v53  ;;  %v1679_v18 = vmul.f32 0.5, %v1669_v57  ;;  %v1875_v52 = vld [vmem:[#allocation11 + $0x510] sm:$0xff]  ;;  %v1872_v51 = vld [vmem:[#allocation11 + $0x4f8] sm:$0xff] }
 0x38e   :  { %2191 = vmatprep.subr.mxu0 %v1812_v58  ;;  %v1868_v4 = vld [vmem:[#allocation11 + $0x4d8] sm:$0xff]  ;;  %v1867_v53 = vld [vmem:[#allocation11 + $0x4d0] sm:$0xff] }
 0x38f   :  { %2422 = verf.f32 %v1687_v24  ;;  %v1688_v3 = vmul.f32 0.70710677, %v1671_v63  ;;  %2192 = vmatpush2.msra.mxu0 %v1811_v61  ;;  %v1680_v15 = vmul.f32 0.5, %v1671_v63  ;;  %v1864_v54 = vld [vmem:[#allocation11 + $0x4b8] sm:$0xff]  ;;  %v1863_v56 = vld [vmem:[#allocation11 + $0x4b0] sm:$0xff] }
 0x390   :  { %2193 = vmatprep.subr.mxu0 %v1808_v0  ;;  %v1860_v57 = vld [vmem:[#allocation11 + $0x498] sm:$0xff]  ;;  %v1859_v58 = vld [vmem:[#allocation11 + $0x490] sm:$0xff] }
 0x391   :  { %2424 = verf.f32 %v1688_v3  ;;  %2194 = vmatpush2.msra.mxu0 %v1807_v2  ;;  %v1856_v60 = vld [vmem:[#allocation11 + $0x478] sm:$0xff]  ;;  %v1855_v61 = vld [vmem:[#allocation11 + $0x470] sm:$0xff] }
 0x392   :  { %2195 = vmatprep.subr.mxu0 %v1804_v5  ;;  %v1852_v24 = vld [vmem:[#allocation11 + $0x458] sm:$0xff]  ;;  %v1851_v63 = vld [vmem:[#allocation11 + $0x450] sm:$0xff] }
 0x393   :  { %2196 = vmatpush2.msra.mxu0 %v1803_v22  ;;  %v1848_v0 = vld [vmem:[#allocation11 + $0x438] sm:$0xff]  ;;  %v1847_v2 = vld [vmem:[#allocation11 + $0x430] sm:$0xff] }
 0x394   :  { %2197 = vmatprep.subr.mxu0 %v1800_v6  ;;  %v1844_v3 = vld [vmem:[#allocation11 + $0x418] sm:$0xff]  ;;  %v1843_v5 = vld [vmem:[#allocation11 + $0x410] sm:$0xff] }
 0x395   :  { %2198 = vmatpush2.msra.mxu0 %v1799_v7  ;;  %v1968_v22 = vld [vmem:[#allocation11 + $0x7f8] sm:$0xff]  ;;  %v1967_v6 = vld [vmem:[#allocation11 + $0x7f0] sm:$0xff] }
 0x396   :  { %2199 = vmatprep.subr.mxu0 %v1796_v10  ;;  %v1964_v7 = vld [vmem:[#allocation11 + $0x7d8] sm:$0xff]  ;;  %v1963_v10 = vld [vmem:[#allocation11 + $0x7d0] sm:$0xff] }
 0x397   :  { %2200 = vmatpush2.msra.mxu0 %v1795_v16  ;;  %v1960_v16 = vld [vmem:[#allocation11 + $0x7b8] sm:$0xff] }
 0x398   :  { %v2419_v21 = vpop.eup %2418  ;;  %2201 = vmatprep.subr.mxu0 %v1792_v13  ;;  %v1959_v13 = vld [vmem:[#allocation11 + $0x7b0] sm:$0xff] }
 0x399   :  { %2202 = vmatpush2.msra.mxu0 %v1791_v17  ;;  %v1699_v27 = vadd.f32 1.0, %v2419_v21  ;;  %v1956_v17 = vld [vmem:[#allocation11 + $0x798] sm:$0xff] }
 0x39a   :  { %v2421_v26 = vpop.eup %2420  ;;  %2203 = vmatprep.subr.mxu0 %v1788_v19  ;;  %v1955_v19 = vld [vmem:[#allocation11 + $0x790] sm:$0xff]  ;;  %v1952_v21 = vld [vmem:[#allocation11 + $0x778] sm:$0xff] }
 0x39b   :  { %2204 = vmatpush2.msra.mxu0 %v1787_v23  ;;  %v1700_v31 = vadd.f32 1.0, %v2421_v26  ;;  %v2786_v59 = vmul.f32 %v1699_v27, %v1675_v33  ;;  %v1951_v23 = vld [vmem:[#allocation11 + $0x770] sm:$0xff]  ;;  %v1944_v27 = vld [vmem:[#allocation11 + $0x738] sm:$0xff] }
 0x39c   :  { %v2423_v32 = vpop.eup %2422  ;;  %2205 = vmatprep.subr.mxu0 %v1784_v25  ;;  %v1948_v25 = vld [vmem:[#allocation11 + $0x758] sm:$0xff]  ;;  %v1947_v26 = vld [vmem:[#allocation11 + $0x750] sm:$0xff] }
 0x39d   :  { %2206 = vmatpush2.msra.mxu0 %v1783_v28  ;;  %v1708_v35 = vmul.f32 %v1700_v31, %v1676_v29  ;;  %v1703_v1 = vadd.f32 1.0, %v2423_v32  ;;  %v1943_v28 = vld [vmem:[#allocation11 + $0x730] sm:$0xff]  ;;  %v1940_v29 = vld [vmem:[#allocation11 + $0x718] sm:$0xff] }
 0x39e   :  { %v2425_v36 = vpop.eup %2424  ;;  %2207 = vmatprep.subr.mxu0 %v1780_v30  ;;  %v1939_v30 = vld [vmem:[#allocation11 + $0x710] sm:$0xff]  ;;  %v1936_v31 = vld [vmem:[#allocation11 + $0x6f8] sm:$0xff] }
 0x39f   :  { %2132 = vmatprep.mubr.f32.mxu1 %v1708_v35  ;;  %2208 = vmatpush2.msra.mxu0 %v1779_v34  ;;  %v1704_v39 = vadd.f32 1.0, %v2425_v36  ;;  %v2793_v42 = vmul.f32 %v1703_v1, %v1679_v18  ;;  %v1935_v32 = vld [vmem:[#allocation11 + $0x6f0] sm:$0xff]  ;;  %v1932_v33 = vld [vmem:[#allocation11 + $0x6d8] sm:$0xff] }
 0x3a0   :  { %2133 = vmatmul.mubr.f32.vlgmr.msra.gmra.mxu1 %v2786_v59  ;;  %2210 = vmatmul.mubr.f32.vlgmr.msra.gmra.mxu0 %v2769_v46  ;;  %v1888_v46 = vld [vmem:[#allocation11 + $0x578] sm:$0xff]  ;;  %v1931_v34 = vld [vmem:[#allocation11 + $0x6d0] sm:$0xff] }
 0x3a1   :  { %2223 = vmatpush1.msra.mxu1 %v1903_v37  ;;  %2215 = vmatprep.mubr.f32.mxu0 %v2772_v55  ;;  %v2791_v20 = vmul.f32 %v1704_v39, %v1680_v15  ;;  %v1887_v55 = vld [vmem:[#allocation11 + $0x570] sm:$0xff]  ;;  %v1924_v37 = vld [vmem:[#allocation11 + $0x698] sm:$0xff] }
 0x3a2   :  { %2224 = vmatprep.subr.mxu1 %v1900_v38  ;;  %v1927_v36 = vld [vmem:[#allocation11 + $0x6b0] sm:$0xff]  ;;  %v1920_v15 = vld [vmem:[#allocation11 + $0x678] sm:$0xff] }
 0x3a3   :  { %2225 = vmatpush1.msra.mxu1 %v1899_v40  ;;  %2138 = vmatprep.mubr.f32.mxu1 %v2791_v20  ;;  %v1923_v1 = vld [vmem:[#allocation11 + $0x690] sm:$0xff]  ;;  %v1916_v39 = vld [vmem:[#allocation11 + $0x658] sm:$0xff] }
 0x3a4   :  { %2226 = vmatprep.subr.mxu1 %v1896_v41  ;;  %2139 = vmatmul.mubr.f32.gmra.mxu1 %v2793_v42  ;;  %v1919_v38 = vld [vmem:[#allocation11 + $0x670] sm:$0xff]  ;;  %v1912_v40 = vld [vmem:[#allocation11 + $0x638] sm:$0xff] }
 0x3a5   :  { %2216 = vmatmul.mubr.f32.gmra.mxu0 %v2774_v62  ;;  %2227 = vmatpush1.msra.mxu1 %v1895_v43  ;;  %v1871_v62 = vld [vmem:[#allocation11 + $0x4f0] sm:$0xff]  ;;  %v1908_v43 = vld [vmem:[#allocation11 + $0x618] sm:$0xff] }
 0x3a6   :  { %2228 = vmatprep.subr.mxu1 %v1892_v44  ;;  %2286 = vmatprep.mubr.f32.mxu1 %v1708_v35  ;;  %v1928_v35 = vld [vmem:[#allocation11 + $0x6b8] sm:$0xff]  ;;  %v1915_v18 = vld [vmem:[#allocation11 + $0x650] sm:$0xff] }
 0x3a7   :  { %2229 = vmatpush1.msra.mxu1 %v1891_v45  ;;  %v1911_v41 = vld [vmem:[#allocation11 + $0x630] sm:$0xff] }
 0x3a8   :  { %2230 = vmatprep.subr.mxu1 %v1888_v46  ;;  %v1907_v44 = vld [vmem:[#allocation11 + $0x610] sm:$0xff]  ;;  %v1969_v46 = vld [vmem:[%s2822_s8] sm:$0xf]  ;;  %s2602_s8 = smov [#allocation13]  }
 0x3a9   :  { %2231 = vmatpush1.msra.mxu1 %v1887_v55  ;;  %s2352_s22 = sshll.u32 %s2602_s8, 4  ;;  %s2353_s22 = int_to_ptr.vmem [resolvable:$true] %s2352_s22 }
 0x3aa   :  { %2232 = vmatprep.subr.mxu1 %v1884_v47  ;;  %v1974_v47 = vrot.slane %v1969_v46, %v2683_v8  ;;  %s2562_s1 = scalar_lea.vmem %s2353_s22, 1024  ;;  %p2567_p3 = scmp.lt.s32.totalorder %s2353_s22, %s2353_s22 }
 0x3ab   :  { %2233 = vmatpush1.msra.mxu1 %v1883_v48  ;;  %v1978_v48 = vrot.slane %v1969_v46, %v2687_v11  ;;  %p2563_p2 = scmp.ne.s32.totalorder %s2353_s22, %s2562_s1  ;;  %p2568_p4 = scmp.lt.s32.totalorder %s2562_s1, %s2562_s1 }
 0x3ac   :  { %2234 = vmatprep.subr.mxu1 %v1880_v14 }
 0x3ad   :  { %2235 = vmatpush1.msra.mxu1 %v1879_v49  ;;  %p2569_p5 = por %p2568_p4, %p2567_p3 }
 0x3ae   :  { %2236 = vmatprep.subr.mxu1 %v1876_v50 }
 0x3af   :  { %2237 = vmatpush1.msra.mxu1 %v1875_v52  ;;  %p2570_p6 = pnand %p2569_p5, %p2563_p2 }
 0x3b0   :  { %2238 = vmatprep.subr.mxu1 %v1872_v51 }
 0x3b1   :  { %2239 = vmatpush1.msra.mxu1 %v1871_v62 }
 0x3b2   :  { %2240 = vmatprep.subr.mxu1 %v1868_v4 }
 0x3b3   :  { %2241 = vmatpush1.msra.mxu1 %v1867_v53 }
 0x3b4   :  { %2242 = vmatprep.subr.mxu1 %v1864_v54 }
 0x3b5   :  { %2243 = vmatpush1.msra.mxu1 %v1863_v56 }
 0x3b6   :  { %2244 = vmatprep.subr.mxu1 %v1860_v57 }
 0x3b7   :  { %2245 = vmatpush1.msra.mxu1 %v1859_v58 }
 0x3b8   :  { %2246 = vmatprep.subr.mxu1 %v1856_v60 }
 0x3b9   :  { %2247 = vmatpush1.msra.mxu1 %v1855_v61 }
 0x3ba   :  { %2248 = vmatprep.subr.mxu1 %v1852_v24 }
 0x3bb   :  { %2249 = vmatpush1.msra.mxu1 %v1851_v63 }
 0x3bc   :  { %2250 = vmatprep.subr.mxu1 %v1848_v0 }
 0x3bd   :  { %2251 = vmatpush1.msra.mxu1 %v1847_v2 }
 0x3be   :  { %2252 = vmatprep.subr.mxu1 %v1844_v3 }
 0x3bf   :  { %2253 = vmatpush1.msra.mxu1 %v1843_v5 }
 0x3c0   :  { %2254 = vmatprep.subr.mxu1 %v1968_v22 }
 0x3c1   :  { %2255 = vmatpush2.msra.mxu1 %v1967_v6 }
 0x3c2   :  { %2256 = vmatprep.subr.mxu1 %v1964_v7 }
 0x3c3   :  { %2257 = vmatpush2.msra.mxu1 %v1963_v10 }
 0x3c4   :  { %2258 = vmatprep.subr.mxu1 %v1960_v16 }
 0x3c5   :  { %2259 = vmatpush2.msra.mxu1 %v1959_v13 }
 0x3c6   :  { %2260 = vmatprep.subr.mxu1 %v1956_v17 }
 0x3c7   :  { %2261 = vmatpush2.msra.mxu1 %v1955_v19 }
 0x3c8   :  { %2262 = vmatprep.subr.mxu1 %v1952_v21 }
 0x3c9   :  { %2263 = vmatpush2.msra.mxu1 %v1951_v23 }
 0x3ca   :  { %2264 = vmatprep.subr.mxu1 %v1948_v25 }
 0x3cb   :  { %2265 = vmatpush2.msra.mxu1 %v1947_v26  ;;  %v1982_v26 = vrot.slane %v1969_v46, %v2685_v9 }
 0x3cc   :  { %2266 = vmatprep.subr.mxu1 %v1944_v27  ;;  %v1986_v27 = vrot.slane %v1969_v46, %v2689_v12 }
 0x3cd   :  { %2267 = vmatpush2.msra.mxu1 %v1943_v28 }
 0x3ce   :  { %2268 = vmatprep.subr.mxu1 %v1940_v29 }
 0x3cf   :  { %2269 = vmatpush2.msra.mxu1 %v1939_v30 }
 0x3d0   :  { %2270 = vmatprep.subr.mxu1 %v1936_v31 }
 0x3d1   :  { %2271 = vmatpush2.msra.mxu1 %v1935_v32 }
 0x3d2   :  { %2272 = vmatprep.subr.mxu1 %v1932_v33 }
 0x3d3   :  { %2273 = vmatpush2.msra.mxu1 %v1931_v34 }
 0x3d4   :  { %2274 = vmatprep.subr.mxu1 %v1928_v35 }
 0x3d5   :  { %2275 = vmatpush2.msra.mxu1 %v1927_v36 }
 0x3d6   :  { %2276 = vmatprep.subr.mxu1 %v1924_v37 }
 0x3d7   :  { %2277 = vmatpush2.msra.mxu1 %v1923_v1 }
 0x3d8   :  { %2278 = vmatprep.subr.mxu1 %v1920_v15 }
 0x3d9   :  { %2279 = vmatpush2.msra.mxu1 %v1919_v38 }
 0x3da   :  { %2280 = vmatprep.subr.mxu1 %v1916_v39 }
 0x3db   :  { %2281 = vmatpush2.msra.mxu1 %v1915_v18 }
 0x3dc   :  { %2282 = vmatprep.subr.mxu1 %v1912_v40 }
 0x3dd   :  { %2283 = vmatpush2.msra.mxu1 %v1911_v41 }
 0x3de   :  { %2284 = vmatprep.subr.mxu1 %v1908_v43 }
 0x3df   :  { %2285 = vmatpush2.msra.mxu1 %v1907_v44 }
 0x3e0   :  { %2287 = vmatmul.mubr.f32.vlgmr.msra.gmra.mxu1 %v2786_v59 }
 0x3e1   :  { %2292 = vmatprep.mubr.f32.mxu1 %v2791_v20 }
 0x3e4   :  { %2293 = vmatmul.mubr.f32.gmra.mxu1 %v2793_v42 }
 0x420   :  { %v2057_v45 = vpop.f32.mrf.mxu0 }
 0x421   :  { %v2058_v49 = vadd.f32 %v2057_v45, %v1974_v47 }
 0x422   :  { %v2059_v55 = vpop.f32.mrf.mxu0 }
 0x423   :  { %v2060_v52 = vadd.f32 %v2059_v55, %v1978_v48 }
 0x424   :  { %v2063_v14 = vpop.f32.mrf.mxu0 }
 0x425   :  { %v2064_v20 = vadd.f32 %v2063_v14, %v1974_v47 }
 0x426   :  { %v2065_v59 = vpop.f32.mrf.mxu0 }
 0x427   :  { %v2066_v54 = vadd.f32 %v2065_v59, %v1978_v48 }
 0x460   :  { %v2134_v50 = vpop.f32.mrf.mxu1  ;;  %v2211_v23 = vpop.f32.mrf.mxu0 }
 0x461   :  { %v2135_v51 = vadd.f32 %v2134_v50, %v2058_v49  ;;  %v2212_v29 = vadd.f32 %v2211_v23, %v1982_v26 }
 0x462   :  { %v2136_v62 = vpop.f32.mrf.mxu1  ;;  %v2213_v25 = vpop.f32.mrf.mxu0 }
 0x463   :  { %v2307_v4 = vmul.f32 0.70710677, %v2135_v51  ;;  %v2137_v42 = vadd.f32 %v2136_v62, %v2060_v52  ;;  %v2299_v24 = vmul.f32 0.5, %v2135_v51  ;;  %v2214_v31 = vadd.f32 %v2213_v25, %v1986_v27 }
 0x464   :  { %v2140_v53 = vpop.f32.mrf.mxu1 }
 0x465   :  { %2426 = verf.f32 %v2307_v4  ;;  %v2308_v56 = vmul.f32 0.70710677, %v2137_v42  ;;  %v2141_v57 = vadd.f32 %v2140_v53, %v2064_v20  ;;  %v2300_v3 = vmul.f32 0.5, %v2137_v42  ;;  %v2217_v28 = vpop.f32.mrf.mxu0 }
 0x466   :  { %v2142_v58 = vpop.f32.mrf.mxu1  ;;  %v2218_v35 = vadd.f32 %v2217_v28, %v1982_v26 }
 0x467   :  { %2428 = verf.f32 %v2308_v56  ;;  %v2311_v8 = vmul.f32 0.70710677, %v2141_v57  ;;  %v2143_v60 = vadd.f32 %v2142_v58, %v2066_v54  ;;  %v2303_v7 = vmul.f32 0.5, %v2141_v57  ;;  %v2219_v33 = vpop.f32.mrf.mxu0 }
 0x468   :  { %v2220_v15 = vadd.f32 %v2219_v33, %v1986_v27 }
 0x469   :  { %2430 = verf.f32 %v2311_v8  ;;  %v2312_v11 = vmul.f32 0.70710677, %v2143_v60  ;;  %v2304_v17 = vmul.f32 0.5, %v2143_v60 }
 0x46b   :  { %2432 = verf.f32 %v2312_v11 }
 0x472   :  { %v2427_v61 = vpop.eup %2426 }
 0x473   :  { %v2323_v63 = vadd.f32 1.0, %v2427_v61 }
 0x474   :  { %v2429_v0 = vpop.eup %2428 }
 0x475   :  { %v2331_v2 = vmul.f32 %v2323_v63, %v2299_v24  ;;  %v2324_v5 = vadd.f32 1.0, %v2429_v0 }
 0x476   :  { %v2431_v22 = vpop.eup %2430 }
 0x477   :  { %2339 = vst [vmem:[#allocation13] sm:$0xff] %v2331_v2  ;;  %v2332_v6 = vmul.f32 %v2324_v5, %v2300_v3  ;;  %v2327_v10 = vadd.f32 1.0, %v2431_v22 }
 0x478   :  { %v2433_v16 = vpop.eup %2432 }
 0x479   :  { %2340 = vst [vmem:[#allocation13 + $0x8] sm:$0xff] %v2332_v6  ;;  %v2335_v13 = vmul.f32 %v2327_v10, %v2303_v7  ;;  %v2328_v19 = vadd.f32 1.0, %v2433_v16 }
 0x47b   :  { %2343 = vst [vmem:[#allocation13 + $0x20] sm:$0xff] %v2335_v13  ;;  %v2336_v21 = vmul.f32 %v2328_v19, %v2304_v17 }
 0x47d   :  { %2344 = vst [vmem:[#allocation13 + $0x28] sm:$0xff] %v2336_v21 }
 0x4a0   :  { %v2288_v30 = vpop.f32.mrf.mxu1 }
 0x4a1   :  { %v2289_v32 = vadd.f32 %v2288_v30, %v2212_v29 }
 0x4a2   :  { %v2290_v34 = vpop.f32.mrf.mxu1 }
 0x4a3   :  { %v2309_v36 = vmul.f32 0.70710677, %v2289_v32  ;;  %v2291_v37 = vadd.f32 %v2290_v34, %v2214_v31  ;;  %v2301_v43 = vmul.f32 0.5, %v2289_v32 }
 0x4a4   :  { %v2294_v1 = vpop.f32.mrf.mxu1 }
 0x4a5   :  { %2434 = verf.f32 %v2309_v36  ;;  %v2310_v38 = vmul.f32 0.70710677, %v2291_v37  ;;  %v2295_v39 = vadd.f32 %v2294_v1, %v2218_v35  ;;  %v2302_v55 = vmul.f32 0.5, %v2291_v37 }
 0x4a6   :  { %v2296_v18 = vpop.f32.mrf.mxu1 }
 0x4a7   :  { %2436 = verf.f32 %v2310_v38  ;;  %v2313_v9 = vmul.f32 0.70710677, %v2295_v39  ;;  %v2297_v40 = vadd.f32 %v2296_v18, %v2220_v15  ;;  %v2305_v49 = vmul.f32 0.5, %v2295_v39 }
 0x4a9   :  { %2438 = verf.f32 %v2313_v9  ;;  %v2314_v12 = vmul.f32 0.70710677, %v2297_v40  ;;  %v2306_v59 = vmul.f32 0.5, %v2297_v40 }
 0x4ab   :  { %2440 = verf.f32 %v2314_v12 }
 0x4b2   :  { %v2435_v41 = vpop.eup %2434 }
 0x4b3   :  { %v2325_v44 = vadd.f32 1.0, %v2435_v41 }
 0x4b4   :  { %v2437_v45 = vpop.eup %2436 }
 0x4b5   :  { %v2333_v46 = vmul.f32 %v2325_v44, %v2301_v43  ;;  %v2326_v47 = vadd.f32 1.0, %v2437_v45 }
 0x4b6   :  { %v2439_v48 = vpop.eup %2438 }
 0x4b7   :  { %2341 = vst [vmem:[#allocation13 + $0x10] sm:$0xff] %v2333_v46  ;;  %v2334_v14 = vmul.f32 %v2326_v47, %v2302_v55  ;;  %v2329_v50 = vadd.f32 1.0, %v2439_v48 }
 0x4b8   :  { %v2441_v52 = vpop.eup %2440 }
 0x4b9   :  { %2342 = vst [vmem:[#allocation13 + $0x18] sm:$0xff] %v2334_v14  ;;  %v2337_v51 = vmul.f32 %v2329_v50, %v2305_v49  ;;  %v2330_v62 = vadd.f32 1.0, %v2441_v52 }
 0x4bb   :  { %2345 = vst [vmem:[#allocation13 + $0x30] sm:$0xff] %v2337_v51  ;;  %v2338_v20 = vmul.f32 %v2330_v62, %v2306_v59 }
 0x4bd   :  { %2346 = vst [vmem:[#allocation13 + $0x38] sm:$0xff] %v2338_v20 }
 0x4be   :  { %2573 = shalt.err (!%p2570_p6)
}
 0x4bf   :  { %2358 = dma.vmem_to_hbm [thread:$0]  %s2353_s22, 1024, %s2823_s9, [#allocation4], %s2593_s12, %s2593_s12, %s2594_s13  }
 0x4c0   :  { %2590 = dma.done.wait [#allocation4], 1024  }
 0x4c1   :  { %2591 = vsyncadd [#allocation4], 4294966272 }
 0x4c2   :  { %2362 = vsyncpa [#allocation3], 1 }
 0x4c3   :  { %2363 = vsyncpa [#allocation6], 1 }
 0x4c4   :  { %2364 = vsyncpa [#allocation9], 1 }
 0x4c5   :  { %2365 = vsyncpa [#allocation12], 1 }
 0x4c6   :  { %2366 = vsyncpa [#allocation4], 1 }

</bundles_post_ra>
